<compile_context>
chip_gen: v7x
topology: tpu7x:2x2x1
jax: 0.10.0
libtpu: 0.0.40
codegen_flags: <defaults>
</compile_context>

<pallas_src>
import jax
import jax.numpy as jnp
from jax import lax
from jax.experimental import pallas as pl
from jax.experimental.pallas import tpu as pltpu

EPS = 1e-5
GROUPS = 20
CG = 16                  # channels per conv group
C = GROUPS * CG          # 320
H = W = 14
WP = W + 2               # padded width = 16
ROWS = H * WP            # 224 rows in the W-padded flat layout
PAD = 24                 # top/bottom margin rows (covers the +/-17 tap offsets, 8-aligned)
RPAD = ROWS + 2 * PAD    # 272
SPLITS = 2               # channel halves (one per v7x TensorCore)
GPS = GROUPS // SPLITS   # 10 groups per split
CH = C // SPLITS         # 160 channels per split
NVALID = float(H * W)    # BN statistics are over H*W elements per channel (N=1)


def _bn_relu_gconv_kernel(x_ref, w_ref, gamma_ref, beta_ref, o_ref, ybuf):
    # x_ref:     (1, ROWS, CH) f32   W-padded flat activations for this half (no margin)
    # w_ref:     (1, 9, CH, CH) bf16 per-tap block-diagonal weights, (cin, cout) order
    # gamma_ref: (1, 1, CH) f32      BN scale
    # beta_ref:  (1, 1, CH) f32      BN shift
    # o_ref:     (1, ROWS, CH) f32   W-padded flat output (valid cols are 1..14 of each 16)
    # ybuf:      (RPAD, CH) f32 VMEM scratch: BN+ReLU activations with true zero padding
    x = x_ref[0]                                                    # (ROWS, CH)

    # --- BatchNorm2d (training-mode batch statistics). The W-pad columns of x are zero,
    #     so plain sums divided by H*W give the statistics over the valid elements. ---
    inv_n = 1.0 / NVALID
    mean = jnp.sum(x, axis=0, keepdims=True) * inv_n                # (1, CH)
    msq = jnp.sum(x * x, axis=0, keepdims=True) * inv_n
    var = jnp.maximum(msq - mean * mean, 0.0)                       # biased variance
    scale = gamma_ref[0] * lax.rsqrt(var + EPS)                     # (1, CH)
    shift = beta_ref[0] - mean * scale

    # --- BN affine + ReLU, then re-zero the W-padding columns (affine+ReLU of a zero
    #     input is not zero).  Columns 0 and 15 of each 16-wide padded row are padding. ---
    y = jnp.maximum(x * scale + shift, 0.0)                         # (ROWS, CH)
    col = lax.bitwise_and(lax.broadcasted_iota(jnp.int32, (ROWS, 1), 0), WP - 1)
    y = jnp.where((col >= 1) & (col <= W), y, 0.0)

    # --- stage into the margin-padded scratch (zero top/bottom margins in VMEM) ---
    ybuf[0:PAD, :] = jnp.zeros((PAD, CH), jnp.float32)
    ybuf[PAD + ROWS:RPAD, :] = jnp.zeros((PAD, CH), jnp.float32)
    ybuf[PAD:PAD + ROWS, :] = y

    # --- 3x3 grouped conv: 9 shifted-window matmuls on block-diagonal tap weights ---
    acc = None
    for t in range(9):
        dy, dx = t // 3 - 1, t % 3 - 1
        start = PAD + dy * WP + dx                                  # static, in [7, 41]
        win = ybuf[start:start + ROWS, :].astype(jnp.bfloat16)      # (ROWS, CH)
        contrib = jnp.dot(win, w_ref[0, t], preferred_element_type=jnp.float32)
        acc = contrib if acc is None else acc + contrib
    o_ref[0] = acc


@jax.jit
def bn_relu_grouped_conv(x_nchw, gamma, beta, weight):
    """x_nchw: (1, 320, 14, 14) f32; gamma/beta: (320,); weight: (320, 16, 3, 3) OIHW."""
    N = x_nchw.shape[0]
    assert x_nchw.shape == (N, C, H, W) and N == 1

    # --- activations: per-half channels-last, W-padded, flattened to (rows, channels) ---
    xs = x_nchw.reshape(SPLITS, CH, H, W).transpose(0, 2, 3, 1)      # (2, 14, 14, 160)
    xs = jnp.pad(xs, ((0, 0), (0, 0), (1, 1), (0, 0)))               # (2, 14, 16, 160)
    xs = xs.reshape(SPLITS, ROWS, CH)                                # (2, 224, 160)

    # --- weights: per-tap block-diagonal (cin, cout) matrices for each channel half ---
    w5 = weight.astype(jnp.bfloat16).reshape(GROUPS, CG, CG, 3, 3)   # (g, o, i, ky, kx)
    w5 = jnp.transpose(w5, (0, 3, 4, 2, 1))                          # (g, ky, kx, i, o)
    wg = w5.reshape(SPLITS, GPS, 9, CG, CG)                          # (s, g, t, i, o)
    eye = jnp.eye(GPS, dtype=jnp.bfloat16)
    wbd = jnp.einsum("sgtio,gh->stgiho", wg, eye)                    # exact 0/1 mask
    wbd = wbd.reshape(SPLITS, 9, CH, CH)                             # (2, 9, 160, 160)

    gg = gamma.reshape(SPLITS, 1, CH)
    bb = beta.reshape(SPLITS, 1, CH)

    out = pl.pallas_call(
        _bn_relu_gconv_kernel,
        out_shape=jax.ShapeDtypeStruct((SPLITS, ROWS, CH), jnp.float32),
        grid=(SPLITS,),
        in_specs=[
            pl.BlockSpec((1, ROWS, CH), lambda s: (s, 0, 0)),
            pl.BlockSpec((1, 9, CH, CH), lambda s: (s, 0, 0, 0)),
            pl.BlockSpec((1, 1, CH), lambda s: (s, 0, 0)),
            pl.BlockSpec((1, 1, CH), lambda s: (s, 0, 0)),
        ],
        out_specs=pl.BlockSpec((1, ROWS, CH), lambda s: (s, 0, 0)),
        scratch_shapes=[pltpu.VMEM((RPAD, CH), jnp.float32)],
        compiler_params=pltpu.CompilerParams(dimension_semantics=("parallel",)),
    )(xs, wbd, gg, bb)                                               # (2, 224, 160)

    # --- drop the W padding columns and return to NCHW ---
    out = out.reshape(SPLITS, H, WP, CH)[:, :, 1:1 + W, :]           # (2, 14, 14, 160)
    out = jnp.transpose(out, (0, 3, 1, 2)).reshape(N, C, H, W)
    return out


def _reference(x_nchw, gamma, beta, weight):
    # pure-JAX reference of the PyTorch forward (train-mode BN, N=1)
    mean = jnp.mean(x_nchw, axis=(0, 2, 3), keepdims=True)
    var = jnp.mean(jnp.square(x_nchw - mean), axis=(0, 2, 3), keepdims=True)
    y = (x_nchw - mean) * lax.rsqrt(var + EPS)
    y = y * gamma[None, :, None, None] + beta[None, :, None, None]
    y = jnp.maximum(y, 0.0)
    return lax.conv_general_dilated(
        y, weight, window_strides=(1, 1), padding=((1, 1), (1, 1)),
        dimension_numbers=("NCHW", "OIHW", "NCHW"), feature_group_count=GROUPS)


if __name__ == "__main__":
    key = jax.random.PRNGKey(0)
    k1, k2, k3, k4 = jax.random.split(key, 4)

    # shapes fixed by the module: C_in = C_out = 320, groups = 20, 3x3 kernel, 14x14 input
    x = jax.random.normal(k1, (1, C, H, W), dtype=jnp.float32)
    gamma = 1.0 + 0.1 * jax.random.normal(k2, (C,), dtype=jnp.float32)
    beta = 0.1 * jax.random.normal(k3, (C,), dtype=jnp.float32)
    weight = 0.1 * jax.random.normal(k4, (C, CG, 3, 3), dtype=jnp.float32)

    out = jax.block_until_ready(bn_relu_grouped_conv(x, gamma, beta, weight))
    ref = jax.block_until_ready(_reference(x, gamma, beta, weight))

    assert out.shape == (1, C, H, W)
    err = float(jnp.max(jnp.abs(out - ref)))
    assert err < 2e-2, f"max abs err {err}"

    print("KERNEL_OK")
</pallas_src>

<mosaic_0001>
module attributes {stable_mosaic.version = 11 : i64} {
  func.func @_bn_relu_gconv_kernel(%arg0: i32, %arg1: memref<1x224x160xf32, #tpu.memory_space<vmem>>, %arg2: memref<1x9x160x160xbf16, #tpu.memory_space<vmem>>, %arg3: memref<1x1x160xf32, #tpu.memory_space<vmem>>, %arg4: memref<1x1x160xf32, #tpu.memory_space<vmem>>, %arg5: memref<1x224x160xf32, #tpu.memory_space<vmem>>, %arg6: memref<272x160xf32, #tpu.memory_space<vmem>>) attributes {dimension_semantics = [#tpu.dimension_semantics<parallel>], iteration_bounds = array<i64: 2>, scalar_prefetch = 0 : i64, scratch_operands = 1 : i64, tpu.core_type = #tpu.core_type<tc>, window_params = [{transform_indices = @transform_0, window_bounds = array<i64: 1, 224, 160>}, {transform_indices = @transform_1, window_bounds = array<i64: 1, 9, 160, 160>}, {transform_indices = @transform_2, window_bounds = array<i64: 1, 1, 160>}, {transform_indices = @transform_3, window_bounds = array<i64: 1, 1, 160>}, {transform_indices = @transform_4, window_bounds = array<i64: 1, 224, 160>}]} {
    %c0 = arith.constant 0 : index
    %c0_0 = arith.constant 0 : index
    %c0_1 = arith.constant 0 : index
    %0 = vector.load %arg1[%c0, %c0_0, %c0_1] : memref<1x224x160xf32, #tpu.memory_space<vmem>>, vector<1x224x160xf32>
    %1 = vector.shape_cast %0 : vector<1x224x160xf32> to vector<224x160xf32>
    %cst = arith.constant dense<0.000000e+00> : vector<160xf32>
    %2 = vector.multi_reduction <add>, %1, %cst [0] : vector<224x160xf32> to vector<160xf32>
    %3 = vector.shape_cast %2 : vector<160xf32> to vector<1x160xf32>
    %cst_2 = arith.constant 0.00510204071 : f32
    %4 = vector.broadcast %cst_2 : f32 to vector<1x160xf32>
    %5 = arith.mulf %3, %4 : vector<1x160xf32>
    %6 = arith.mulf %1, %1 : vector<224x160xf32>
    %cst_3 = arith.constant dense<0.000000e+00> : vector<160xf32>
    %7 = vector.multi_reduction <add>, %6, %cst_3 [0] : vector<224x160xf32> to vector<160xf32>
    %8 = vector.shape_cast %7 : vector<160xf32> to vector<1x160xf32>
    %cst_4 = arith.constant 0.00510204071 : f32
    %9 = vector.broadcast %cst_4 : f32 to vector<1x160xf32>
    %10 = arith.mulf %8, %9 : vector<1x160xf32>
    %11 = arith.mulf %5, %5 : vector<1x160xf32>
    %12 = arith.subf %10, %11 : vector<1x160xf32>
    %cst_5 = arith.constant 0.000000e+00 : f32
    %13 = vector.broadcast %cst_5 : f32 to vector<1x160xf32>
    %14 = arith.maximumf %12, %13 : vector<1x160xf32>
    %c0_6 = arith.constant 0 : index
    %c0_7 = arith.constant 0 : index
    %c0_8 = arith.constant 0 : index
    %15 = vector.load %arg3[%c0_6, %c0_7, %c0_8] : memref<1x1x160xf32, #tpu.memory_space<vmem>>, vector<1x1x160xf32>
    %16 = vector.shape_cast %15 : vector<1x1x160xf32> to vector<1x160xf32>
    %cst_9 = arith.constant 9.99999974E-6 : f32
    %17 = vector.broadcast %cst_9 : f32 to vector<1x160xf32>
    %18 = arith.addf %14, %17 : vector<1x160xf32>
    %19 = math.rsqrt %18 : vector<1x160xf32>
    %20 = arith.mulf %16, %19 : vector<1x160xf32>
    %c0_10 = arith.constant 0 : index
    %c0_11 = arith.constant 0 : index
    %c0_12 = arith.constant 0 : index
    %21 = vector.load %arg4[%c0_10, %c0_11, %c0_12] : memref<1x1x160xf32, #tpu.memory_space<vmem>>, vector<1x1x160xf32>
    %22 = vector.shape_cast %21 : vector<1x1x160xf32> to vector<1x160xf32>
    %23 = arith.mulf %5, %20 : vector<1x160xf32>
    %24 = arith.subf %22, %23 : vector<1x160xf32>
    %25 = vector.broadcast %20 : vector<1x160xf32> to vector<224x160xf32>
    %26 = arith.mulf %1, %25 : vector<224x160xf32>
    %27 = vector.broadcast %24 : vector<1x160xf32> to vector<224x160xf32>
    %28 = arith.addf %26, %27 : vector<224x160xf32>
    %cst_13 = arith.constant 0.000000e+00 : f32
    %29 = vector.broadcast %cst_13 : f32 to vector<224x160xf32>
    %30 = arith.maximumf %28, %29 : vector<224x160xf32>
    %31 = tpu.iota {dimensions = array<i32: 0>} : vector<224x1xi32>
    %c15_i32 = arith.constant 15 : i32
    %32 = vector.broadcast %c15_i32 : i32 to vector<224x1xi32>
    %33 = arith.andi %31, %32 : vector<224x1xi32>
    %c1_i32 = arith.constant 1 : i32
    %34 = vector.broadcast %c1_i32 : i32 to vector<224x1xi32>
    %35 = arith.cmpi sge, %33, %34 : vector<224x1xi32>
    %c14_i32 = arith.constant 14 : i32
    %36 = vector.broadcast %c14_i32 : i32 to vector<224x1xi32>
    %37 = arith.cmpi sle, %33, %36 : vector<224x1xi32>
    %38 = arith.andi %35, %37 : vector<224x1xi1>
    %cst_14 = arith.constant 0.000000e+00 : f32
    %39 = vector.shape_cast %38 : vector<224x1xi1> to vector<224x1xi1>
    %40 = vector.broadcast %39 : vector<224x1xi1> to vector<224x160xi1>
    %41 = vector.broadcast %cst_14 : f32 to vector<224x160xf32>
    %42 = arith.select %40, %30, %41 : vector<224x160xi1>, vector<224x160xf32>
    %cst_15 = arith.constant 0.000000e+00 : f32
    %43 = vector.broadcast %cst_15 : f32 to vector<24x160xf32>
    %c0_16 = arith.constant 0 : index
    %c0_17 = arith.constant 0 : index
    %44 = vector.load %arg6[%c0_16, %c0_17] : memref<272x160xf32, #tpu.memory_space<vmem>>, vector<24x160xf32>
    tpu.vector_store %arg6[%c0_16, %c0_17], %43 {strides = array<i32>} : memref<272x160xf32, #tpu.memory_space<vmem>>, vector<24x160xf32>,
    %cst_18 = arith.constant 0.000000e+00 : f32
    %45 = vector.broadcast %cst_18 : f32 to vector<24x160xf32>
    %c248 = arith.constant 248 : index
    %c0_19 = arith.constant 0 : index
    %46 = vector.load %arg6[%c248, %c0_19] : memref<272x160xf32, #tpu.memory_space<vmem>>, vector<24x160xf32>
    tpu.vector_store %arg6[%c248, %c0_19], %45 {strides = array<i32>} : memref<272x160xf32, #tpu.memory_space<vmem>>, vector<24x160xf32>,
    %c24 = arith.constant 24 : index
    %c0_20 = arith.constant 0 : index
    %47 = vector.load %arg6[%c24, %c0_20] : memref<272x160xf32, #tpu.memory_space<vmem>>, vector<224x160xf32>
    tpu.vector_store %arg6[%c24, %c0_20], %42 {strides = array<i32>} : memref<272x160xf32, #tpu.memory_space<vmem>>, vector<224x160xf32>,
    %c7 = arith.constant 7 : index
    %c0_21 = arith.constant 0 : index
    %48 = vector.load %arg6[%c7, %c0_21] : memref<272x160xf32, #tpu.memory_space<vmem>>, vector<224x160xf32>
    %49 = arith.truncf %48 : vector<224x160xf32> to vector<224x160xbf16>
    %c0_22 = arith.constant 0 : index
    %c0_23 = arith.constant 0 : index
    %c0_24 = arith.constant 0 : index
    %c0_25 = arith.constant 0 : index
    %50 = vector.load %arg2[%c0_22, %c0_23, %c0_24, %c0_25] : memref<1x9x160x160xbf16, #tpu.memory_space<vmem>>, vector<1x1x160x160xbf16>
    %51 = vector.shape_cast %50 : vector<1x1x160x160xbf16> to vector<160x160xbf16>
    %cst_26 = arith.constant dense<0.000000e+00> : vector<224x160xf32>
    %52 = tpu.matmul %49, %51, %cst_26 {dimension_numbers = #tpu.dot_dimension_numbers<[1], [0], [0], [1], [0, 0, 1, 1], [], []>} : vector<224x160xbf16>, vector<160x160xbf16>, vector<224x160xf32> -> vector<224x160xf32>
    %c8 = arith.constant 8 : index
    %c0_27 = arith.constant 0 : index
    %53 = vector.load %arg6[%c8, %c0_27] : memref<272x160xf32, #tpu.memory_space<vmem>>, vector<224x160xf32>
    %54 = arith.truncf %53 : vector<224x160xf32> to vector<224x160xbf16>
    %c0_28 = arith.constant 0 : index
    %c1 = arith.constant 1 : index
    %c0_29 = arith.constant 0 : index
    %c0_30 = arith.constant 0 : index
    %55 = vector.load %arg2[%c0_28, %c1, %c0_29, %c0_30] : memref<1x9x160x160xbf16, #tpu.memory_space<vmem>>, vector<1x1x160x160xbf16>
    %56 = vector.shape_cast %55 : vector<1x1x160x160xbf16> to vector<160x160xbf16>
    %cst_31 = arith.constant dense<0.000000e+00> : vector<224x160xf32>
    %57 = tpu.matmul %54, %56, %cst_31 {dimension_numbers = #tpu.dot_dimension_numbers<[1], [0], [0], [1], [0, 0, 1, 1], [], []>} : vector<224x160xbf16>, vector<160x160xbf16>, vector<224x160xf32> -> vector<224x160xf32>
    %58 = arith.addf %52, %57 : vector<224x160xf32>
    %c9 = arith.constant 9 : index
    %c0_32 = arith.constant 0 : index
    %59 = vector.load %arg6[%c9, %c0_32] : memref<272x160xf32, #tpu.memory_space<vmem>>, vector<224x160xf32>
    %60 = arith.truncf %59 : vector<224x160xf32> to vector<224x160xbf16>
    %c0_33 = arith.constant 0 : index
    %c2 = arith.constant 2 : index
    %c0_34 = arith.constant 0 : index
    %c0_35 = arith.constant 0 : index
    %61 = vector.load %arg2[%c0_33, %c2, %c0_34, %c0_35] : memref<1x9x160x160xbf16, #tpu.memory_space<vmem>>, vector<1x1x160x160xbf16>
    %62 = vector.shape_cast %61 : vector<1x1x160x160xbf16> to vector<160x160xbf16>
    %cst_36 = arith.constant dense<0.000000e+00> : vector<224x160xf32>
    %63 = tpu.matmul %60, %62, %cst_36 {dimension_numbers = #tpu.dot_dimension_numbers<[1], [0], [0], [1], [0, 0, 1, 1], [], []>} : vector<224x160xbf16>, vector<160x160xbf16>, vector<224x160xf32> -> vector<224x160xf32>
    %64 = arith.addf %58, %63 : vector<224x160xf32>
    %c23 = arith.constant 23 : index
    %c0_37 = arith.constant 0 : index
    %65 = vector.load %arg6[%c23, %c0_37] : memref<272x160xf32, #tpu.memory_space<vmem>>, vector<224x160xf32>
    %66 = arith.truncf %65 : vector<224x160xf32> to vector<224x160xbf16>
    %c0_38 = arith.constant 0 : index
    %c3 = arith.constant 3 : index
    %c0_39 = arith.constant 0 : index
    %c0_40 = arith.constant 0 : index
    %67 = vector.load %arg2[%c0_38, %c3, %c0_39, %c0_40] : memref<1x9x160x160xbf16, #tpu.memory_space<vmem>>, vector<1x1x160x160xbf16>
    %68 = vector.shape_cast %67 : vector<1x1x160x160xbf16> to vector<160x160xbf16>
    %cst_41 = arith.constant dense<0.000000e+00> : vector<224x160xf32>
    %69 = tpu.matmul %66, %68, %cst_41 {dimension_numbers = #tpu.dot_dimension_numbers<[1], [0], [0], [1], [0, 0, 1, 1], [], []>} : vector<224x160xbf16>, vector<160x160xbf16>, vector<224x160xf32> -> vector<224x160xf32>
    %70 = arith.addf %64, %69 : vector<224x160xf32>
    %c24_42 = arith.constant 24 : index
    %c0_43 = arith.constant 0 : index
    %71 = vector.load %arg6[%c24_42, %c0_43] : memref<272x160xf32, #tpu.memory_space<vmem>>, vector<224x160xf32>
    %72 = arith.truncf %71 : vector<224x160xf32> to vector<224x160xbf16>
    %c0_44 = arith.constant 0 : index
    %c4 = arith.constant 4 : index
    %c0_45 = arith.constant 0 : index
    %c0_46 = arith.constant 0 : index
    %73 = vector.load %arg2[%c0_44, %c4, %c0_45, %c0_46] : memref<1x9x160x160xbf16, #tpu.memory_space<vmem>>, vector<1x1x160x160xbf16>
    %74 = vector.shape_cast %73 : vector<1x1x160x160xbf16> to vector<160x160xbf16>
    %cst_47 = arith.constant dense<0.000000e+00> : vector<224x160xf32>
    %75 = tpu.matmul %72, %74, %cst_47 {dimension_numbers = #tpu.dot_dimension_numbers<[1], [0], [0], [1], [0, 0, 1, 1], [], []>} : vector<224x160xbf16>, vector<160x160xbf16>, vector<224x160xf32> -> vector<224x160xf32>
    %76 = arith.addf %70, %75 : vector<224x160xf32>
    %c25 = arith.constant 25 : index
    %c0_48 = arith.constant 0 : index
    %77 = vector.load %arg6[%c25, %c0_48] : memref<272x160xf32, #tpu.memory_space<vmem>>, vector<224x160xf32>
    %78 = arith.truncf %77 : vector<224x160xf32> to vector<224x160xbf16>
    %c0_49 = arith.constant 0 : index
    %c5 = arith.constant 5 : index
    %c0_50 = arith.constant 0 : index
    %c0_51 = arith.constant 0 : index
    %79 = vector.load %arg2[%c0_49, %c5, %c0_50, %c0_51] : memref<1x9x160x160xbf16, #tpu.memory_space<vmem>>, vector<1x1x160x160xbf16>
    %80 = vector.shape_cast %79 : vector<1x1x160x160xbf16> to vector<160x160xbf16>
    %cst_52 = arith.constant dense<0.000000e+00> : vector<224x160xf32>
    %81 = tpu.matmul %78, %80, %cst_52 {dimension_numbers = #tpu.dot_dimension_numbers<[1], [0], [0], [1], [0, 0, 1, 1], [], []>} : vector<224x160xbf16>, vector<160x160xbf16>, vector<224x160xf32> -> vector<224x160xf32>
    %82 = arith.addf %76, %81 : vector<224x160xf32>
    %c39 = arith.constant 39 : index
    %c0_53 = arith.constant 0 : index
    %83 = vector.load %arg6[%c39, %c0_53] : memref<272x160xf32, #tpu.memory_space<vmem>>, vector<224x160xf32>
    %84 = arith.truncf %83 : vector<224x160xf32> to vector<224x160xbf16>
    %c0_54 = arith.constant 0 : index
    %c6 = arith.constant 6 : index
    %c0_55 = arith.constant 0 : index
    %c0_56 = arith.constant 0 : index
    %85 = vector.load %arg2[%c0_54, %c6, %c0_55, %c0_56] : memref<1x9x160x160xbf16, #tpu.memory_space<vmem>>, vector<1x1x160x160xbf16>
    %86 = vector.shape_cast %85 : vector<1x1x160x160xbf16> to vector<160x160xbf16>
    %cst_57 = arith.constant dense<0.000000e+00> : vector<224x160xf32>
    %87 = tpu.matmul %84, %86, %cst_57 {dimension_numbers = #tpu.dot_dimension_numbers<[1], [0], [0], [1], [0, 0, 1, 1], [], []>} : vector<224x160xbf16>, vector<160x160xbf16>, vector<224x160xf32> -> vector<224x160xf32>
    %88 = arith.addf %82, %87 : vector<224x160xf32>
    %c40 = arith.constant 40 : index
    %c0_58 = arith.constant 0 : index
    %89 = vector.load %arg6[%c40, %c0_58] : memref<272x160xf32, #tpu.memory_space<vmem>>, vector<224x160xf32>
    %90 = arith.truncf %89 : vector<224x160xf32> to vector<224x160xbf16>
    %c0_59 = arith.constant 0 : index
    %c7_60 = arith.constant 7 : index
    %c0_61 = arith.constant 0 : index
    %c0_62 = arith.constant 0 : index
    %91 = vector.load %arg2[%c0_59, %c7_60, %c0_61, %c0_62] : memref<1x9x160x160xbf16, #tpu.memory_space<vmem>>, vector<1x1x160x160xbf16>
    %92 = vector.shape_cast %91 : vector<1x1x160x160xbf16> to vector<160x160xbf16>
    %cst_63 = arith.constant dense<0.000000e+00> : vector<224x160xf32>
    %93 = tpu.matmul %90, %92, %cst_63 {dimension_numbers = #tpu.dot_dimension_numbers<[1], [0], [0], [1], [0, 0, 1, 1], [], []>} : vector<224x160xbf16>, vector<160x160xbf16>, vector<224x160xf32> -> vector<224x160xf32>
    %94 = arith.addf %88, %93 : vector<224x160xf32>
    %c41 = arith.constant 41 : index
    %c0_64 = arith.constant 0 : index
    %95 = vector.load %arg6[%c41, %c0_64] : memref<272x160xf32, #tpu.memory_space<vmem>>, vector<224x160xf32>
    %96 = arith.truncf %95 : vector<224x160xf32> to vector<224x160xbf16>
    %c0_65 = arith.constant 0 : index
    %c8_66 = arith.constant 8 : index
    %c0_67 = arith.constant 0 : index
    %c0_68 = arith.constant 0 : index
    %97 = vector.load %arg2[%c0_65, %c8_66, %c0_67, %c0_68] : memref<1x9x160x160xbf16, #tpu.memory_space<vmem>>, vector<1x1x160x160xbf16>
    %98 = vector.shape_cast %97 : vector<1x1x160x160xbf16> to vector<160x160xbf16>
    %cst_69 = arith.constant dense<0.000000e+00> : vector<224x160xf32>
    %99 = tpu.matmul %96, %98, %cst_69 {dimension_numbers = #tpu.dot_dimension_numbers<[1], [0], [0], [1], [0, 0, 1, 1], [], []>} : vector<224x160xbf16>, vector<160x160xbf16>, vector<224x160xf32> -> vector<224x160xf32>
    %100 = arith.addf %94, %99 : vector<224x160xf32>
    %c0_70 = arith.constant 0 : index
    %c0_71 = arith.constant 0 : index
    %c0_72 = arith.constant 0 : index
    %101 = vector.load %arg5[%c0_70, %c0_71, %c0_72] : memref<1x224x160xf32, #tpu.memory_space<vmem>>, vector<1x224x160xf32>
    %102 = vector.shape_cast %101 : vector<1x224x160xf32> to vector<224x160xf32>
    %103 = vector.shape_cast %100 : vector<224x160xf32> to vector<1x224x160xf32>
    tpu.vector_store %arg5[%c0_70, %c0_71, %c0_72], %103 {strides = array<i32>} : memref<1x224x160xf32, #tpu.memory_space<vmem>>, vector<1x224x160xf32>,
    return
  }
  func.func @transform_0(%arg0: i32) -> (i32, i32, i32) {
    %c0_i32 = arith.constant 0 : i32
    %c0_i32_0 = arith.constant 0 : i32
    %c0_i32_1 = arith.constant 0 : i32
    return %arg0, %c0_i32, %c0_i32_0 : i32, i32, i32
  }
  func.func @transform_1(%arg0: i32) -> (i32, i32, i32, i32) {
    %c0_i32 = arith.constant 0 : i32
    %c0_i32_0 = arith.constant 0 : i32
    %c0_i32_1 = arith.constant 0 : i32
    %c0_i32_2 = arith.constant 0 : i32
    return %arg0, %c0_i32, %c0_i32_0, %c0_i32_1 : i32, i32, i32, i32
  }
  func.func @transform_2(%arg0: i32) -> (i32, i32, i32) {
    %c0_i32 = arith.constant 0 : i32
    %c0_i32_0 = arith.constant 0 : i32
    %c0_i32_1 = arith.constant 0 : i32
    return %arg0, %c0_i32, %c0_i32_0 : i32, i32, i32
  }
  func.func @transform_3(%arg0: i32) -> (i32, i32, i32) {
    %c0_i32 = arith.constant 0 : i32
    %c0_i32_0 = arith.constant 0 : i32
    %c0_i32_1 = arith.constant 0 : i32
    return %arg0, %c0_i32, %c0_i32_0 : i32, i32, i32
  }
  func.func @transform_4(%arg0: i32) -> (i32, i32, i32) {
    %c0_i32 = arith.constant 0 : i32
    %c0_i32_0 = arith.constant 0 : i32
    %c0_i32_1 = arith.constant 0 : i32
    return %arg0, %c0_i32, %c0_i32_0 : i32, i32, i32
  }
}

</mosaic_0001>

<bundles_post_ra>
// kernel: bn_relu_grouped_conv.1
= control target key start
LH: loop header
LB: loop body
LE: loop exit
PB: predicated region body
PF: predicated region fallthrough
CT: control target
= control target key end

     0   :  { %s8302_s15 = smov 0   ;;  %s11537_s0 = inlined_call_operand.vmem [shape: f32[2,224,160], index: 0, kind: input, shape index: {}]   ;;  %s11538_s1 = inlined_call_operand.vmem [shape: bf16[2,9,160,160], index: 1, kind: input, shape index: {}]   ;;  %s11539_s2 = inlined_call_operand.vmem [shape: f32[2,1,160], index: 2, kind: input, shape index: {}]   ;;  %s11540_s3 = inlined_call_operand.vmem [shape: f32[2,1,160], index: 3, kind: input, shape index: {}]   ;;  %s11541_s4 = inlined_call_operand.vmem [shape: f32[2,224,160], index: 4, kind: output, shape index: {}]  }
   0x1 LB: > { %s6887_s16 = sadd.s32 4294967295, %s8272_s15   ;;  %p6891_p0 = scmp.ge.s32.totalorder %s8272_s15, 1  ;;  %s8272_s15 = sphi %s8302_s15, %s14_s15  }
   0x2   : > { %p190_p1 = scmp.lt.s32.totalorder %s8272_s15, 3 }
   0x4   : > { %p191_p2 = pnand %p6891_p0, %p190_p1 }
   0x6   : > { %194 = sbr.rel (%p191_p2) target bundleno = 905 (0x389), region = 36 }
   0xd   : > { %p229_p3 = scmp.lt.s32.totalorder %s6887_s16, 1  ;;  %vm342_vm0 = vcmask 261120  }
   0xf   : > { %s11938_s16 = smov (!%p229_p3, %s6887_s16), 1 }
  0x10   : > { %s7834_s17 = smul.u32 1440, %s11938_s16  ;;  %s6894_s25 = sshll.u32 %s11938_s16, 1 }
  0x11   : > { %s7833_s21 = smul.u32 448, %s11938_s16  ;;  %s242_s28 = scalar_lea.vmem %s11539_s2, %s6894_s25 }
  0x12   : > { %s8316_s20 = scalar_lea.vmem %s11538_s1, %s7834_s17  ;;  %s246_s5 = scalar_lea.vmem %s11540_s3, %s6894_s25 }
  0x13   : > { %v7845_v0 = vld [vmem:[%s8316_s20 + $0xa4] ss:$8 sps:$4 sm:$0xff]   ;;  %v7847_v1 = vld [vmem:[%s8316_s20 + $0xa0] ss:$8 sps:$4 sm:$0xff]   ;;  %v7848_v2 = vld [vmem:[%s8316_s20 + $0xb4] ss:$8 sps:$4 sm:$0xff]   ;;  %s8348_s24 = scalar_lea.vmem %s11537_s0, %s7833_s21  ;;  %s11437_s8 = scalar_lea.vmem %s11541_s4, %s7833_s21 }
  0x14   : > { %1422 = vmatprep.subr.bf16.mxu1 %v7845_v0  ;;  %v7850_v3 = vld [vmem:[%s8316_s20 + $0xb0] ss:$8 sps:$4 sm:$0xff]   ;;  %v7851_v4 = vld [vmem:[%s8316_s20 + $0x284] ss:$8 sps:$4 sm:$0xff]   ;;  %v7855_v6 = vld [vmem:[%s8316_s20 + $0x280] ss:$8 sps:$4 sm:$0xff]  }
  0x15   : > { %1423 = vmatpush1.bf16.msra.mxu1 %v7847_v1  ;;  %v7853_v5 = vld [vmem:[%s8316_s20 + $0xc4] ss:$8 sps:$4 sm:$0xff]   ;;  %3875 = vmatprep.subr.bf16.mxu0 %v7851_v4  ;;  %v7857_v7 = vld [vmem:[%s8316_s20 + $0x294] ss:$8 sps:$4 sm:$0xff]   ;;  %v7856_v8 = vld [vmem:[%s8316_s20 + $0xc0] ss:$8 sps:$4 sm:$0xff]  }
  0x16   : > { %1424 = vmatprep.subr.bf16.mxu1 %v7848_v2  ;;  %3876 = vmatpush1.bf16.msra.mxu0 %v7855_v6  ;;  %v7859_v9 = vld [vmem:[%s8316_s20 + $0xd4] ss:$8 sps:$4 sm:$0xff]   ;;  %v7861_v10 = vld [vmem:[%s8316_s20 + $0x290] ss:$8 sps:$4 sm:$0xff]   ;;  %v7863_v11 = vld [vmem:[%s8316_s20 + $0x2a4] ss:$8 sps:$4 sm:$0xff]  }
  0x17   : > { %3877 = vmatprep.subr.bf16.mxu0 %v7857_v7  ;;  %v7862_v12 = vld [vmem:[%s8316_s20 + $0xd0] ss:$8 sps:$4 sm:$0xff]   ;;  %v7867_v13 = vld [vmem:[%s8316_s20 + $0x2a0] ss:$8 sps:$4 sm:$0xff]   ;;  %v7869_v14 = vld [vmem:[%s8316_s20 + $0x2b4] ss:$8 sps:$4 sm:$0xff]  }
  0x18   : > { %v7865_v15 = vld [vmem:[%s8316_s20 + $0xe4] ss:$8 sps:$4 sm:$0xff]   ;;  %v7873_v16 = vld [vmem:[%s8316_s20 + $0x2b0] ss:$8 sps:$4 sm:$0xff]   ;;  %v7868_v17 = vld [vmem:[%s8316_s20 + $0xe0] ss:$8 sps:$4 sm:$0xff]  }
  0x19   : > { %1425 = vmatpush1.bf16.msra.mxu1 %v7850_v3  ;;  %v7875_v18 = vld [vmem:[%s8316_s20 + $0x2c4] ss:$8 sps:$4 sm:$0xff]   ;;  %v7871_v19 = vld [vmem:[%s8316_s20 + $0xf4] ss:$8 sps:$4 sm:$0xff]   ;;  %v7874_v20 = vld [vmem:[%s8316_s20 + $0xf0] ss:$8 sps:$4 sm:$0xff]  }
  0x1a   : > { %1426 = vmatprep.subr.bf16.mxu1 %v7853_v5  ;;  %3878 = vmatpush1.bf16.msra.mxu0 %v7861_v10  ;;  %v7879_v21 = vld [vmem:[%s8316_s20 + $0x2c0] ss:$8 sps:$4 sm:$0xff]   ;;  %v7881_v22 = vld [vmem:[%s8316_s20 + $0x2d4] ss:$8 sps:$4 sm:$0xff]   ;;  %v7877_v23 = vld [vmem:[%s8316_s20 + $0x104] ss:$8 sps:$4 sm:$0xff]  }
  0x1b   : > { %3879 = vmatprep.subr.bf16.mxu0 %v7863_v11  ;;  %v7885_v24 = vld [vmem:[%s8316_s20 + $0x2d0] ss:$8 sps:$4 sm:$0xff]   ;;  %v7880_v25 = vld [vmem:[%s8316_s20 + $0x100] ss:$8 sps:$4 sm:$0xff]   ;;  %v7883_v26 = vld [vmem:[%s8316_s20 + $0x114] ss:$8 sps:$4 sm:$0xff]  }
  0x1c   : > { %v7887_v27 = vld [vmem:[%s8316_s20 + $0x2e4] ss:$8 sps:$4 sm:$0xff]   ;;  %v8361_v30 = vld [vmem:[%s8348_s24 + $0x10] sm:$0xff]  ;;  %v8364_v31 = vld [vmem:[%s8348_s24 + $0x18] sm:$0xff] }
  0x1d   : > { %1427 = vmatpush1.bf16.msra.mxu1 %v7856_v8  ;;  %v8355_v28 = vld [vmem:[%s8348_s24] sm:$0xff]  ;;  %v8358_v29 = vld [vmem:[%s8348_s24 + $0x8] sm:$0xff]  ;;  %v8378_v37 = vld [vmem:[%s8348_s24 + $0x30] sm:$0xff]  ;;  %v344_v39 = vsel %vm342_vm0, %v8364_v31, 0.0 }
  0x1e   : > { %1428 = vmatprep.subr.bf16.mxu1 %v7859_v9  ;;  %3880 = vmatpush1.bf16.msra.mxu0 %v7867_v13  ;;  %v8367_v32 = vld [vmem:[%s8348_s24 + $0x20] sm:$0xff]  ;;  %v8370_v33 = vld [vmem:[%s8348_s24 + $0x28] sm:$0xff]  ;;  %v309_v34 = vadd.f32 %v8361_v30, %v8355_v28  ;;  %v343_v35 = vsel %vm342_vm0, %v8358_v29, 0.0  ;;  %v8381_v38 = vld [vmem:[%s8348_s24 + $0x38] sm:$0xff] }
  0x1f   : > { %3881 = vmatprep.subr.bf16.mxu0 %v7869_v14  ;;  %v7891_v36 = vld [vmem:[%s8316_s20 + $0x2e0] ss:$8 sps:$4 sm:$0xff]   ;;  %v346_v40 = vsel %vm342_vm0, %v8370_v33, 0.0  ;;  %v7886_v41 = vld [vmem:[%s8316_s20 + $0x110] ss:$8 sps:$4 sm:$0xff]   ;;  %v345_v45 = vadd.f32 %v344_v39, %v343_v35  ;;  %v348_v48 = vsel %vm342_vm0, %v8381_v38, 0.0 }
  0x20   : > { %v7893_v42 = vld [vmem:[%s8316_s20 + $0x2f4] ss:$8 sps:$4 sm:$0xff]   ;;  %v8390_v43 = vld [vmem:[%s8348_s24 + $0x48] sm:$0xff]  ;;  %v310_v44 = vadd.f32 %v309_v34, %v8367_v32  ;;  %v8395_v47 = vld [vmem:[%s8348_s24 + $0x40] sm:$0xff] }
  0x21   : > { %1429 = vmatpush1.bf16.msra.mxu1 %v7862_v12  ;;  %v7889_v46 = vld [vmem:[%s8316_s20 + $0x124] ss:$8 sps:$4 sm:$0xff]   ;;  %v8400_v49 = vld [vmem:[%s8348_s24 + $0x58] sm:$0xff]  ;;  %v347_v51 = vadd.f32 %v346_v40, %v345_v45  ;;  %v8405_v53 = vld [vmem:[%s8348_s24 + $0x50] sm:$0xff]  ;;  %v350_v54 = vsel %vm342_vm0, %v8390_v43, 0.0 }
  0x22   : > { %1430 = vmatprep.subr.bf16.mxu1 %v7865_v15  ;;  %3882 = vmatpush1.bf16.msra.mxu0 %v7873_v16  ;;  %v311_v50 = vadd.f32 %v310_v44, %v8378_v37  ;;  %v7897_v52 = vld [vmem:[%s8316_s20 + $0x2f0] ss:$8 sps:$4 sm:$0xff]   ;;  %v7892_v55 = vld [vmem:[%s8316_s20 + $0x120] ss:$8 sps:$4 sm:$0xff]   ;;  %v7895_v59 = vld [vmem:[%s8316_s20 + $0x134] ss:$8 sps:$4 sm:$0xff]  }
  0x23   : > { %3883 = vmatprep.subr.bf16.mxu0 %v7875_v18  ;;  %v8411_v56 = vld [vmem:[%s8348_s24 + $0x68] sm:$0xff]  ;;  %v349_v58 = vadd.f32 %v348_v48, %v347_v51  ;;  %v8416_v60 = vld [vmem:[%s8348_s24 + $0x60] sm:$0xff]  ;;  %v352_v61 = vsel %vm342_vm0, %v8400_v49, 0.0  ;;  %v8421_v62 = vld [vmem:[%s8348_s24 + $0x78] sm:$0xff] }
  0x24   : > { %v312_v57 = vadd.f32 %v311_v50, %v8395_v47  ;;  %v8425_v1 = vld [vmem:[%s8348_s24 + $0x70] sm:$0xff]  ;;  %v354_v2 = vsel %vm342_vm0, %v8411_v56, 0.0  ;;  %v8431_v4 = vld [vmem:[%s8348_s24 + $0x88] sm:$0xff]  ;;  %v8435_v7 = vld [vmem:[%s8348_s24 + $0x80] sm:$0xff]  ;;  %v356_v8 = vsel %vm342_vm0, %v8421_v62, 0.0 }
  0x25   : > { %1431 = vmatpush1.bf16.msra.mxu1 %v7868_v17  ;;  %v351_v0 = vadd.f32 %v350_v54, %v349_v58  ;;  %v7898_v3 = vld [vmem:[%s8316_s20 + $0x130] ss:$8 sps:$4 sm:$0xff]   ;;  %v358_v13 = vsel %vm342_vm0, %v8431_v4, 0.0  ;;  %v8449_v14 = vld [vmem:[%s8348_s24 + $0xa8] sm:$0xff]  ;;  %v8453_v17 = vld [vmem:[%s8348_s24 + $0xa0] sm:$0xff]  ;;  %v408_v58 = vmul.f32 %v8361_v30, %v8361_v30  ;;  %v410_v30 = vmul.f32 %v8367_v32, %v8367_v32 }
  0x26   : > { %1432 = vmatprep.subr.bf16.mxu1 %v7871_v19  ;;  %3884 = vmatpush1.bf16.msra.mxu0 %v7879_v21  ;;  %v313_v63 = vadd.f32 %v312_v57, %v8405_v53  ;;  %v8440_v9 = vld [vmem:[%s8348_s24 + $0x98] sm:$0xff]  ;;  %v8444_v12 = vld [vmem:[%s8348_s24 + $0x90] sm:$0xff]  ;;  %v7899_v35 = vld [vmem:[%s8316_s20 + $0x304] ss:$8 sps:$4 sm:$0xff]   ;;  %v406_v57 = vmul.f32 %v8355_v28, %v8355_v28  ;;  %v414_v32 = vmul.f32 %v8395_v47, %v8395_v47 }
  0x27   : > { %3885 = vmatprep.subr.bf16.mxu0 %v7881_v22  ;;  %v353_v6 = vadd.f32 %v352_v61, %v351_v0  ;;  %v360_v18 = vsel %vm342_vm0, %v8440_v9, 0.0  ;;  %v8458_v19 = vld [vmem:[%s8348_s24 + $0xb8] sm:$0xff]  ;;  %v8462_v22 = vld [vmem:[%s8348_s24 + $0xb0] sm:$0xff]  ;;  %v7901_v40 = vld [vmem:[%s8316_s20 + $0x300] ss:$8 sps:$4 sm:$0xff]   ;;  %v409_v0 = vmul.f32 %v8364_v31, %v8364_v31 }
  0x28   : > { %v314_v5 = vadd.f32 %v313_v63, %v8416_v60  ;;  %v364_v39 = vsel %vm342_vm0, %v8458_v19, 0.0  ;;  %v7902_v45 = vld [vmem:[%s8316_s20 + $0x314] ss:$8 sps:$4 sm:$0xff]   ;;  %v8490_v48 = vld [vmem:[%s8348_s24 + $0xe0] sm:$0xff]  ;;  %v407_v63 = vmul.f32 %v8358_v29, %v8358_v29  ;;  %v8525_v31 = vld [vmem:[%s8348_s24 + $0x108] sm:$0xff] }
  0x29   : > { %1433 = vmatpush1.bf16.msra.mxu1 %v7874_v20  ;;  %v355_v11 = vadd.f32 %v354_v2, %v353_v6  ;;  %v8495_v51 = vld [vmem:[%s8348_s24 + $0xf8] sm:$0xff]  ;;  %v8510_v2 = vld [vmem:[%s8348_s24 + $0xf0] sm:$0xff]  ;;  %v7907_v29 = vld [vmem:[%s8316_s20 + $0x4] ss:$8 sps:$4 sm:$0xff]  }
  0x2a   : > { %1434 = vmatprep.subr.bf16.mxu1 %v7877_v23  ;;  %3886 = vmatpush1.bf16.msra.mxu0 %v7885_v24  ;;  %v315_v10 = vadd.f32 %v314_v5, %v8425_v1  ;;  %v8465_v23 = vld [vmem:[%s8348_s24 + $0xc0] sm:$0xff]  ;;  %v8468_v24 = vld [vmem:[%s8348_s24 + $0xc8] sm:$0xff]  ;;  %v412_v5 = vmul.f32 %v8378_v37, %v8378_v37  ;;  %v8537_v37 = vld [vmem:[%s8348_s24 + $0x118] sm:$0xff] }
  0x2b   : > { %3887 = vmatprep.subr.bf16.mxu0 %v7887_v27  ;;  %v357_v16 = vadd.f32 %v356_v8, %v355_v11  ;;  %v366_v50 = vsel %vm342_vm0, %v8468_v24, 0.0  ;;  %v8522_v6 = vld [vmem:[%s8348_s24 + $0x100] sm:$0xff]  ;;  %v413_v11 = vmul.f32 %v8381_v38, %v8381_v38  ;;  %v8546_v38 = vld [vmem:[%s8348_s24 + $0x128] sm:$0xff] }
  0x2c   : > { %v316_v15 = vadd.f32 %v315_v10, %v8435_v7 }
  0x2d   : > { %1435 = vmatpush1.bf16.msra.mxu1 %v7880_v25  ;;  %v359_v21 = vadd.f32 %v358_v13, %v357_v16  ;;  %v362_v25 = vsel %vm342_vm0, %v8449_v14, 0.0  ;;  %v8534_v13 = vld [vmem:[%s8348_s24 + $0x110] sm:$0xff]  ;;  %v415_v16 = vmul.f32 %v8390_v43, %v8390_v43  ;;  %v374_v43 = vsel %vm342_vm0, %v8525_v31, 0.0 }
  0x2e   : > { %1436 = vmatprep.subr.bf16.mxu1 %v7883_v26  ;;  %3888 = vmatpush1.bf16.msra.mxu0 %v7891_v36  ;;  %v317_v20 = vadd.f32 %v316_v15, %v8444_v12  ;;  %v8473_v26 = vld [vmem:[%s8348_s24 + $0xd8] sm:$0xff]  ;;  %v8478_v36 = vld [vmem:[%s8348_s24 + $0xd0] sm:$0xff]  ;;  %v372_v15 = vsel %vm342_vm0, %v8495_v51, 0.0 }
  0x2f   : > { %3889 = vmatprep.subr.bf16.mxu0 %v7893_v42  ;;  %v361_v34 = vadd.f32 %v360_v18, %v359_v21  ;;  %v416_v18 = vmul.f32 %v8405_v53, %v8405_v53 }
  0x30   : > { %v318_v27 = vadd.f32 %v317_v20, %v8453_v17  ;;  %v462_v20 = vadd.f32 %v408_v58, %v406_v57 }
  0x31   : > { %1437 = vmatpush1.bf16.msra.mxu1 %v7886_v41  ;;  %v8484_v41 = vld [vmem:[%s8348_s24 + $0xe8] sm:$0xff]  ;;  %v363_v44 = vadd.f32 %v362_v25, %v361_v34  ;;  %v495_v25 = vsel %vm342_vm0, %v407_v63, 0.0  ;;  %v8552_v34 = vld [vmem:[%s8348_s24 + $0x120] sm:$0xff] }
  0x32   : > { %1438 = vmatprep.subr.bf16.mxu1 %v7889_v46  ;;  %3890 = vmatpush1.bf16.msra.mxu0 %v7897_v52  ;;  %v319_v42 = vadd.f32 %v318_v27, %v8462_v22  ;;  %v7904_v46 = vld [vmem:[%s8316_s20 + $0x310] ss:$8 sps:$4 sm:$0xff]   ;;  %v370_v28 = vsel %vm342_vm0, %v8484_v41, 0.0  ;;  %v496_v27 = vsel %vm342_vm0, %v409_v0, 0.0  ;;  %v8576_v63 = vld [vmem:[%s8348_s24 + $0x140] sm:$0xff]  ;;  %v8579_v0 = vld [vmem:[%s8348_s24 + $0x148] sm:$0xff] }
  0x33   : > { %3891 = vmatprep.subr.bf16.mxu0 %v7899_v35  ;;  %v365_v54 = vadd.f32 %v364_v39, %v363_v44  ;;  %v463_v35 = vadd.f32 %v462_v20, %v410_v30  ;;  %v497_v53 = vadd.f32 %v496_v27, %v495_v25  ;;  %v417_v44 = vmul.f32 %v8400_v49, %v8400_v49  ;;  %v8607_v25 = vld [vmem:[%s8348_s24 + $0x160] sm:$0xff] }
  0x34   : > { %v320_v52 = vadd.f32 %v319_v42, %v8465_v23  ;;  %v419_v49 = vmul.f32 %v8411_v56, %v8411_v56  ;;  %v382_v27 = vsel %vm342_vm0, %v8579_v0, 0.0 }
  0x35   : > { %1439 = vmatpush1.bf16.msra.mxu1 %v7892_v55  ;;  %v368_v55 = vsel %vm342_vm0, %v8473_v26, 0.0  ;;  %v367_v61 = vadd.f32 %v366_v50, %v365_v54  ;;  %v418_v50 = vmul.f32 %v8416_v60, %v8416_v60  ;;  %v378_v60 = vsel %vm342_vm0, %v8546_v38, 0.0 }
  0x36   : > { %1440 = vmatprep.subr.bf16.mxu1 %v7895_v59  ;;  %3892 = vmatpush1.bf16.msra.mxu0 %v7901_v40  ;;  %v321_v59 = vadd.f32 %v320_v52, %v8478_v36  ;;  %v464_v52 = vadd.f32 %v463_v35, %v412_v5  ;;  %v8586_v5 = vld [vmem:[%s8348_s24 + $0x158] sm:$0xff] }
  0x37   : > { %3893 = vmatprep.subr.bf16.mxu0 %v7902_v45  ;;  %v369_v10 = vadd.f32 %v368_v55, %v367_v61  ;;  %v500_v45 = vsel %vm342_vm0, %v413_v11, 0.0  ;;  %v8566_v55 = vld [vmem:[%s8348_s24 + $0x138] sm:$0xff]  ;;  %v8573_v61 = vld [vmem:[%s8348_s24 + $0x130] sm:$0xff] }
  0x38   : > { %v322_v8 = vadd.f32 %v321_v59, %v8490_v48  ;;  %v502_v59 = vsel %vm342_vm0, %v415_v16, 0.0  ;;  %v465_v30 = vadd.f32 %v464_v52, %v414_v32  ;;  %v8593_v11 = vld [vmem:[%s8348_s24 + $0x150] sm:$0xff]  ;;  %v8600_v16 = vld [vmem:[%s8348_s24 + $0x168] sm:$0xff] }
  0x39   : > { %1441 = vmatpush1.bf16.msra.mxu1 %v7898_v3  ;;  %v411_v3 = vmul.f32 %v8370_v33, %v8370_v33  ;;  %v7910_v33 = vld [vmem:[%s8316_s20 + $0x324] ss:$8 sps:$4 sm:$0xff]   ;;  %v371_v21 = vadd.f32 %v370_v28, %v369_v10  ;;  %v420_v28 = vmul.f32 %v8425_v1, %v8425_v1  ;;  %v504_v10 = vsel %vm342_vm0, %v417_v44, 0.0 }
  0x3a   : > { %3894 = vmatpush1.bf16.msra.mxu0 %v7904_v46  ;;  %2020 = vmatprep.subr.bf16.mxu1 %v7907_v29  ;;  %v323_v47 = vadd.f32 %v322_v8, %v8510_v2  ;;  %v376_v46 = vsel %vm342_vm0, %v8537_v37, 0.0  ;;  %v421_v8 = vmul.f32 %v8421_v62, %v8421_v62  ;;  %v422_v1 = vmul.f32 %v8435_v7, %v8435_v7 }
  0x3b   : > { %4601 = vmatprep.subr.bf16.mxu0 %v7910_v33  ;;  %v498_v39 = vsel %vm342_vm0, %v411_v3, 0.0  ;;  %v373_v42 = vadd.f32 %v372_v15, %v371_v21  ;;  %v380_v33 = vsel %vm342_vm0, %v8566_v55, 0.0  ;;  %v466_v32 = vadd.f32 %v465_v30, %v416_v18 }
  0x3c   : > { %v324_v40 = vadd.f32 %v323_v47, %v8522_v6  ;;  %v499_v54 = vadd.f32 %v498_v39, %v497_v53  ;;  %v423_v62 = vmul.f32 %v8431_v4, %v8431_v4  ;;  %v506_v21 = vsel %vm342_vm0, %v419_v49, 0.0 }
  0x3d   : > { %v375_v58 = vadd.f32 %v374_v43, %v373_v42  ;;  %v424_v7 = vmul.f32 %v8444_v12, %v8444_v12  ;;  %v467_v18 = vadd.f32 %v466_v32, %v418_v50  ;;  %v425_v39 = vmul.f32 %v8440_v9, %v8440_v9 }
  0x3e   : > { %v325_v57 = vadd.f32 %v324_v40, %v8534_v13  ;;  %v501_v3 = vadd.f32 %v500_v45, %v499_v54  ;;  %v508_v4 = vsel %vm342_vm0, %v421_v8, 0.0  ;;  %v384_v40 = vsel %vm342_vm0, %v8586_v5, 0.0  ;;  %v8622_v45 = vld [vmem:[%s8348_s24 + $0x178] sm:$0xff]  ;;  %v8629_v54 = vld [vmem:[%s8348_s24 + $0x170] sm:$0xff] }
  0x3f   : > { %v377_v29 = vadd.f32 %v376_v46, %v375_v58  ;;  %v426_v42 = vmul.f32 %v8453_v17, %v8453_v17  ;;  %v468_v12 = vadd.f32 %v467_v18, %v420_v28  ;;  %v427_v9 = vmul.f32 %v8449_v14, %v8449_v14 }
  0x40   : > { %v326_v56 = vadd.f32 %v325_v57, %v8552_v34  ;;  %v503_v15 = vadd.f32 %v502_v59, %v501_v3  ;;  %v510_v52 = vsel %vm342_vm0, %v423_v62, 0.0  ;;  %v386_v57 = vsel %vm342_vm0, %v8600_v16, 0.0  ;;  %v8636_v59 = vld [vmem:[%s8348_s24 + $0x180] sm:$0xff] }
  0x41   : > { %v379_v47 = vadd.f32 %v378_v60, %v377_v29  ;;  %v428_v17 = vmul.f32 %v8462_v22, %v8462_v22  ;;  %v469_v58 = vadd.f32 %v468_v12, %v422_v1  ;;  %v8639_v60 = vld [vmem:[%s8348_s24 + $0x188] sm:$0xff]  ;;  %v429_v14 = vmul.f32 %v8458_v19, %v8458_v19  ;;  %v8670_v19 = vld [vmem:[%s8348_s24 + $0x198] sm:$0xff] }
  0x42   : > { %v327_v20 = vadd.f32 %v326_v56, %v8573_v61  ;;  %v505_v43 = vadd.f32 %v504_v10, %v503_v15  ;;  %v512_v3 = vsel %vm342_vm0, %v425_v39, 0.0  ;;  %v388_v56 = vsel %vm342_vm0, %v8622_v45, 0.0 }
  0x43   : > { %v381_v53 = vadd.f32 %v380_v33, %v379_v47  ;;  %v470_v29 = vadd.f32 %v469_v58, %v424_v7  ;;  %v431_v33 = vmul.f32 %v8468_v24, %v8468_v24  ;;  %v514_v1 = vsel %vm342_vm0, %v427_v9, 0.0 }
  0x44   : > { %v328_v35 = vadd.f32 %v327_v20, %v8576_v63  ;;  %v507_v44 = vadd.f32 %v506_v21, %v505_v43  ;;  %v8274_v32 = vmov 0.0   ;;  %v430_v24 = vmul.f32 %v8465_v23, %v8465_v23  ;;  %v8683_v23 = vld [vmem:[%s8348_s24 + $0x190] sm:$0xff] }
  0x45   : > { %v383_v50 = vadd.f32 %v382_v27, %v381_v53  ;;  %1054 = vst.msk [vmem:[#allocation2 + $0x8] sm:$0xff] %vm342_vm0, %v8274_v32  ;;  %1056 = vst.msk [vmem:[#allocation2 + $0x18] sm:$0xff] %vm342_vm0, %v8274_v32  ;;  %v471_v15 = vadd.f32 %v470_v29, %v426_v42  ;;  %v390_v62 = vsel %vm342_vm0, %v8639_v60, 0.0  ;;  %v433_v21 = vmul.f32 %v8473_v26, %v8473_v26 }
  0x46   : > { %v329_v46 = vadd.f32 %v328_v35, %v8593_v11  ;;  %v509_v49 = vadd.f32 %v508_v4, %v507_v44  ;;  %1058 = vst.msk [vmem:[#allocation2 + $0x28] sm:$0xff] %vm342_vm0, %v8274_v32  ;;  %1053 = vst [vmem:[#allocation2] sm:$0xff] %v8274_v32  ;;  %v516_v27 = vsel %vm342_vm0, %v429_v14, 0.0  ;;  %v432_v18 = vmul.f32 %v8478_v36, %v8478_v36 }
  0x47   : > { %v385_v30 = vadd.f32 %v384_v40, %v383_v50  ;;  %1055 = vst [vmem:[#allocation2 + $0x10] sm:$0xff] %v8274_v32  ;;  %1057 = vst [vmem:[#allocation2 + $0x20] sm:$0xff] %v8274_v32  ;;  %v472_v43 = vadd.f32 %v471_v15, %v428_v17  ;;  %v435_v53 = vmul.f32 %v8484_v41, %v8484_v41  ;;  %v518_v39 = vsel %vm342_vm0, %v431_v33, 0.0  ;;  %v8704_v17 = vld [vmem:[%s8348_s24 + $0x1a0] sm:$0xff]  ;;  %v8727_v15 = vld [vmem:[%s8348_s24 + $0x1b0] sm:$0xff] }
  0x48   : > { %v330_v28 = vadd.f32 %v329_v46, %v8607_v25  ;;  %v511_v8 = vadd.f32 %v510_v52, %v509_v49  ;;  %1059 = vst [vmem:[#allocation2 + $0x1f0] sm:$0xff] %v8274_v32  ;;  %1060 = vst.msk [vmem:[#allocation2 + $0x1f8] sm:$0xff] %vm342_vm0, %v8274_v32  ;;  %v434_v26 = vmul.f32 %v8490_v48, %v8490_v48  ;;  %v392_v36 = vsel %vm342_vm0, %v8670_v19, 0.0  ;;  %v8698_v46 = vld [vmem:[%s8348_s24 + $0x1a8] sm:$0xff] }
  0x49   : > { %v387_v10 = vadd.f32 %v386_v57, %v385_v30  ;;  %1061 = vst [vmem:[#allocation2 + $0x200] sm:$0xff] %v8274_v32  ;;  %1062 = vst.msk [vmem:[#allocation2 + $0x208] sm:$0xff] %vm342_vm0, %v8274_v32  ;;  %v473_v40 = vadd.f32 %v472_v43, %v430_v24  ;;  %v436_v12 = vmul.f32 %v8510_v2, %v8510_v2  ;;  %v520_v44 = vsel %vm342_vm0, %v433_v21, 0.0  ;;  %v7905_v49 = vld [vmem:[%s8316_s20] ss:$8 sps:$4 sm:$0xff]   ;;  %v8713_v30 = vld [vmem:[%s8348_s24 + $0x1b8] sm:$0xff] }
  0x4a   : > { %v331_v22 = vadd.f32 %v330_v28, %v8629_v54  ;;  %1063 = vst [vmem:[#allocation2 + $0x210] sm:$0xff] %v8274_v32  ;;  %1064 = vst.msk [vmem:[#allocation2 + $0x218] sm:$0xff] %vm342_vm0, %v8274_v32  ;;  %v513_v20 = vadd.f32 %v512_v3, %v511_v8  ;;  %v437_v41 = vmul.f32 %v8495_v51, %v8495_v51  ;;  %v522_v2 = vsel %vm342_vm0, %v435_v53, 0.0  ;;  %v7916_v28 = vld [vmem:[%s8316_s20 + $0x14] ss:$8 sps:$4 sm:$0xff]  }
  0x4b   : > { %v389_v47 = vadd.f32 %v388_v56, %v387_v10  ;;  %v474_v50 = vadd.f32 %v473_v40, %v432_v18  ;;  %v439_v58 = vmul.f32 %v8525_v31, %v8525_v31  ;;  %v438_v3 = vmul.f32 %v8522_v6, %v8522_v6 }
  0x4c   : > { %v332_v7 = vadd.f32 %v331_v22, %v8636_v59  ;;  %v515_v35 = vadd.f32 %v514_v1, %v513_v20  ;;  %v8701_v52 = vld [vmem:[#allocation2 + $0x18] sm:$0xff]  ;;  %v394_v8 = vsel %vm342_vm0, %v8698_v46, 0.0  ;;  %v441_v31 = vmul.f32 %v8537_v37, %v8537_v37 }
  0x4d   : > { %v391_v4 = vadd.f32 %v390_v62, %v389_v47  ;;  %v1126_v57 = vld [vmem:[#allocation2 + $0x28] sm:$0xff]  ;;  %v475_v56 = vadd.f32 %v474_v50, %v434_v26  ;;  %v524_v22 = vsel %vm342_vm0, %v437_v41, 0.0  ;;  %v440_v33 = vmul.f32 %v8534_v13, %v8534_v13  ;;  %v7914_v47 = vld [vmem:[%s8316_s20 + $0x10] ss:$8 sps:$4 sm:$0xff]   ;;  %v7934_v26 = vld [vmem:[%s8316_s20 + $0x34] ss:$8 sps:$4 sm:$0xff]  }
  0x4e   : > { %v517_v42 = vadd.f32 %v516_v27, %v515_v35  ;;  %v333_v48 = vadd.f32 %v332_v7, %v8683_v23  ;;  %v1232_v51 = vpack.c.bf16 %v1126_v57, %v8701_v52  ;;  %v8275_v24 = vmov 0.0|0.0   ;;  %v7925_v7 = vld [vmem:[%s8316_s20 + $0x24] ss:$8 sps:$4 sm:$0xff]  }
  0x4f   : > { %v393_v14 = vadd.f32 %v392_v36, %v391_v4  ;;  %v476_v6 = vadd.f32 %v475_v56, %v436_v12  ;;  %v443_v20 = vmul.f32 %v8546_v38, %v8546_v38  ;;  %v526_v37 = vsel %vm342_vm0, %v439_v58, 0.0  ;;  %v7932_v58 = vld [vmem:[%s8316_s20 + $0x30] ss:$8 sps:$4 sm:$0xff]  }
  0x50   : > { %v519_v9 = vadd.f32 %v518_v39, %v517_v42  ;;  %6937 = vmatprep.mubr.msk.bf16.mxu1 %vm342_vm0, %v1232_v51  ;;  %v334_v10 = vadd.f32 %v333_v48, %v8704_v17  ;;  %v442_v21 = vmul.f32 %v8552_v34, %v8552_v34  ;;  %v396_v18 = vsel %vm342_vm0, %v8713_v30, 0.0  ;;  %v7923_v34 = vld [vmem:[%s8316_s20 + $0x20] ss:$8 sps:$4 sm:$0xff]  }
  0x51   : > { %1455 = vmatmul.mubr.bf16.vlgmr.msra.gmra.mrb[0].mxu1 %v8275_v24  ;;  %v395_v62 = vadd.f32 %v394_v8, %v393_v14  ;;  %v477_v13 = vadd.f32 %v476_v6, %v438_v3  ;;  %v445_v38 = vmul.f32 %v8566_v55, %v8566_v55  ;;  %v528_v43 = vsel %vm342_vm0, %v441_v31, 0.0  ;;  %v7941_v31 = vld [vmem:[%s8316_s20 + $0x40] ss:$8 sps:$4 sm:$0xff]  }
  0x52   : > { %v521_v29 = vadd.f32 %v520_v44, %v519_v9  ;;  %2021 = vmatpush1.bf16.msra.mxu1 %v7905_v49  ;;  %v335_v35 = vadd.f32 %v334_v10, %v8727_v15  ;;  %v444_v53 = vmul.f32 %v8573_v61, %v8573_v61  ;;  %v447_v40 = vmul.f32 %v8579_v0, %v8579_v0 }
  0x53   : > { %2022 = vmatprep.subr.bf16.mxu1 %v7916_v28  ;;  %v478_v39 = vadd.f32 %v477_v13, %v440_v33  ;;  %v530_v42 = vsel %vm342_vm0, %v443_v20, 0.0  ;;  %v397_v36 = vadd.f32 %v396_v18, %v395_v62  ;;  %v446_v55 = vmul.f32 %v8576_v63, %v8576_v63  ;;  %v7943_v28 = vld [vmem:[%s8316_s20 + $0x44] ss:$8 sps:$4 sm:$0xff]   ;;  %v7950_v13 = vld [vmem:[%s8316_s20 + $0x50] ss:$8 sps:$4 sm:$0xff]  }
  0x54   : > { %v523_v1 = vadd.f32 %v522_v2, %v521_v29  ;;  %v449_v61 = vmul.f32 %v8586_v5, %v8586_v5  ;;  %v532_v44 = vsel %vm342_vm0, %v445_v38, 0.0  ;;  %v336_v48 = vrot.slane %v335_v35, 4 }
  0x55   : > { %v479_v12 = vadd.f32 %v478_v39, %v442_v21  ;;  %v448_v0 = vmul.f32 %v8593_v11, %v8593_v11  ;;  %v451_v57 = vmul.f32 %v8600_v16, %v8600_v16  ;;  %v534_v63 = vsel %vm342_vm0, %v447_v40, 0.0 }
  0x56   : > { %v525_v27 = vadd.f32 %v524_v22, %v523_v1  ;;  %2023 = vmatpush1.bf16.msra.mxu1 %v7914_v47  ;;  %v398_v2 = vrot.slane %v397_v36, 4  ;;  %v450_v5 = vmul.f32 %v8607_v25, %v8607_v25  ;;  %v453_v11 = vmul.f32 %v8622_v45, %v8622_v45 }
  0x57   : > { %2024 = vmatprep.subr.bf16.mxu1 %v7925_v7  ;;  %v480_v50 = vadd.f32 %v479_v12, %v444_v53  ;;  %v536_v14 = vsel %vm342_vm0, %v449_v61, 0.0  ;;  %v337_v3 = vadd.f32 %v336_v48, %v335_v35  ;;  %v452_v16 = vmul.f32 %v8629_v54, %v8629_v54 }
  0x58   : > { %v527_v4 = vadd.f32 %v526_v37, %v525_v27  ;;  %v455_v8 = vmul.f32 %v8639_v60, %v8639_v60  ;;  %v538_v25 = vsel %vm342_vm0, %v451_v57, 0.0  ;;  %v399_v22 = vadd.f32 %v398_v2, %v397_v36  ;;  %v7952_v27 = vld [vmem:[%s8316_s20 + $0x54] ss:$8 sps:$4 sm:$0xff]   ;;  %v7958_v57 = vld [vmem:[%s8316_s20 + $0x64] ss:$8 sps:$4 sm:$0xff]  }
  0x59   : > { %v481_v51 = vadd.f32 %v480_v50, %v446_v55  ;;  %v454_v10 = vmul.f32 %v8636_v59, %v8636_v59  ;;  %v457_v54 = vmul.f32 %v8670_v19, %v8670_v19  ;;  %v540_v6 = vsel %vm342_vm0, %v453_v11, 0.0 }
  0x5a   : > { %v529_v41 = vadd.f32 %v528_v43, %v527_v4  ;;  %2025 = vmatpush1.bf16.msra.mxu1 %v7923_v34  ;;  %v338_v1 = vrot.slane %v337_v3, 2  ;;  %v456_v60 = vmul.f32 %v8683_v23, %v8683_v23  ;;  %v459_v37 = vmul.f32 %v8698_v46, %v8698_v46 }
  0x5b   : > { %2026 = vmatprep.subr.bf16.mxu1 %v7934_v26  ;;  %v482_v56 = vadd.f32 %v481_v51, %v448_v0  ;;  %v542_v59 = vsel %vm342_vm0, %v455_v8, 0.0  ;;  %v400_v47 = vrot.slane %v399_v22, 2  ;;  %v458_v62 = vmul.f32 %v8704_v17, %v8704_v17 }
  0x5c   : > { %v531_v9 = vadd.f32 %v530_v42, %v529_v41  ;;  %v461_v7 = vmul.f32 %v8713_v30, %v8713_v30  ;;  %v544_v23 = vsel %vm342_vm0, %v457_v54, 0.0  ;;  %v339_v18 = vadd.f32 %v338_v1, %v337_v3 }
  0x5d   : > { %v483_v45 = vadd.f32 %v482_v56, %v450_v5  ;;  %v460_v46 = vmul.f32 %v8727_v15, %v8727_v15  ;;  %v546_v35 = vsel %vm342_vm0, %v459_v37, 0.0  ;;  %v401_v17 = vadd.f32 %v400_v47, %v399_v22  ;;  %v7962_v56 = vld [vmem:[%s8316_s20 + $0x70] ss:$8 sps:$4 sm:$0xff]   ;;  %v7970_v37 = vld [vmem:[%s8316_s20 + $0x84] ss:$8 sps:$4 sm:$0xff]  }
  0x5e   : > { %v533_v49 = vadd.f32 %v532_v44, %v531_v9  ;;  %2027 = vmatpush1.bf16.msra.mxu1 %v7932_v58  ;;  %v548_v4 = vsel %vm342_vm0, %v461_v7, 0.0  ;;  %v340_v34 = vrot.slane %v339_v18, 1  ;;  %v7956_v9 = vld [vmem:[%s8316_s20 + $0x60] ss:$8 sps:$4 sm:$0xff]   ;;  %v575_v54 = vlaneseq }
  0x5f   : > { %2028 = vmatprep.subr.bf16.mxu1 %v7943_v28  ;;  %v484_v24 = vadd.f32 %v483_v45, %v452_v16  ;;  %v402_v40 = vrot.slane %v401_v17, 1  ;;  %v8276_v45 = vmov 1966171168  }
  0x60   : > { %v535_v29 = vadd.f32 %v534_v63, %v533_v49  ;;  %v341_v15 = vadd.f32 %v340_v34, %v339_v18  ;;  %v8797_v1 = vshrl.u32 %v575_v54, 7  ;;  %v7976_v18 = vld [vmem:[%s8316_s20 + $0x94] ss:$8 sps:$4 sm:$0xff]   ;;  %v1122_v34 = vld [vmem:[#allocation2 + $0x8] sm:$0x80] }
  0x61   : > { %v485_v21 = vadd.f32 %v484_v24, %v454_v10  ;;  %v403_v41 = vadd.f32 %v402_v40, %v401_v17  ;;  %v8125_v54 = vld [vmem:[%s8348_s24 + $0x10] sm:$0xff] }
  0x62   : > { %v537_v33 = vadd.f32 %v536_v14, %v535_v29  ;;  %2029 = vmatpush1.bf16.msra.mxu1 %v7941_v31  ;;  %v404_v48 = vmul.f32 0.0051020407, %v341_v15  ;;  %v7964_v29 = vld [vmem:[%s8316_s20 + $0x74] ss:$8 sps:$4 sm:$0xff]   ;;  %11649 = vst [vmem:[#allocation3_spill] sm:$0xff] %v8797_v1  ;;  %v804_v17 = vadd.s32 24, %v8797_v1 }
  0x63   : > { %v486_v38 = vadd.f32 %v485_v21, %v456_v60  ;;  %2030 = vmatprep.subr.bf16.mxu1 %v7952_v27  ;;  %v405_v63 = vmul.f32 0.0051020407, %v403_v41  ;;  %v564_v21 = vld [vmem:[%s242_s28] sm:$0x3]  ;;  %v596_v27 = vsub.s32 1, %v8797_v1 }
  0x64   : > { %v539_v20 = vadd.f32 %v538_v25, %v537_v33  ;;  %v558_v49 = vmul.f32 %v404_v48, %v404_v48  ;;  %v573_v33 = vunpack.c.l.s4 %v8276_v45  ;;  %v832_v15 = vand.u32 15, %v804_v17  ;;  %v1121_v41 = vld [vmem:[#allocation2] sm:$0x80] }
  0x65   : > { %v487_v53 = vadd.f32 %v486_v38, %v458_v62  ;;  %v559_v14 = vmul.f32 %v405_v63, %v405_v63  ;;  %v803_v38 = vadd.s32 16, %v8797_v1  ;;  %v8124_v45 = vld [vmem:[%s8348_s24] sm:$0xff] }
  0x66   : > { %v541_v19 = vadd.f32 %v540_v6, %v539_v20  ;;  %2031 = vmatpush1.bf16.msra.mxu1 %v7950_v13  ;;  %v574_v6 = vunpack.c.0.s8 %v573_v33  ;;  %v7968_v20 = vld [vmem:[%s8316_s20 + $0x80] ss:$8 sps:$4 sm:$0xff]   ;;  %v592_v13 = vsub.s32 0, %v8797_v1  ;;  %vm8854_vm5 = vcmp.le.s32.totalorder %v832_v15, 14 }
  0x67   : > { %v488_v30 = vadd.f32 %v487_v53, %v460_v46  ;;  %2032 = vmatprep.subr.bf16.mxu1 %v7958_v57  ;;  %v802_v46 = vadd.s32 8, %v8797_v1  ;;  %v805_v53 = vadd.s32 32, %v8797_v1  ;;  %v831_v40 = vand.u32 15, %v803_v38 }
  0x68   : > { %v543_v43 = vadd.f32 %v542_v59, %v541_v19  ;;  %v577_v24 = vsub.s32 %v574_v6, %v8797_v1  ;;  %v8844_v57 = vadd.s32 56, %v8797_v1 }
  0x69   : > { %v489_v42 = vrot.slane %v488_v30, 4  ;;  %vm8835_vm2 = vcmp.ge.s32.totalorder %v831_v40, 1 }
  0x6a   : > { %v545_v39 = vadd.f32 %v544_v23, %v543_v43  ;;  %2033 = vmatpush1.bf16.msra.mxu1 %v7956_v9  ;;  %v7974_v23 = vld [vmem:[%s8316_s20 + $0x90] ss:$8 sps:$4 sm:$0xff]  }
  0x6b   : > { %v490_v55 = vadd.f32 %v489_v42, %v488_v30  ;;  %2034 = vmatprep.subr.bf16.mxu1 %v7964_v29  ;;  %v829_v30 = vand.u32 15, %v8797_v1  ;;  %v806_v42 = vadd.s32 40, %v8797_v1  ;;  %v8121_v29 = vld [vmem:[%s8348_s24 + $0x28] sm:$0xff] }
  0x6c   : > { %v547_v26 = vadd.f32 %v546_v35, %v545_v39 }
  0x6d   : > { %v491_v61 = vrot.slane %v490_v55, 2  ;;  %vm8831_vm1 = vcmp.ge.s32.totalorder %v829_v30, 1 }
  0x6e   : > { %v549_v36 = vadd.f32 %v548_v4, %v547_v26  ;;  %2035 = vmatpush1.bf16.msra.mxu1 %v7962_v56  ;;  %v830_v26 = vand.u32 15, %v802_v46  ;;  %v8892_v46 = vadd.s32 72, %v8797_v1 }
  0x6f   : > { %v492_v0 = vadd.f32 %v491_v61, %v490_v55  ;;  %2036 = vmatprep.subr.bf16.mxu1 %v7970_v37  ;;  %v833_v55 = vand.u32 15, %v805_v53  ;;  %v8829_v61 = vadd.s32 48, %v8797_v1 }
  0x70   : > { %v550_v12 = vrot.slane %v549_v36, 4  ;;  %vm8839_vm3 = vcmp.le.s32.totalorder %v830_v26, 14 }
  0x71   : > { %v493_v58 = vrot.slane %v492_v0, 1  ;;  %vm8850_vm4 = vcmp.ge.s32.totalorder %v833_v55, 1  ;;  %vm8203_vm11 = vmpackc.low %vm8839_vm3, %vm8831_vm1 }
  0x72   : > { %v551_v44 = vadd.f32 %v550_v12, %v549_v36  ;;  %2037 = vmatpush1.bf16.msra.mxu1 %v7968_v20  ;;  %v8826_v12 = vpack.c.bf16 %v8701_v52, %v1122_v34  ;;  %v834_v52 = vand.u32 15, %v806_v42 }
  0x73   : > { %v494_v5 = vadd.f32 %v493_v58, %v492_v0  ;;  %2038 = vmatprep.subr.bf16.mxu1 %v7976_v18  ;;  %v8138_v0 = vld [vmem:[%s8348_s24 + $0x90] sm:$0xff] }
  0x74   : > { %v552_v50 = vrot.slane %v551_v44, 2  ;;  %vm8898_vm6 = vcmp.le.s32.totalorder %v834_v52, 14 }
  0x75   : > { %v556_v11 = vmul.f32 0.0051020407, %v494_v5 }
  0x76   : > { %v553_v2 = vadd.f32 %v552_v50, %v551_v44  ;;  %2039 = vmatpush1.bf16.msra.mxu1 %v7974_v23  ;;  %v588_v44 = vld [vmem:[%s246_s5] sm:$0x3] }
  0x77   : > { %v560_v16 = vsub.f32 %v556_v11, %v558_v49  ;;  %v8119_v49 = vld [vmem:[%s8348_s24 + $0x8] sm:$0xff]  ;;  %v8129_v23 = vld [vmem:[%s8348_s24 + $0x40] sm:$0xff] }
  0x78   : > { %v554_v51 = vrot.slane %v553_v2, 1 }
  0x79   : > { %v562_v25 = vmax.f32 %v560_v16, 0.0  ;;  %v8120_v16 = vld [vmem:[%s8348_s24 + $0x18] sm:$0xff] }
  0x7a   : > { %v555_v28 = vadd.f32 %v554_v51, %v553_v2  ;;  %v8848_v2 = vpack.c.bf16 %v8274_v32, %v1121_v41  ;;  %v835_v32 = vand.u32 15, %v8829_v61 }
  0x7b   : > { %v565_v22 = vadd.f32 1e-05, %v562_v25  ;;  %v8122_v25 = vld [vmem:[%s8348_s24 + $0x38] sm:$0xff] }
  0x7c   : > { %v557_v3 = vmul.f32 0.0051020407, %v555_v28  ;;  %11657 = vst [vmem:[#allocation5_spill] sm:$0xff] %v8848_v2  ;;  %vm8993_vm7 = vcmp.ge.s32.totalorder %v835_v32, 1  ;;  %v8132_v32 = vld [vmem:[%s8348_s24 + $0x78] sm:$0xff] }
  0x7d   : > { %8115 = vrsqrt.f32 %v565_v22  ;;  %v8123_v22 = vld [vmem:[%s8348_s24 + $0x48] sm:$0xff] }
  0x7e   : > { %v561_v8 = vsub.f32 %v557_v3, %v559_v14 }
  0x80   : > { %v563_v31 = vmax.f32 %v561_v8, 0.0 }
  0x82   : > { %v566_v10 = vadd.f32 1e-05, %v563_v31 }
  0x84   : > { %8117 = vrsqrt.f32 %v566_v10 }
  0x87   : > { %v8116_v60 = vpop.eup %8115 }
  0x8e   : > { %v8118_v59 = vpop.eup %8117 }
  0x8f   : > { %v571_v47 = vcombine.low %v8116_v60, %v8118_v59  ;;  %v8126_v60 = vld [vmem:[%s8348_s24 + $0x20] sm:$0xff]  ;;  %v836_v59 = vand.u32 15, %v8844_v57 }
  0x91   : > { %v578_v62 = vrot.slane %v571_v47, %v577_v24  ;;  %v8883_v47 = vadd.s32 64, %v8797_v1  ;;  %vm8997_vm8 = vcmp.le.s32.totalorder %v836_v59, 14 }
  0x93   : > { %v585_v19 = vrot.slane %v578_v62, %v577_v24  ;;  %v8127_v62 = vld [vmem:[%s8348_s24 + $0x30] sm:$0xff] }
  0x95   : > { %v587_v7 = vmul.f32 %v585_v19, %v564_v21  ;;  %v8128_v19 = vld [vmem:[%s8348_s24 + $0x58] sm:$0xff] }
  0x97   : > { %v8812_v43 = vrot.slane %v587_v7, %v592_v13  ;;  %v8814_v35 = vrot.slane %v587_v7, %v596_v27 }
  0x99   : > { %11650 = vst [vmem:[#allocation4_spill] sm:$0xff] %v8814_v35  ;;  %v600_v39 = vmul.f32 %v8812_v43, %v404_v48  ;;  %v601_v4 = vmul.f32 %v8814_v35, %v405_v63  ;;  %v7982_v63 = vld [vmem:[%s8316_s20 + $0x144] ss:$8 sps:$4 sm:$0xff]   ;;  %v622_v28 = vmul.f32 %v8119_v49, %v8814_v35  ;;  %v624_v56 = vmul.f32 %v8120_v16, %v8814_v35 }
  0x9a   : > { %2691 = vmatprep.subr.bf16.mxu1 %v7982_v63  ;;  %v626_v8 = vmul.f32 %v8121_v29, %v8814_v35  ;;  %v628_v31 = vmul.f32 %v8122_v25, %v8814_v35  ;;  %v630_v10 = vmul.f32 %v8123_v22, %v8814_v35  ;;  %v621_v33 = vmul.f32 %v8124_v45, %v8812_v43 }
  0x9b   : > { %v604_v36 = vcombine.low %v600_v39, %v601_v4  ;;  %v623_v6 = vmul.f32 %v8125_v54, %v8812_v43  ;;  %v627_v21 = vmul.f32 %v8127_v62, %v8812_v43  ;;  %v632_v7 = vmul.f32 %v8128_v19, %v8814_v35 }
  0x9c   : > { %v629_v18 = vmul.f32 %v8129_v23, %v8812_v43  ;;  %v8954_v25 = vadd.s32 88, %v8797_v1  ;;  %v837_v54 = vand.u32 15, %v8883_v47  ;;  %v636_v59 = vmul.f32 %v8132_v32, %v8814_v35  ;;  %v8134_v32 = vld [vmem:[%s8348_s24 + $0x70] sm:$0xff] }
  0x9d   : > { %v611_v48 = vrot.slane %v604_v36, %v577_v24  ;;  %v639_v9 = vmul.f32 %v8138_v0, %v8812_v43  ;;  %v9089_v0 = vadd.s32 128, %v8797_v1 }
  0x9e   : > { %vm9044_vm9 = vcmp.ge.s32.totalorder %v837_v54, 1 }
  0x9f   : > { %v618_v58 = vrot.slane %v611_v48, %v577_v24  ;;  %v625_v24 = vmul.f32 %v8126_v60, %v8812_v43  ;;  %v8974_v60 = vadd.s32 104, %v8797_v1 }
  0xa1   : > { %v620_v3 = vsub.f32 %v588_v44, %v618_v58 }
  0xa3   : > { %v8877_v20 = vrot.slane %v620_v3, %v592_v13  ;;  %v8879_v37 = vrot.slane %v620_v3, %v596_v27 }
  0xa5   : > { %11662 = vst [vmem:[#allocation6_spill] sm:$0xff] %v8879_v37  ;;  %v689_v13 = vadd.f32 %v8879_v37, %v622_v28  ;;  %v691_v27 = vadd.f32 %v8879_v37, %v624_v56  ;;  %v693_v38 = vadd.f32 %v8879_v37, %v626_v8  ;;  %v695_v17 = vadd.f32 %v8879_v37, %v628_v31  ;;  %v8130_v56 = vld [vmem:[%s8348_s24 + $0x50] sm:$0xff]  ;;  %v8135_v31 = vld [vmem:[%s8348_s24 + $0x88] sm:$0xff] }
  0xa6   : > { %v697_v39 = vadd.f32 %v8879_v37, %v630_v10  ;;  %v8904_v4 = vadd.f32 %v8877_v20, %v621_v33  ;;  %v8907_v34 = vadd.f32 %v8877_v20, %v623_v6  ;;  %v8910_v30 = vadd.f32 %v8877_v20, %v625_v24 }
  0xa7   : > { %v745_v26 = vmax.f32 %v689_v13, 0.0  ;;  %v747_v40 = vmax.f32 %v691_v27, 0.0  ;;  %v749_v42 = vmax.f32 %v693_v38, 0.0  ;;  %v751_v36 = vmax.f32 %v695_v17, 0.0  ;;  %v8131_v17 = vld [vmem:[%s8348_s24 + $0x68] sm:$0xff] }
  0xa8   : > { %v753_v15 = vmax.f32 %v697_v39, 0.0  ;;  %v744_v55 = vmax.f32 %v8904_v4, 0.0  ;;  %v746_v41 = vmax.f32 %v8907_v34, 0.0  ;;  %v8915_v44 = vadd.f32 %v8877_v20, %v627_v21  ;;  %v7911_v34 = vld [vmem:[%s8316_s20 + $0x330] ss:$8 sps:$4 sm:$0xff]  }
  0xa9   : > { %v998_v48 = vsel %vm8831_vm1, %v745_v26, 0.0  ;;  %v1000_v52 = vsel %vm8839_vm3, %v747_v40, 0.0  ;;  %v1002_v57 = vsel %vm8835_vm2, %v749_v42, 0.0  ;;  %v1004_v63 = vsel %vm8854_vm5, %v751_v36, 0.0  ;;  %v8145_v36 = vld [vmem:[%s8348_s24 + $0xe8] sm:$0xff] }
  0xaa   : > { %1066 = vst.msk [vmem:[#allocation2 + $0x38] sm:$0xff] %vm342_vm0, %v998_v48  ;;  %1068 = vst.msk [vmem:[#allocation2 + $0x48] sm:$0xff] %vm342_vm0, %v1000_v52  ;;  %v1006_v58 = vsel %vm8850_vm4, %v753_v15, 0.0  ;;  %v8935_v49 = vsel %vm8831_vm1, %v744_v55, 0.0  ;;  %v8941_v28 = vsel %vm8839_vm3, %v746_v41, 0.0  ;;  %v11545_v3 = vmax.f32 %v8910_v30, 0.0 }
  0xab   : > { %1070 = vst.msk [vmem:[#allocation2 + $0x58] sm:$0xff] %vm342_vm0, %v1002_v57  ;;  %1072 = vst.msk [vmem:[#allocation2 + $0x68] sm:$0xff] %vm342_vm0, %v1004_v63  ;;  %v11544_v16 = vmax.f32 %v8915_v44, 0.0  ;;  %v631_v29 = vmul.f32 %v8130_v56, %v8812_v43  ;;  %v8951_v8 = vadd.s32 80, %v8797_v1  ;;  %v699_v10 = vadd.f32 %v8879_v37, %v632_v7  ;;  %v8133_v56 = vld [vmem:[%s8348_s24 + $0x60] sm:$0xff] }
  0xac   : > { %11665 = vst [vmem:[#allocation7_spill] sm:$0xff] %v8935_v49  ;;  %1074 = vst.msk [vmem:[#allocation2 + $0x78] sm:$0xff] %vm342_vm0, %v1006_v58  ;;  %v8961_v22 = vsel %vm8835_vm2, %v11545_v3, 0.0  ;;  %v8965_v45 = vadd.f32 %v8877_v20, %v629_v18  ;;  %v8971_v6 = vadd.s32 96, %v8797_v1  ;;  %v838_v18 = vand.u32 15, %v8892_v46 }
  0xad   : > { %1065 = vst [vmem:[#allocation2 + $0x30] sm:$0xff] %v8935_v49  ;;  %1067 = vst [vmem:[#allocation2 + $0x40] sm:$0xff] %v8941_v28  ;;  %v8980_v24 = vsel %vm8854_vm5, %v11544_v16, 0.0  ;;  %v8984_v62 = vpack.c.bf16 %v8961_v22, %v8941_v28  ;;  %v755_v21 = vmax.f32 %v699_v10, 0.0  ;;  %v8989_v19 = vadd.f32 %v8877_v20, %v631_v29  ;;  %v7908_v58 = vld [vmem:[%s8316_s20 + $0x320] ss:$8 sps:$4 sm:$0xff]  }
  0xae   : > { %1069 = vst [vmem:[#allocation2 + $0x50] sm:$0xff] %v8961_v22  ;;  %v11542_v47 = vmax.f32 %v8965_v45, 0.0  ;;  %1071 = vst [vmem:[#allocation2 + $0x60] sm:$0xff] %v8980_v24  ;;  %v839_v13 = vand.u32 15, %v8951_v8  ;;  %v840_v27 = vand.u32 15, %v8954_v25  ;;  %v634_v61 = vmul.f32 %v8131_v17, %v8814_v35  ;;  %v8144_v16 = vld [vmem:[%s8348_s24 + $0xd8] sm:$0xff] }
  0xaf   : > { %11666 = vst [vmem:[#allocation8_spill] sm:$0xff] %v8984_v62  ;;  %v1008_v38 = vsel %vm8898_vm6, %v755_v21, 0.0  ;;  %v9011_v39 = vadd.s32 112, %v8797_v1  ;;  %v9024_v15 = vadd.s32 120, %v8797_v1  ;;  %v633_v29 = vmul.f32 %v8133_v56, %v8812_v43  ;;  %vm8209_vm1 = vmpackc.low %vm8854_vm5, %vm8835_vm2 }
  0xb0   : > { %1076 = vst.msk [vmem:[#allocation2 + $0x88] sm:$0xff] %vm342_vm0, %v1008_v38  ;;  %v9020_v42 = vsel %vm8850_vm4, %v11542_v47, 0.0  ;;  %v7913_v38 = vld [vmem:[%s8316_s20 + $0x334] ss:$8 sps:$4 sm:$0xff]   ;;  %v11543_v17 = vmax.f32 %v8989_v19, 0.0  ;;  %v701_v56 = vadd.f32 %v8879_v37, %v634_v61  ;;  %v638_v14 = vmul.f32 %v8135_v31, %v8814_v35  ;;  %v8143_v47 = vld [vmem:[%s8348_s24 + $0xc8] sm:$0xff]  ;;  %vm8215_vm5 = vmpackc.low %vm8898_vm6, %vm8850_vm4 }
  0xb1   : > { %v9013_v26 = vld [vmem:[#allocation2 + $0x38] sm:$0xff]  ;;  %v1130_v46 = vld [vmem:[#allocation2 + $0x48] sm:$0xff]  ;;  %1073 = vst [vmem:[#allocation2 + $0x70] sm:$0xff] %v9020_v42  ;;  %vm9054_vm10 = vcmp.le.s32.totalorder %v838_v18, 14  ;;  %v8204_v61 = vpack.c.bf16 %v746_v41, %v744_v55  ;;  %vm9073_vm12 = vcmp.ge.s32.totalorder %v839_v13, 1  ;;  %vm9105_vm13 = vcmp.le.s32.totalorder %v840_v27, 14 }
  0xb2   : > { %v1132_v40 = vld [vmem:[#allocation2 + $0x58] sm:$0xff]  ;;  %v1234_v52 = vpack.c.bf16 %v1130_v46, %v9013_v26  ;;  %v9029_v57 = vld [vmem:[#allocation2 + $0x68] sm:$0xff]  ;;  %v757_v54 = vmax.f32 %v701_v56, 0.0  ;;  %v9121_v27 = vadd.f32 %v8877_v20, %v633_v29  ;;  %v9125_v3 = vmul.f32 %v8144_v16, %v8814_v35 }
  0xb3   : > { %v9026_v48 = vpack.c.bf16 %v1132_v40, %v1130_v46  ;;  %v2931_v63 = vld [vmem:[#allocation2 + $0x78] sm:$0xff]  ;;  %v3687_v21 = vpack.c.bf16 %v9029_v57, %v1132_v40  ;;  %v635_v46 = vmul.f32 %v8134_v32, %v8812_v43  ;;  %v703_v40 = vadd.f32 %v8879_v37, %v636_v59  ;;  %v8137_v59 = vld [vmem:[%s8348_s24 + $0x80] sm:$0xff]  ;;  %v8139_v55 = vld [vmem:[%s8348_s24 + $0xa8] sm:$0xff] }
  0xb4   : > { %v9037_v10 = vpack.c.bf16 %v2931_v63, %v9029_v57  ;;  %6938 = vmatprep.mubr.msk.bf16.mxu1 %vm342_vm0, %v1234_v52  ;;  %7133 = vmatprep.mubr.msk.bf16.mxu0 %vm342_vm0, %v1234_v52  ;;  %v8136_v31 = vld [vmem:[%s8348_s24 + $0x98] sm:$0xff]  ;;  %v637_v52 = vmul.f32 %v8137_v59, %v8812_v43  ;;  %v642_v41 = vmul.f32 %v8139_v55, %v8814_v35  ;;  %v8141_v59 = vld [vmem:[%s8348_s24 + $0xa0] sm:$0xff]  ;;  %v9097_v55 = vsel %vm8898_vm6, %v11543_v17, 0.0  ;;  %vm8221_vm6 = vmpackc.low %vm8997_vm8, %vm8993_vm7 }
  0xb5   : > { %11671 = vst [vmem:[#allocation9_spill] sm:$0xff] %v9026_v48  ;;  %8205 = vmatmul.mubr.msk.bf16.gmra.mrb[4].mxu1 %vm8203_vm11, %v8204_v61  ;;  %8208 = vmatmul.mubr.msk.bf16.vlgmr.msra.gmra.mrb[0].mxu0 %vm8203_vm11, %v8204_v61  ;;  %v640_v18 = vmul.f32 %v8136_v31, %v8814_v35  ;;  %v8140_v61 = vld [vmem:[%s8348_s24 + $0xb8] sm:$0xff]  ;;  %v9086_v13 = vmul.f32 %v8141_v59, %v8812_v43  ;;  %1075 = vst [vmem:[#allocation2 + $0x80] sm:$0xff] %v9097_v55  ;;  %v759_v25 = vmax.f32 %v703_v40, 0.0  ;;  %v7917_v29 = vld [vmem:[%s8316_s20 + $0x340] ss:$8 sps:$4 sm:$0xff]  }
  0xb6   : > { %11672 = vst [vmem:[#allocation10_spill] sm:$0xff] %v9037_v10  ;;  %4602 = vmatpush1.bf16.msra.mxu0 %v7908_v58  ;;  %6939 = vmatprep.mubr.msk.bf16.mxu1 %vm342_vm0, %v3687_v21  ;;  %v644_v31 = vmul.f32 %v8140_v61, %v8814_v35  ;;  %v7919_v58 = vld [vmem:[%s8316_s20 + $0x344] ss:$8 sps:$4 sm:$0xff]   ;;  %v9101_v61 = vpack.c.bf16 %v9020_v42, %v8980_v24  ;;  %v1010_v40 = vsel %vm8993_vm7, %v757_v54, 0.0  ;;  %v7931_v10 = vld [vmem:[%s8316_s20 + $0x374] ss:$8 sps:$4 sm:$0xff]  }
  0xb7   : > { %4603 = vmatprep.subr.bf16.mxu0 %v7913_v38  ;;  %7134 = vmatprep.mubr.msk.bf16.mxu0 %vm342_vm0, %v3687_v21  ;;  %v8142_v38 = vld [vmem:[%s8348_s24 + $0xb0] sm:$0xff]  ;;  %v9115_v17 = vmul.f32 %v8143_v47, %v8814_v35  ;;  %v9117_v4 = vld [vmem:[#allocation2 + $0x88] sm:$0xff]  ;;  %v9133_v8 = vadd.f32 %v8877_v20, %v635_v46  ;;  %v9137_v56 = vmul.f32 %v8145_v36, %v8814_v35  ;;  %v1012_v16 = vsel %vm8997_vm8, %v759_v25, 0.0  ;;  %v4105_v48 = vld [vmem:[#allocation2 + $0x38] sm:$0xfe] }
  0xb8   : > { %11679 = vst [vmem:[#allocation11_spill] sm:$0xff] %v9101_v61  ;;  %v9111_v21 = vmul.f32 %v8142_v38, %v8812_v43  ;;  %v9129_v38 = vpack.c.bf16 %v8980_v24, %v8961_v22  ;;  %v1238_v47 = vpack.c.bf16 %v9117_v4, %v2931_v63  ;;  %v11549_v22 = vmax.f32 %v9121_v27, 0.0  ;;  %v7922_v63 = vld [vmem:[%s8316_s20 + $0x354] ss:$8 sps:$4 sm:$0xff]   ;;  %1078 = vst.msk [vmem:[#allocation2 + $0x98] sm:$0xff] %vm342_vm0, %v1010_v40  ;;  %v4107_v2 = vld [vmem:[#allocation2 + $0x48] sm:$0xff] }
  0xb9   : > { %v705_v24 = vadd.f32 %v8879_v37, %v638_v14  ;;  %1080 = vst.msk [vmem:[#allocation2 + $0xa8] sm:$0xff] %vm342_vm0, %v1012_v16  ;;  %v11546_v36 = vmax.f32 %v9133_v8, 0.0  ;;  %v707_v46 = vadd.f32 %v8879_v37, %v640_v18  ;;  %v9155_v54 = vadd.f32 %v8877_v20, %v639_v9  ;;  %v7947_v32 = vld [vmem:[%s8316_s20 + $0x3b0] ss:$8 sps:$4 sm:$0xff]  }
  0xba   : > { %4604 = vmatpush1.bf16.msra.mxu0 %v7911_v34  ;;  %v9152_v34 = vadd.f32 %v8877_v20, %v637_v52  ;;  %v11682_v25 = vand.u32 15, %v8971_v6  ;;  %v9173_v18 = vsel %vm8993_vm7, %v11549_v22, 0.0  ;;  %v709_v6 = vadd.f32 %v8879_v37, %v642_v41  ;;  %v7926_v22 = vld [vmem:[%s8316_s20 + $0x360] ss:$8 sps:$4 sm:$0xff]  }
  0xbb   : > { %4605 = vmatprep.subr.bf16.mxu0 %v7919_v58  ;;  %v11685_v58 = vand.u32 15, %v8974_v60  ;;  %v761_v52 = vmax.f32 %v705_v24, 0.0  ;;  %v711_v9 = vadd.f32 %v8879_v37, %v644_v31  ;;  %v11688_v60 = vmax.f32 %v8910_v30, 0.0  ;;  %1077 = vst [vmem:[#allocation2 + $0x90] sm:$0xff] %v9173_v18 }
  0xbc   : > { %vm9159_vm14 = vcmp.ge.s32.totalorder %v11682_v25, 1  ;;  %v11689_v16 = vmax.f32 %v8915_v44, 0.0  ;;  %v9189_v41 = vsel %vm8997_vm8, %v11546_v36, 0.0  ;;  %v9194_v50 = vpack.c.bf16 %v9173_v18, %v9097_v55  ;;  %v7920_v44 = vld [vmem:[%s8316_s20 + $0x350] ss:$8 sps:$4 sm:$0xff]  }
  0xbd   : > { %vm9165_vm15 = vcmp.le.s32.totalorder %v11685_v58, 14  ;;  %v763_v51 = vmax.f32 %v707_v46, 0.0  ;;  %v11548_v30 = vmax.f32 %v9152_v34, 0.0  ;;  %1079 = vst [vmem:[#allocation2 + $0xa0] sm:$0xff] %v9189_v41  ;;  %v1014_v31 = vsel %vm9044_vm9, %v761_v52, 0.0  ;;  %v8147_v52 = vld [vmem:[%s8348_s24 + $0xd0] sm:$0xff] }
  0xbe   : > { %v8210_v25 = vpack.c.bf16 %v11689_v16, %v11688_v60  ;;  %11690 = vst [vmem:[#allocation12_spill] sm:$0xff] %v9194_v50  ;;  %4606 = vmatpush1.bf16.msra.mxu0 %v7917_v29  ;;  %v11547_v24 = vmax.f32 %v9155_v54, 0.0  ;;  %v765_v58 = vmax.f32 %v709_v6, 0.0  ;;  %v11691_v60 = vand.u32 15, %v9011_v39  ;;  %v8146_v29 = vld [vmem:[%s8348_s24 + $0xc0] sm:$0xff]  ;;  %1082 = vst.msk [vmem:[#allocation2 + $0xb8] sm:$0xff] %vm342_vm0, %v1014_v31 }
  0xbf   : > { %v11692_v46 = vmov 0  ;;  %v645_v16 = vmul.f32 %v8146_v29, %v8812_v43  ;;  %4607 = vmatprep.subr.bf16.mxu0 %v7922_v63  ;;  %v1016_v36 = vsel %vm9054_vm10, %v763_v51, 0.0  ;;  %v9220_v39 = vsel %vm9044_vm9, %v11548_v30, 0.0  ;;  %v8150_v30 = vld [vmem:[%s8348_s24 + $0x100] sm:$0xff] }
  0xc0   : > { %8211 = vmatmul.mubr.msk.bf16.gmra.mrb[8].mxu1 %vm8209_vm1, %v8210_v25  ;;  %8214 = vmatmul.mubr.msk.bf16.gmra.mrb[4].mxu0 %vm8209_vm1, %v8210_v25  ;;  %vm9205_vm2 = vcmp.ge.s32.totalorder %v11691_v60, 1  ;;  %v7928_v25 = vld [vmem:[%s8316_s20 + $0x364] ss:$8 sps:$4 sm:$0xff]   ;;  %v647_v6 = vmul.f32 %v8147_v52, %v8812_v43  ;;  %1084 = vst.msk [vmem:[#allocation2 + $0xc8] sm:$0xff] %vm342_vm0, %v1016_v36  ;;  %1081 = vst [vmem:[#allocation2 + $0xb0] sm:$0xff] %v9220_v39  ;;  %v9236_v63 = vpack.c.bf16 %v9220_v39, %v9189_v41 }
  0xc1   : > { %6940 = vmatprep.mubr.msk.bf16.mxu1 %vm342_vm0, %v1238_v47  ;;  %v11693_v46 = vsel %vm9205_vm2, 4294967295, %v11692_v46  ;;  %7135 = vmatprep.mubr.msk.bf16.mxu0 %vm342_vm0, %v1238_v47  ;;  %v8148_v60 = vld [vmem:[%s8348_s24 + $0xe0] sm:$0xff]  ;;  %v9231_v47 = vsel %vm9054_vm10, %v11547_v24, 0.0  ;;  %v767_v51 = vmax.f32 %v711_v9, 0.0  ;;  %v1018_v31 = vsel %vm9073_vm12, %v765_v58, 0.0  ;;  %v1140_v58 = vld [vmem:[#allocation2 + $0x98] sm:$0xff]  ;;  %vm8227_vm1 = vmpackc.low %vm9054_vm10, %vm9044_vm9 }
  0xc2   : > { %11694 = vst [vmem:[#allocation13_spill] sm:$0xff] %v11693_v46  ;;  %v649_v29 = vmul.f32 %v8148_v60, %v8812_v43  ;;  %11695 = vst [vmem:[#allocation14_spill] sm:$0xff] %v9236_v63  ;;  %v9242_v36 = vpack.c.bf16 %v9097_v55, %v9020_v42  ;;  %v9248_v52 = vadd.f32 %v8877_v20, %v9086_v13  ;;  %4608 = vmatpush1.bf16.msra.mxu0 %v7920_v44  ;;  %v1142_v42 = vld [vmem:[#allocation2 + $0xa8] sm:$0xff]  ;;  %v8149_v24 = vld [vmem:[%s8348_s24 + $0xf0] sm:$0xff]  ;;  %vm2302_vm9 = vsmask.f32 7424 }
  0xc3   : > { %1083 = vst [vmem:[#allocation2 + $0xc0] sm:$0xff] %v9231_v47  ;;  %1086 = vst.msk [vmem:[#allocation2 + $0xd8] sm:$0xff] %vm342_vm0, %v1018_v31  ;;  %v9252_v60 = vadd.f32 %v8877_v20, %v9111_v21  ;;  %v713_v9 = vadd.f32 %v8879_v37, %v9115_v17  ;;  %v1020_v55 = vsel %vm9105_vm13, %v767_v51, 0.0  ;;  %v715_v31 = vadd.f32 %v8879_v37, %v9125_v3  ;;  %v7967_v46 = vld [vmem:[%s8316_s20 + $0x3e4] ss:$8 sps:$4 sm:$0xff]  }
  0xc4   : > { %v651_v13 = vmul.f32 %v8149_v24, %v8812_v43  ;;  %v653_v21 = vmul.f32 %v8150_v30, %v8812_v43  ;;  %4609 = vmatprep.subr.bf16.mxu0 %v7928_v25  ;;  %v9266_v17 = vpack.c.bf16 %v1140_v58, %v9117_v4  ;;  %v9268_v44 = vpack.c.bf16 %v1142_v42, %v1140_v58 }
  0xc5   : > { %1088 = vst.msk [vmem:[#allocation2 + $0xe8] sm:$0xff] %vm342_vm0, %v1020_v55  ;;  %v11554_v51 = vmax.f32 %v9248_v52, 0.0  ;;  %v11553_v3 = vmax.f32 %v9252_v60, 0.0  ;;  %v769_v63 = vmax.f32 %v713_v9, 0.0  ;;  %v771_v24 = vmax.f32 %v715_v31, 0.0 }
  0xc6   : > { %11696 = vst [vmem:[#allocation15_spill] sm:$0xff] %v9266_v17  ;;  %v717_v30 = vadd.f32 %v8879_v37, %v9137_v56  ;;  %v9277_v25 = vadd.f32 %v8877_v20, %v645_v16  ;;  %v11697_v17 = vand.u32 15, %v9024_v15  ;;  %v11698_v58 = vmov 0  ;;  %v1144_v56 = vld [vmem:[#allocation2 + $0xb8] sm:$0xff]  ;;  %4610 = vmatpush1.bf16.msra.mxu0 %v7926_v22 }
  0xc7   : > { %v11701_v9 = vmax.f32 %v8965_v45, 0.0  ;;  %v11702_v55 = vmax.f32 %v8989_v19, 0.0  ;;  %v9297_v15 = vsel %vm9073_vm12, %v11554_v51, 0.0  ;;  %v9303_v5 = vsel %vm9105_vm13, %v11553_v3, 0.0  ;;  %v8151_v45 = vld [vmem:[%s8348_s24 + $0xf8] sm:$0xff]  ;;  %4611 = vmatprep.subr.bf16.mxu0 %v7931_v10 }
  0xc8   : > { %vm9281_vm3 = vcmp.le.s32.totalorder %v11697_v17, 14  ;;  %v9306_v53 = vadd.f32 %v8877_v20, %v647_v6  ;;  %v652_v19 = vmul.f32 %v8151_v45, %v8814_v35  ;;  %1085 = vst [vmem:[#allocation2 + $0xd0] sm:$0xff] %v9297_v15  ;;  %1087 = vst [vmem:[#allocation2 + $0xe0] sm:$0xff] %v9303_v5  ;;  %v9318_v16 = vpack.c.bf16 %v9297_v15, %v9231_v47 }
  0xc9   : > { %v11699_v58 = vsel %vm9281_vm3, 4294967295, %v11698_v58  ;;  %v8216_v31 = vpack.c.bf16 %v11702_v55, %v11701_v9  ;;  %v1022_v6 = vsel %vm9159_vm14, %v769_v63, 0.0  ;;  %v1024_v17 = vsel %vm9165_vm15, %v771_v24, 0.0  ;;  %v7929_v55 = vld [vmem:[%s8316_s20 + $0x370] ss:$8 sps:$4 sm:$0xff]  }
  0xca   : > { %11700 = vst [vmem:[#allocation16_spill] sm:$0xff] %v11699_v58  ;;  %11703 = vst [vmem:[#allocation17_spill] sm:$0xff] %v9318_v16  ;;  %v9325_v9 = vadd.f32 %v8877_v20, %v649_v29  ;;  %v9328_v45 = vpack.c.bf16 %v1144_v56, %v1142_v42  ;;  %v773_v3 = vmax.f32 %v717_v30, 0.0  ;;  %v11555_v51 = vmax.f32 %v9277_v25, 0.0  ;;  %v7937_v29 = vld [vmem:[%s8316_s20 + $0x384] ss:$8 sps:$4 sm:$0xff]   ;;  %4612 = vmatpush1.bf16.msra.mxu0 %v7929_v55 }
  0xcb   : > { %8217 = vmatmul.mubr.msk.bf16.gmra.mrb[12].mxu1 %vm8215_vm5, %v8216_v31  ;;  %8220 = vmatmul.mubr.msk.bf16.gmra.mrb[8].mxu0 %vm8215_vm5, %v8216_v31  ;;  %v1146_v31 = vld [vmem:[#allocation2 + $0xc8] sm:$0xff]  ;;  %1090 = vst.msk [vmem:[#allocation2 + $0xf8] sm:$0xff] %vm342_vm0, %v1022_v6  ;;  %1092 = vst.msk [vmem:[#allocation2 + $0x108] sm:$0xff] %vm342_vm0, %v1024_v17  ;;  %v11556_v63 = vmax.f32 %v9306_v53, 0.0  ;;  %v9336_v24 = vpack.c.bf16 %v9189_v41, %v9173_v18  ;;  %v9339_v22 = vld [vmem:[#allocation2 + $0xd8] sm:$0xff]  ;;  %v9342_v42 = vadd.f32 %v8877_v20, %v651_v13 }
  0xcc   : > { %6941 = vmatprep.mubr.msk.bf16.mxu1 %vm342_vm0, %v9268_v44  ;;  %7136 = vmatprep.mubr.msk.bf16.mxu0 %vm342_vm0, %v9268_v44  ;;  %11704 = vst [vmem:[#allocation18_spill] sm:$0xff] %v9328_v45  ;;  %v845_v6 = vand.u32 15, %v9089_v0  ;;  %v9346_v30 = vadd.s32 136, %v8797_v1  ;;  %v9349_v17 = vpack.c.bf16 %v9339_v22, %v1146_v31  ;;  %v1026_v18 = vsel %vm9205_vm2, %v773_v3, 0.0  ;;  %v7940_v45 = vld [vmem:[%s8316_s20 + $0x394] ss:$8 sps:$4 sm:$0xff]  }
  0xcd   : > { %11705 = vst [vmem:[#allocation19_spill] sm:$0xff] %v9336_v24  ;;  %v9357_v10 = vsel %vm9159_vm14, %v11555_v51, 0.0  ;;  %v9363_v0 = vsel %vm9165_vm15, %v11556_v63, 0.0  ;;  %v9365_v41 = vpack.c.bf16 %v1146_v31, %v1144_v56  ;;  %1094 = vst.msk [vmem:[#allocation2 + $0x118] sm:$0xff] %vm342_vm0, %v1026_v18  ;;  %v9375_v3 = vadd.f32 %v8877_v20, %v653_v21  ;;  %v7935_v63 = vld [vmem:[%s8316_s20 + $0x380] ss:$8 sps:$4 sm:$0xff]   ;;  %4613 = vmatprep.subr.bf16.mxu0 %v7937_v29 }
  0xce   : > { %11706 = vst [vmem:[#allocation20_spill] sm:$0xff] %v9349_v17  ;;  %1089 = vst [vmem:[#allocation2 + $0xf0] sm:$0xff] %v9357_v10  ;;  %v9372_v13 = vpack.c.bf16 %v9357_v10, %v9303_v5  ;;  %v11561_v51 = vmax.f32 %v9325_v9, 0.0  ;;  %v719_v31 = vadd.f32 %v8879_v37, %v652_v19  ;;  %v819_v18 = vadd.s32 144, %v8797_v1  ;;  %v8152_v19 = vld [vmem:[%s8348_s24 + $0x108] sm:$0xff]  ;;  %4614 = vmatpush1.bf16.msra.mxu0 %v7935_v63  ;;  %v8156_v24 = vld [vmem:[%s8348_s24 + $0x138] sm:$0xff] }
  0xcf   : > { %11707 = vst [vmem:[#allocation21_spill] sm:$0xff] %v9365_v41  ;;  %1091 = vst [vmem:[#allocation2 + $0x100] sm:$0xff] %v9363_v0  ;;  %v9383_v17 = vadd.s32 152, %v8797_v1  ;;  %vm9387_vm4 = vcmp.ge.s32.totalorder %v845_v6, 1  ;;  %v654_v56 = vmul.f32 %v8152_v19, %v8814_v35  ;;  %v11712_v29 = vmax.f32 %v9121_v27, 0.0  ;;  %v8153_v27 = vld [vmem:[%s8348_s24 + $0x118] sm:$0xff]  ;;  %4615 = vmatprep.subr.bf16.mxu0 %v7940_v45 }
  0xd0   : > { %11708 = vst [vmem:[#allocation22_spill] sm:$0xff] %v9372_v13  ;;  %11709 = vst [vmem:[#allocation23_spill] sm:$0xff] %v9375_v3  ;;  %v9395_v55 = vsel %vm9205_vm2, %v11561_v51, 0.0  ;;  %v11713_v6 = vmax.f32 %v9133_v8, 0.0  ;;  %v11714_v16 = vmax.f32 %v9342_v42, 0.0  ;;  %v775_v23 = vmax.f32 %v719_v31, 0.0 }
  0xd1   : > { %1093 = vst [vmem:[#allocation2 + $0x110] sm:$0xff] %v9395_v55  ;;  %v9416_v7 = vpack.c.bf16 %v9395_v55, %v9363_v0  ;;  %v656_v8 = vmul.f32 %v8153_v27, %v8814_v35  ;;  %v11716_v19 = vshrl.u32 %v8826_v12, 16  ;;  %v7946_v27 = vld [vmem:[%s8316_s20 + $0x3a4] ss:$8 sps:$4 sm:$0xff]   ;;  %v846_v50 = vand.u32 15, %v9346_v30 }
  0xd2   : > { %v8222_v13 = vpack.c.bf16 %v11713_v6, %v11712_v29  ;;  %v9411_v51 = vsel %vm9281_vm3, %v11714_v16, 0.0  ;;  %v1150_v16 = vld [vmem:[#allocation2 + $0xe8] sm:$0xff]  ;;  %v7938_v29 = vld [vmem:[%s8316_s20 + $0x390] ss:$8 sps:$4 sm:$0xff]   ;;  %v847_v61 = vand.u32 15, %v819_v18  ;;  %v848_v62 = vand.u32 15, %v9383_v17 }
  0xd3   : > { %11715 = vst [vmem:[#allocation24_spill] sm:$0xff] %v9416_v7  ;;  %v9429_v6 = vld [vmem:[#allocation2 + $0xf8] sm:$0xff]  ;;  %v11717_v7 = vmax.f32 %v9375_v3, 0.0  ;;  %1095 = vst [vmem:[#allocation2 + $0x120] sm:$0xff] %v9411_v51  ;;  %v9448_v63 = vadd.s32 160, %v8797_v1  ;;  %v9451_v3 = vadd.s32 168, %v8797_v1  ;;  %v721_v45 = vadd.f32 %v8879_v37, %v654_v56  ;;  %4616 = vmatpush1.bf16.msra.mxu0 %v7938_v29 }
  0xd4   : > { %8223 = vmatmul.mubr.msk.bf16.gmra.mrb[16].mxu1 %vm8221_vm6, %v8222_v13  ;;  %8226 = vmatmul.mubr.msk.bf16.gmra.mrb[12].mxu0 %vm8221_vm6, %v8222_v13  ;;  %v9422_v13 = vrot.slane %v11716_v19, 3  ;;  %v9440_v19 = vpack.c.bf16 %v9429_v6, %v1150_v16  ;;  %v723_v30 = vadd.f32 %v8879_v37, %v656_v8  ;;  %v8154_v17 = vld [vmem:[%s8348_s24 + $0x110] sm:$0xff]  ;;  %v7944_v56 = vld [vmem:[%s8316_s20 + $0x3a0] ss:$8 sps:$4 sm:$0xff]   ;;  %v9476_v8 = vpack.c.bf16 %v4107_v2, %v4105_v48  ;;  %vm8233_vm6 = vmpackc.low %vm9105_vm13, %vm9073_vm12 }
  0xd5   : > { %6942 = vmatprep.mubr.msk.bf16.mxu1 %vm342_vm0, %v9365_v41  ;;  %7137 = vmatprep.mubr.msk.bf16.mxu0 %vm342_vm0, %v9365_v41  ;;  %v9435_v31 = vsel %vm9387_vm4, %v11717_v7, 0.0  ;;  %v1028_v7 = vsel %vm9281_vm3, %v775_v23, 0.0  ;;  %v655_v18 = vmul.f32 %v8154_v17, %v8812_v43  ;;  %v11720_v23 = vshll.u32 %v8826_v12, 16 }
  0xd6   : > { %11718 = vst [vmem:[#allocation25_spill] sm:$0xff] %v9440_v19  ;;  %1097 = vst [vmem:[#allocation2 + $0x130] sm:$0xff] %v9435_v31  ;;  %v9455_v19 = vpack.c.bf16 %v9231_v47, %v9220_v39  ;;  %v9467_v41 = vpack.c.bf16 %v1150_v16, %v9339_v22  ;;  %v9470_v39 = vadd.s32 176, %v8797_v1  ;;  %v9473_v47 = vadd.s32 184, %v8797_v1  ;;  %4617 = vmatprep.subr.bf16.mxu0 %v7946_v27  ;;  %v7949_v22 = vld [vmem:[%s8316_s20 + $0x3b4] ss:$8 sps:$4 sm:$0xff]  }
  0xd7   : > { %1096 = vst.msk [vmem:[#allocation2 + $0x128] sm:$0xff] %vm342_vm0, %v1028_v7  ;;  %v9464_v49 = vrot.slane %v11720_v23, 4  ;;  %v777_v7 = vmax.f32 %v721_v45, 0.0  ;;  %vm9478_vm7 = vcmp.le.s32.totalorder %v846_v50, 14  ;;  %vm9482_vm8 = vcmp.ge.s32.totalorder %v847_v61, 1  ;;  %v4109_v16 = vld [vmem:[#allocation2 + $0x58] sm:$0xff]  ;;  %4618 = vmatpush1.bf16.msra.mxu0 %v7944_v56 }
  0xd8   : > { %11719 = vst [vmem:[#allocation26_spill] sm:$0xff] %v9455_v19  ;;  %v779_v23 = vmax.f32 %v723_v30, 0.0  ;;  %v8155_v19 = vld [vmem:[%s8348_s24 + $0x128] sm:$0xff]  ;;  %v660_v2 = vmul.f32 %v8156_v24, %v8814_v35  ;;  %vm9491_vm11 = vcmp.le.s32.totalorder %v848_v62, 14  ;;  %v11727_v61 = vmax.f32 %v9152_v34, 0.0  ;;  %4619 = vmatprep.subr.bf16.mxu0 %v7949_v22 }
  0xd9   : > { %v658_v29 = vmul.f32 %v8155_v19, %v8814_v35  ;;  %v11728_v50 = vmax.f32 %v9155_v54, 0.0  ;;  %v1030_v19 = vsel %vm9387_vm4, %v777_v7, 0.0  ;;  %v9506_v62 = vadd.f32 %v8877_v20, %v655_v18  ;;  %v8157_v54 = vld [vmem:[%s8348_s24 + $0x120] sm:$0xff]  ;;  %v9522_v30 = vld [vmem:[#allocation2 + $0x108] sm:$0xff] }
  0xda   : > { %v849_v24 = vand.u32 15, %v9448_v63  ;;  %v850_v33 = vand.u32 15, %v9451_v3  ;;  %v1032_v34 = vsel %vm9478_vm7, %v779_v23, 0.0  ;;  %1098 = vst.msk [vmem:[#allocation2 + $0x138] sm:$0xff] %vm342_vm0, %v1030_v19  ;;  %v657_v45 = vmul.f32 %v8157_v54, %v8812_v43  ;;  %11729 = vst [vmem:[#allocation27_spill] sm:$0xff] %v9522_v30  ;;  %v8159_v3 = vld [vmem:[#allocation2 + $0x28] sm:$0xff] }
  0xdb   : > { %v8228_v27 = vpack.c.bf16 %v11728_v50, %v11727_v61  ;;  %v9525_v18 = vpack.c.bf16 %v9029_v57, %v4109_v16  ;;  %v4228_v7 = vshll.u32 %v9476_v8, 16  ;;  %v4104_v61 = vld [vmem:[#allocation2 + $0x30] sm:$0xfe]  ;;  %1100 = vst.msk [vmem:[#allocation2 + $0x148] sm:$0xff] %vm342_vm0, %v1032_v34  ;;  %v11576_v23 = vmax.f32 %v9506_v62, 0.0  ;;  %4620 = vmatpush1.bf16.msra.mxu0 %v7947_v32 }
  0xdc   : > { %v8158_v50 = vld [vmem:[%s8348_s24 + $0x130] sm:$0xff]  ;;  %v7955_v19 = vld [vmem:[%s8316_s20 + $0x3c4] ss:$8 sps:$4 sm:$0xff]   ;;  %v725_v56 = vadd.f32 %v8879_v37, %v658_v29  ;;  %v727_v54 = vadd.f32 %v8879_v37, %v660_v2  ;;  %v9536_v57 = vadd.s32 192, %v8797_v1  ;;  %v9539_v16 = vadd.s32 200, %v8797_v1 }
  0xdd   : > { %8229 = vmatmul.mubr.msk.bf16.gmra.mrb[20].mxu1 %vm8227_vm1, %v8228_v27  ;;  %8232 = vmatmul.mubr.msk.bf16.gmra.mrb[16].mxu0 %vm8227_vm1, %v8228_v27  ;;  %v659_v27 = vmul.f32 %v8158_v50, %v8812_v43  ;;  %v9542_v34 = vpack.c.bf16 %v9013_v26, %v8159_v3  ;;  %v9546_v50 = vpack.c.bf16 %v9303_v5, %v9297_v15  ;;  %v4226_v22 = vshrl.u32 %v9476_v8, 16  ;;  %v4113_v26 = vld [vmem:[#allocation2 + $0x78] sm:$0xff]  ;;  %vm8239_vm1 = vmpackc.low %vm9165_vm15, %vm9159_vm14 }
  0xde   : > { %6943 = vmatprep.mubr.msk.bf16.mxu1 %vm342_vm0, %v9467_v41  ;;  %7138 = vmatprep.mubr.msk.bf16.mxu0 %vm342_vm0, %v9467_v41  ;;  %v9553_v29 = vsel %vm9478_vm7, %v11576_v23, 0.0  ;;  %v9557_v2 = vpack.c.bf16 %v9522_v30, %v9429_v6  ;;  %v9560_v63 = vpack.c.bf16 %v8941_v28, %v4104_v61  ;;  %v781_v15 = vmax.f32 %v725_v56, 0.0  ;;  %v11790_v28 = vld [vmem:[#allocation24_spill] sm:$0xff] }
  0xdf   : > { %1099 = vst [vmem:[#allocation2 + $0x140] sm:$0xff] %v9553_v29  ;;  %v783_v5 = vmax.f32 %v727_v54, 0.0  ;;  %vm9563_vm10 = vcmp.ge.s32.totalorder %v849_v24, 1  ;;  %v4230_v3 = vrot.slane %v4228_v7, 1  ;;  %v4233_v23 = vshll.u32 %v9525_v18, 16  ;;  %5363 = vmatprep.subr.bf16.mxu0 %v7955_v19  ;;  %v1158_v19 = vld [vmem:[#allocation2 + $0x128] sm:$0xff] }
  0xe0   : > { %11730 = vst [vmem:[#allocation28_spill] sm:$0xff] %v9557_v2  ;;  %v9569_v1 = vadd.f32 %v8877_v20, %v657_v45  ;;  %v9572_v6 = vadd.f32 %v8877_v20, %v659_v27  ;;  %vm9574_vm5 = vcmp.le.s32.totalorder %v850_v33, 14  ;;  %v1034_v24 = vsel %vm9482_vm8, %v781_v15, 0.0  ;;  %v8160_v15 = vld [vmem:[%s8348_s24 + $0x148] sm:$0xff] }
  0xe1   : > { %v1036_v32 = vsel %vm9491_vm11, %v783_v5, 0.0  ;;  %v11735_v33 = vmax.f32 %v9248_v52, 0.0  ;;  %v11736_v45 = vmax.f32 %v9252_v60, 0.0  ;;  %v9592_v56 = vld [vmem:[#allocation2 + $0x138] sm:$0xff]  ;;  %v9595_v54 = vpack.c.bf16 %v9117_v4, %v4113_v26  ;;  %1102 = vst.msk [vmem:[#allocation2 + $0x158] sm:$0xff] %vm342_vm0, %v1034_v24 }
  0xe2   : > { %1104 = vst.msk [vmem:[#allocation2 + $0x168] sm:$0xff] %vm342_vm0, %v1036_v32  ;;  %v11580_v11 = vmax.f32 %v9569_v1, 0.0  ;;  %v11579_v59 = vmax.f32 %v9572_v6, 0.0  ;;  %v4216_v4 = vshll.u32 %v9560_v63, 16  ;;  %v9610_v26 = vpack.c.bf16 %v9592_v56, %v1158_v19  ;;  %v9614_v24 = vld [vmem:[#allocation2 + $0x118] sm:$0xff] }
  0xe3   : > { %v8234_v27 = vpack.c.bf16 %v11736_v45, %v11735_v33  ;;  %v662_v5 = vmul.f32 %v8160_v15, %v8814_v35  ;;  %11738 = vst [vmem:[#allocation30_spill] sm:$0xff] %v9614_v24  ;;  %v4231_v32 = vor.u32 %v4230_v3, %v4226_v22  ;;  %v4235_v33 = vrot.slane %v4233_v23, 1  ;;  %v8161_v22 = vld [vmem:[%s8348_s24 + $0x158] sm:$0xff] }
  0xe4   : > { %11737 = vst [vmem:[#allocation29_spill] sm:$0xff] %v9610_v26  ;;  %v9620_v45 = vsel %vm9482_vm8, %v11580_v11, 0.0  ;;  %v9630_v15 = vpack.c.bf16 %v9363_v0, %v9357_v10  ;;  %v4221_v52 = vshll.u32 %v9129_v38, 16  ;;  %v664_v3 = vmul.f32 %v8161_v22, %v8814_v35  ;;  %v8162_v0 = vld [vmem:[%s8348_s24 + $0x140] sm:$0xff] }
  0xe5   : > { %8235 = vmatmul.mubr.msk.bf16.gmra.mrb[24].mxu1 %vm8233_vm6, %v8234_v27  ;;  %8238 = vmatmul.mubr.msk.bf16.gmra.mrb[20].mxu0 %vm8233_vm6, %v8234_v27  ;;  %v9626_v27 = vsel %vm9491_vm11, %v11579_v59, 0.0  ;;  %1101 = vst [vmem:[#allocation2 + $0x150] sm:$0xff] %v9620_v45  ;;  %v9637_v23 = vpack.c.bf16 %v9620_v45, %v9553_v29  ;;  %v4245_v59 = vshrl.u32 %v9525_v18, 16  ;;  %v4249_v11 = vshll.u32 %v9595_v54, 16  ;;  %vm11603_vm6 = vmpackc.low %vm9281_vm3, %vm9205_vm2 }
  0xe6   : > { %6944 = vmatprep.mubr.msk.bf16.mxu1 %vm342_vm0, %v9557_v2  ;;  %7139 = vmatprep.mubr.msk.bf16.mxu0 %vm342_vm0, %v9557_v2  ;;  %11739 = vst [vmem:[#allocation31_spill] sm:$0xff] %v9630_v15  ;;  %1103 = vst [vmem:[#allocation2 + $0x160] sm:$0xff] %v9626_v27  ;;  %v729_v10 = vadd.f32 %v8879_v37, %v662_v5  ;;  %v661_v60 = vmul.f32 %v8162_v0, %v8812_v43  ;;  %v11741_v61 = vand.u32 15, %v9470_v39  ;;  %v8163_v0 = vld [vmem:[%s8348_s24 + $0x150] sm:$0xff] }
  0xe7   : > { %11740 = vst [vmem:[#allocation32_spill] sm:$0xff] %v9637_v23  ;;  %v9653_v26 = vpack.c.bf16 %v1158_v19, %v9614_v24  ;;  %v4214_v22 = vshrl.u32 %v9560_v63, 16  ;;  %v4218_v18 = vrot.slane %v4216_v4, 1  ;;  %v731_v15 = vadd.f32 %v8879_v37, %v664_v3  ;;  %v1162_v24 = vld [vmem:[#allocation2 + $0x148] sm:$0xff] }
  0xe8   : > { %vm9648_vm12 = vcmp.ge.s32.totalorder %v11741_v61, 1  ;;  %v11744_v5 = vand.u32 15, %v9473_v47  ;;  %v4236_v39 = vsel %vm2302_vm9, %v4231_v32, %v4235_v33  ;;  %v785_v61 = vmax.f32 %v729_v10, 0.0  ;;  %v9670_v3 = vld [vmem:[#allocation2 + $0x158] sm:$0xff] }
  0xe9   : > { %v663_v30 = vmul.f32 %v8163_v0, %v8812_v43  ;;  %v9667_v19 = vadd.f32 %v8877_v20, %v661_v60  ;;  %v1625_v63 = vshll.u32 %v9542_v34, 16  ;;  %v4223_v4 = vrot.slane %v4221_v52, 1 }
  0xea   : > { %vm9659_vm13 = vcmp.le.s32.totalorder %v11744_v5, 14  ;;  %v787_v47 = vmax.f32 %v731_v15, 0.0  ;;  %v8164_v5 = vld [vmem:[%s8348_s24 + $0x168] sm:$0xff]  ;;  %v11747_v32 = vmax.f32 %v9277_v25, 0.0  ;;  %v11748_v60 = vmax.f32 %v9306_v53, 0.0 }
  0xeb   : > { %v666_v2 = vmul.f32 %v8164_v5, %v8814_v35  ;;  %v4247_v52 = vor.u32 %v4245_v59, %v4235_v33  ;;  %v9682_v0 = vrot.slane %v4249_v11, 1  ;;  %v9685_v15 = vpack.c.bf16 %v9670_v3, %v1162_v24 }
  0xec   : > { %v8240_v10 = vpack.c.bf16 %v11748_v60, %v11747_v32  ;;  %v1038_v14 = vsel %vm9563_vm10, %v785_v61, 0.0  ;;  %v4219_v40 = vor.u32 %v4218_v18, %v4214_v22  ;;  %v1040_v25 = vsel %vm9574_vm5, %v787_v47, 0.0  ;;  %v8165_v22 = vld [vmem:[%s8348_s24 + $0x178] sm:$0xff] }
  0xed   : > { %11749 = vst [vmem:[#allocation33_spill] sm:$0xff] %v9685_v15  ;;  %1106 = vst.msk [vmem:[#allocation2 + $0x178] sm:$0xff] %vm342_vm0, %v1038_v14  ;;  %v9696_v53 = vadd.f32 %v8877_v20, %v663_v30  ;;  %v11588_v11 = vmax.f32 %v9667_v19, 0.0  ;;  %v9701_v59 = vpack.c.bf16 %v9411_v51, %v9395_v55  ;;  %v4237_v33 = vshrl.u32 %v9129_v38, 16  ;;  %v8166_v38 = vld [vmem:[%s8348_s24 + $0x160] sm:$0xff] }
  0xee   : > { %8241 = vmatmul.mubr.msk.bf16.gmra.mrb[28].mxu1 %vm8239_vm1, %v8240_v10  ;;  %8244 = vmatmul.mubr.msk.bf16.gmra.mrb[24].mxu0 %vm8239_vm1, %v8240_v10  ;;  %1108 = vst.msk [vmem:[#allocation2 + $0x188] sm:$0xff] %vm342_vm0, %v1040_v25  ;;  %v668_v18 = vmul.f32 %v8165_v22, %v8814_v35  ;;  %v4241_v61 = vshll.u32 %v9242_v36, 16  ;;  %v665_v47 = vmul.f32 %v8166_v38, %v8812_v43  ;;  %v11750_v5 = vand.u32 15, %v9536_v57  ;;  %v7953_v22 = vld [vmem:[%s8316_s20 + $0x3c0] ss:$8 sps:$4 sm:$0xff]  }
  0xef   : > { %6945 = vmatprep.mubr.msk.bf16.mxu1 %vm342_vm0, %v9653_v26  ;;  %7187 = vmatprep.mubr.msk.bf16.mxu0 %vm342_vm0, %v4236_v39  ;;  %v733_v39 = vadd.f32 %v8879_v37, %v666_v2  ;;  %v11590_v30 = vmax.f32 %v9696_v53, 0.0  ;;  %v9714_v55 = vsel %vm9563_vm10, %v11588_v11, 0.0  ;;  %v4252_v2 = vsel %vm2302_vm9, %v4247_v52, %v9682_v0 }
  0xf0   : > { %vm9720_vm14 = vcmp.ge.s32.totalorder %v11750_v5, 1  ;;  %1105 = vst [vmem:[#allocation2 + $0x170] sm:$0xff] %v9714_v55  ;;  %v9729_v60 = vpack.c.bf16 %v9714_v55, %v9626_v27  ;;  %v735_v10 = vadd.f32 %v8879_v37, %v668_v18  ;;  %v11753_v25 = vand.u32 15, %v9539_v16  ;;  %v8167_v18 = vld [vmem:[%s8348_s24 + $0x170] sm:$0xff] }
  0xf1   : > { %v789_v14 = vmax.f32 %v733_v39, 0.0  ;;  %v4224_v38 = vsel %vm2302_vm9, %v4219_v40, %v4223_v4  ;;  %v9741_v52 = vpack.c.bf16 %v1162_v24, %v9592_v56  ;;  %v9747_v5 = vsel %vm9574_vm5, %v11590_v30, 0.0 }
  0xf2   : > { %vm9734_vm15 = vcmp.le.s32.totalorder %v11753_v25, 14  ;;  %v667_v39 = vmul.f32 %v8167_v18, %v8812_v43  ;;  %v4239_v16 = vor.u32 %v4237_v33, %v4223_v4  ;;  %v7961_v25 = vld [vmem:[%s8316_s20 + $0x3d4] ss:$8 sps:$4 sm:$0xff]   ;;  %v4261_v11 = vshrl.u32 %v9595_v54, 16  ;;  %1107 = vst [vmem:[#allocation2 + $0x180] sm:$0xff] %v9747_v5 }
  0xf3   : > { %v4265_v15 = vshll.u32 %v9268_v44, 16  ;;  %v791_v56 = vmax.f32 %v735_v10, 0.0  ;;  %v9755_v24 = vrot.slane %v4241_v61, 1  ;;  %v1042_v40 = vsel %vm9648_vm12, %v789_v14, 0.0 }
  0xf4   : > { %v9760_v30 = vadd.f32 %v8877_v20, %v665_v47  ;;  %v9763_v4 = vadd.f32 %v8877_v20, %v667_v39  ;;  %v11757_v54 = vshrl.u32 %v9542_v34, 16  ;;  %v9769_v18 = vrot.slane %v1625_v63, 4  ;;  %v1166_v34 = vld [vmem:[#allocation2 + $0x168] sm:$0xff]  ;;  %v9787_v63 = vld [vmem:[#allocation2 + $0x178] sm:$0xff]  ;;  %1110 = vst.msk [vmem:[#allocation2 + $0x198] sm:$0xff] %vm342_vm0, %v1042_v40 }
  0xf5   : > { %v11758_v61 = vmax.f32 %v9325_v9, 0.0  ;;  %v11759_v47 = vmax.f32 %v9342_v42, 0.0  ;;  %v1044_v14 = vsel %vm9659_vm13, %v791_v56, 0.0  ;;  %v8168_v9 = vld [vmem:[%s8348_s24 + $0x188] sm:$0xff]  ;;  %v7959_v39 = vld [vmem:[%s8316_s20 + $0x3d0] ss:$8 sps:$4 sm:$0xff]   ;;  %v4244_v56 = vsel %vm2302_vm9, %v4239_v16, %v9755_v24 }
  0xf6   : > { %11756 = vst [vmem:[#allocation34_spill] sm:$0xff] %v9763_v4  ;;  %v9767_v33 = vrot.slane %v11757_v54, 3  ;;  %4634 = vmatmul.mubr.bf16.vlgmr.msra.gmra.mrb[0].mxu0 %v4224_v38  ;;  %v670_v42 = vmul.f32 %v8168_v9, %v8814_v35  ;;  %v9798_v54 = vpack.c.bf16 %v9787_v63, %v1166_v34  ;;  %1112 = vst.msk [vmem:[#allocation2 + $0x1a8] sm:$0xff] %vm342_vm0, %v1044_v14  ;;  %v11592_v38 = vmax.f32 %v9760_v30, 0.0 }
  0xf7   : > { %v9779_v10 = vpack.c.bf16 %v11759_v47, %v11758_v61  ;;  %5364 = vmatpush1.bf16.msra.mxu0 %v7953_v22  ;;  %v8169_v61 = vld [vmem:[%s8348_s24 + $0x198] sm:$0xff]  ;;  %7188 = vmatprep.mubr.msk.bf16.mxu0 %vm342_vm0, %v4252_v2  ;;  %v9808_v22 = vpack.c.bf16 %v9553_v29, %v9435_v31  ;;  %v4263_v47 = vor.u32 %v4261_v11, %v9682_v0  ;;  %v4267_v9 = vrot.slane %v4265_v15, 1 }
  0xf8   : > { %11761 = vst [vmem:[#allocation36_spill] sm:$0xff] %v9798_v54  ;;  %v672_v40 = vmul.f32 %v8169_v61, %v8814_v35  ;;  %5365 = vmatprep.subr.bf16.mxu0 %v7961_v25  ;;  %v737_v14 = vadd.f32 %v8879_v37, %v670_v42  ;;  %v9819_v2 = vsel %vm9648_vm12, %v11592_v38, 0.0  ;;  %v11763_v29 = vmax.f32 %v9763_v4, 0.0  ;;  %v11764_v25 = vld [vmem:[#allocation19_spill] sm:$0xff] }
  0xf9   : > { %11760 = vst [vmem:[#allocation35_spill] sm:$0xff] %v9779_v10  ;;  %8247 = vmatmul.mubr.msk.bf16.gmra.mrb[32].mxu1 %vm11603_vm6, %v9779_v10  ;;  %11762 = vst [vmem:[#allocation37_spill] sm:$0xff] %v9808_v22  ;;  %v4253_v11 = vshrl.u32 %v9242_v36, 16  ;;  %v4257_v16 = vshll.u32 %v11764_v25, 16  ;;  %v9834_v42 = vpack.c.bf16 %v9819_v2, %v9747_v5  ;;  %v8170_v38 = vld [vmem:[%s8348_s24 + $0x180] sm:$0xff]  ;;  %v4268_v10 = vsel %vm2302_vm9, %v4263_v47, %v4267_v9 }
  0xfa   : > { %6946 = vmatprep.mubr.msk.bf16.mxu1 %vm342_vm0, %v9741_v52  ;;  %v9825_v0 = vsel %vm9659_vm13, %v11763_v29, 0.0  ;;  %v739_v15 = vadd.f32 %v8879_v37, %v672_v40  ;;  %1109 = vst [vmem:[#allocation2 + $0x190] sm:$0xff] %v9819_v2  ;;  %v793_v61 = vmax.f32 %v737_v14, 0.0  ;;  %v9837_v29 = vpack.c.bf16 %v1166_v34, %v9670_v3  ;;  %v7965_v54 = vld [vmem:[%s8316_s20 + $0x3e0] ss:$8 sps:$4 sm:$0xff]   ;;  %v11766_v37 = vld [vmem:[#allocation21_spill] sm:$0xff]  ;;  %vm8248_vm6 = vmpackc.low %vm9478_vm7, %vm9387_vm4 }
  0xfb   : > { %1111 = vst [vmem:[#allocation2 + $0x1a0] sm:$0xff] %v9825_v0  ;;  %11765 = vst [vmem:[#allocation19_spill] sm:$0xff] %v9834_v42  ;;  %5366 = vmatpush1.bf16.msra.mxu0 %v7959_v39  ;;  %v4277_v40 = vshrl.u32 %v9268_v44, 16  ;;  %v669_v58 = vmul.f32 %v8170_v38, %v8812_v43  ;;  %v4281_v35 = vshll.u32 %v11766_v37, 16  ;;  %v7973_v22 = vld [vmem:[%s8316_s20 + $0x3f4] ss:$8 sps:$4 sm:$0xff]   ;;  %v9876_v21 = vor.u32 %v9769_v18, %v9767_v33 }
  0xfc   : > { %v795_v36 = vmax.f32 %v739_v15, 0.0  ;;  %5367 = vmatprep.subr.bf16.mxu0 %v7967_v46  ;;  %v1046_v14 = vsel %vm9720_vm14, %v793_v61, 0.0  ;;  %v8171_v39 = vld [vmem:[%s8348_s24 + $0x190] sm:$0xff]  ;;  %v8172_v34 = vld [vmem:[#allocation2] sm:$0xff]  ;;  %v1170_v15 = vld [vmem:[#allocation2 + $0x188] sm:$0xff]  ;;  %v4255_v17 = vor.u32 %v4253_v11, %v9755_v24  ;;  %v11772_v33 = vor.u32 %v9464_v49, %v9422_v13 }
  0xfd   : > { %v671_v3 = vmul.f32 %v8171_v39, %v8812_v43  ;;  %v11767_v42 = vld [vmem:[#allocation7_spill] sm:$0xff]  ;;  %v9851_v4 = vld [vmem:[#allocation2 + $0x198] sm:$0xff]  ;;  %1114 = vst.msk [vmem:[#allocation2 + $0x1b8] sm:$0xff] %vm342_vm0, %v1046_v14  ;;  %v9857_v46 = vadd.f32 %v8877_v20, %v669_v58  ;;  %vm1595_vm1 = vsmask.f32 4352  ;;  %v4279_v14 = vor.u32 %v4277_v40, %v4267_v9  ;;  %vm8251_vm4 = vmpackc.low %vm9491_vm11, %vm9482_vm8 }
  0xfe   : > { %v1181_v44 = vpack.c.bf16 %v11767_v42, %v8172_v34  ;;  %v1048_v38 = vsel %vm9734_vm15, %v795_v36, 0.0  ;;  %v11768_v47 = vld [vmem:[#allocation23_spill] sm:$0xff]  ;;  %v11770_v42 = vmax.f32 %v9506_v62, 0.0  ;;  %4644 = vmatmul.mubr.bf16.gmra.mrb[4].mxu0 %v4244_v56  ;;  %v9868_v36 = vpack.c.bf16 %v9851_v4, %v1170_v15  ;;  %vm8254_vm7 = vmpackc.low %vm9574_vm5, %vm9563_vm10 }
  0xff   : > { %v11769_v61 = vmax.f32 %v11768_v47, 0.0  ;;  %1116 = vst.msk [vmem:[#allocation2 + $0x1c8] sm:$0xff] %vm342_vm0, %v1048_v38  ;;  %v9872_v58 = vadd.f32 %v8877_v20, %v671_v3  ;;  %7189 = vmatprep.mubr.msk.bf16.mxu0 %vm342_vm0, %v4268_v10  ;;  %v4259_v62 = vrot.slane %v4257_v16, 1  ;;  %v11605_v56 = vmax.f32 %v9857_v46, 0.0  ;;  %5368 = vmatpush1.bf16.msra.mxu0 %v7965_v54  ;;  %v7971_v3 = vld [vmem:[%s8316_s20 + $0x3f0] ss:$8 sps:$4 sm:$0xff]   ;;  %vm8257_vm8 = vmpackc.low %vm9659_vm13, %vm9648_vm12 }
 0x100   : > { %11771 = vst [vmem:[#allocation21_spill] sm:$0xff] %v9868_v36  ;;  %v4283_v34 = vrot.slane %v4281_v35, 1  ;;  %v9890_v18 = vsel %vm1595_vm1, %v11772_v33, %v9876_v21  ;;  %v11773_v47 = vld [vmem:[#allocation5_spill] sm:$0xff]  ;;  %5369 = vmatprep.subr.bf16.mxu0 %v7973_v22  ;;  %v7979_v49 = vld [vmem:[%s8316_s20 + $0x404] ss:$8 sps:$4 sm:$0xff]   ;;  %v1605_v13 = vshrl.u32 %v1181_v44, 16  ;;  %v9909_v54 = vpack.c.bf16 %v9626_v27, %v9620_v45  ;;  %vm8260_vm11 = vmpackc.low %vm9734_vm15, %vm9720_vm14 }
 0x101   : > { %v8249_v39 = vpack.c.bf16 %v11770_v42, %v11769_v61  ;;  %v11604_v38 = vmax.f32 %v9872_v58, 0.0  ;;  %v11774_v10 = vshrl.u32 %v11773_v47, 16  ;;  %v11775_v11 = vshll.u32 %v11773_v47, 16  ;;  %v11776_v27 = vld [vmem:[#allocation26_spill] sm:$0xff]  ;;  %vm11936_vm12 = vmpackc.low %vm9281_vm3, %vm9205_vm2 }
 0x102   : > { %v9904_v35 = vsel %vm9720_vm14, %v11605_v56, 0.0  ;;  %v4260_v40 = vsel %vm2302_vm9, %v4255_v17, %v4259_v62  ;;  %v9924_v61 = vpack.c.bf16 %v1170_v15, %v9787_v63  ;;  %v4269_v45 = vshrl.u32 %v11764_v25, 16  ;;  %v7985_v25 = vld [vmem:[%s8316_s20 + $0x414] ss:$8 sps:$4 sm:$0xff]   ;;  %v7989_v56 = vld [vmem:[%s8316_s20 + $0x420] ss:$8 sps:$4 sm:$0xff]  }
 0x103   : > { %8250 = vmatmul.mubr.msk.bf16.gmra.mrb[36].mxu1 %vm8248_vm6, %v8249_v39  ;;  %v9894_v24 = vrot.slane %v11774_v10, 3  ;;  %v9898_v9 = vrot.slane %v11775_v11, 4  ;;  %v9915_v16 = vsel %vm9734_vm15, %v11604_v38, 0.0  ;;  %1113 = vst [vmem:[#allocation2 + $0x1b0] sm:$0xff] %v9904_v35  ;;  %v9920_v22 = vpack.c.bf16 %v9904_v35, %v9825_v0  ;;  %v7977_v39 = vld [vmem:[%s8316_s20 + $0x400] ss:$8 sps:$4 sm:$0xff]   ;;  %5370 = vmatpush1.bf16.msra.mxu0 %v7971_v3 }
 0x104   : > { %6947 = vmatprep.mubr.msk.bf16.mxu1 %vm342_vm0, %v9837_v29  ;;  %v4273_v42 = vshll.u32 %v11776_v27, 16  ;;  %1115 = vst [vmem:[#allocation2 + $0x1c0] sm:$0xff] %v9915_v16  ;;  %v1608_v33 = vshll.u32 %v1181_v44, 16  ;;  %v4284_v47 = vsel %vm2302_vm9, %v4279_v14, %v4283_v34  ;;  %v1174_v10 = vld [vmem:[#allocation2 + $0x1a8] sm:$0xff]  ;;  %v4293_v11 = vshrl.u32 %v11766_v37, 16  ;;  %v9933_v17 = vld [vmem:[#allocation2 + $0x1b8] sm:$0xff]  ;;  %5371 = vmatprep.subr.bf16.mxu0 %v7979_v49 }
 0x105   : > { %v4297_v38 = vshll.u32 %v9467_v41, 16  ;;  %v9936_v63 = vpack.c.bf16 %v9933_v17, %v1174_v10  ;;  %v11778_v44 = vmax.f32 %v9569_v1, 0.0  ;;  %v11779_v37 = vmax.f32 %v9572_v6, 0.0 }
 0x106   : > { %4654 = vmatmul.mubr.bf16.gmra.mrb[8].mxu0 %v4260_v40  ;;  %v4271_v14 = vor.u32 %v4269_v45, %v4259_v62  ;;  %v4275_v3 = vrot.slane %v4273_v42, 1  ;;  %v9952_v48 = vrot.slane %v1605_v13, 3  ;;  %v9954_v49 = vrot.slane %v1608_v33, 4  ;;  %v11780_v40 = vld [vmem:[#allocation9_spill] sm:$0xff]  ;;  %v7991_v13 = vld [vmem:[%s8316_s20 + $0x424] ss:$8 sps:$4 sm:$0xff]  }
 0x107   : > { %11777 = vst [vmem:[#allocation7_spill] sm:$0xff] %v9936_v63  ;;  %v8252_v15 = vpack.c.bf16 %v11779_v37, %v11778_v44  ;;  %7190 = vmatprep.mubr.msk.bf16.mxu0 %vm342_vm0, %v4284_v47  ;;  %v4295_v1 = vor.u32 %v4293_v11, %v4283_v34  ;;  %v4299_v6 = vrot.slane %v4297_v38, 1  ;;  %5372 = vmatpush1.bf16.msra.mxu0 %v7977_v39  ;;  %v7983_v44 = vld [vmem:[%s8316_s20 + $0x410] ss:$8 sps:$4 sm:$0xff]   ;;  %v1640_v37 = vshrl.u32 %v11780_v40, 16  ;;  %v11782_v42 = vld [vmem:[#allocation28_spill] sm:$0xff] }
 0x108   : > { %v9962_v62 = vpack.c.bf16 %v9747_v5, %v9714_v55  ;;  %5373 = vmatprep.subr.bf16.mxu0 %v7985_v25  ;;  %v4285_v45 = vshrl.u32 %v11776_v27, 16  ;;  %v4289_v34 = vshll.u32 %v9546_v50, 16  ;;  %v4309_v38 = vshrl.u32 %v9467_v41, 16  ;;  %v11783_v47 = vld [vmem:[#allocation11_spill] sm:$0xff]  ;;  %v11784_v25 = vld [vmem:[#allocation12_spill] sm:$0xff] }
 0x109   : > { %v4313_v39 = vshll.u32 %v11782_v42, 16  ;;  %v1643_v33 = vshll.u32 %v11780_v40, 16  ;;  %v4276_v12 = vsel %vm2302_vm9, %v4271_v14, %v4275_v3  ;;  %v9973_v55 = vpack.c.bf16 %v1174_v10, %v9851_v4  ;;  %v11786_v4 = vld [vmem:[#allocation17_spill] sm:$0xff]  ;;  %v11789_v10 = vld [vmem:[#allocation22_spill] sm:$0xff] }
 0x10a   : > { %v9979_v63 = vpack.c.bf16 %v9435_v31, %v9411_v51  ;;  %v4300_v41 = vsel %vm2302_vm9, %v4295_v1, %v4299_v6  ;;  %v7997_v5 = vld [vmem:[%s8316_s20 + $0x434] ss:$8 sps:$4 sm:$0xff]   ;;  %v11787_v51 = vmax.f32 %v9667_v19, 0.0  ;;  %v11788_v31 = vmax.f32 %v9696_v53, 0.0  ;;  %v11791_v19 = vld [vmem:[#allocation27_spill] sm:$0xff] }
 0x10b   : > { %8253 = vmatmul.mubr.msk.bf16.gmra.mrb[40].mxu1 %vm8251_vm4, %v8252_v15  ;;  %v11781_v15 = vld [vmem:[#allocation8_spill] sm:$0xff]  ;;  %5374 = vmatpush1.bf16.msra.mxu0 %v7983_v44  ;;  %v4287_v44 = vor.u32 %v4285_v45, %v4275_v3  ;;  %v4291_v36 = vrot.slane %v4289_v34, 1  ;;  %v4311_v14 = vor.u32 %v4309_v38, %v4299_v6  ;;  %v4315_v40 = vrot.slane %v4313_v39, 1  ;;  %v11792_v53 = vld [vmem:[#allocation30_spill] sm:$0xff] }
 0x10c   : > { %6948 = vmatprep.mubr.msk.bf16.mxu1 %vm342_vm0, %v9924_v61  ;;  %5375 = vmatprep.subr.bf16.mxu0 %v7991_v13  ;;  %v8255_v1 = vpack.c.bf16 %v11788_v31, %v11787_v51  ;;  %v10005_v3 = vpack.c.bf16 %v11792_v53, %v11791_v19  ;;  %v1230_v34 = vld [vmem:[#allocation2 + $0x1c8] sm:$0xff]  ;;  %v7995_v38 = vld [vmem:[%s8316_s20 + $0x430] ss:$8 sps:$4 sm:$0xff]   ;;  %v10018_v53 = vpack.c.bf16 %v9825_v0, %v9819_v2  ;;  %v4329_v6 = vshll.u32 %v9653_v26, 16 }
 0x10d   : > { %v11793_v39 = vld [vmem:[#allocation32_spill] sm:$0xff]  ;;  %v4292_v45 = vsel %vm2302_vm9, %v4287_v44, %v4291_v36  ;;  %v1642_v51 = vrot.slane %v1640_v37, 3  ;;  %v1645_v8 = vrot.slane %v1643_v33, 4  ;;  %v4341_v2 = vshrl.u32 %v9653_v26, 16  ;;  %v11796_v26 = vld [vmem:[#allocation34_spill] sm:$0xff] }
 0x10e   : > { %4664 = vmatmul.mubr.bf16.gmra.mrb[12].mxu0 %v4276_v12  ;;  %v8003_v19 = vld [vmem:[%s8316_s20 + $0x444] ss:$8 sps:$4 sm:$0xff]   ;;  %v10024_v12 = vpack.c.bf16 %v1230_v34, %v9933_v17  ;;  %v4345_v0 = vshll.u32 %v9741_v52, 16  ;;  %v1793_v44 = vshrl.u32 %v9729_v60, 16  ;;  %v11795_v37 = vmax.f32 %v9760_v30, 0.0 }
 0x10f   : > { %7191 = vmatprep.mubr.msk.bf16.mxu0 %vm342_vm0, %v4300_v41  ;;  %5376 = vmatpush1.bf16.msra.mxu0 %v7989_v56  ;;  %v11794_v41 = vld [vmem:[#allocation31_spill] sm:$0xff]  ;;  %v4316_v56 = vsel %vm2302_vm9, %v4311_v14, %v4315_v40  ;;  %v11797_v33 = vmax.f32 %v11796_v26, 0.0  ;;  %v4331_v27 = vrot.slane %v4329_v6, 1  ;;  %v1611_v30 = vor.u32 %v9954_v49, %v9952_v48 }
 0x110   : > { %v4305_v11 = vshll.u32 %v11794_v41, 16  ;;  %5377 = vmatprep.subr.bf16.mxu0 %v7997_v5  ;;  %v4317_v31 = vshrl.u32 %v11794_v41, 16  ;;  %v4321_v5 = vshll.u32 %v9701_v59, 16  ;;  %v8001_v14 = vld [vmem:[%s8316_s20 + $0x440] ss:$8 sps:$4 sm:$0xff]   ;;  %v4347_v26 = vrot.slane %v4345_v0, 1 }
 0x111   : > { %v8258_v41 = vpack.c.bf16 %v11797_v33, %v11795_v37  ;;  %v4343_v6 = vor.u32 %v4341_v2, %v4331_v27  ;;  %v4333_v33 = vshrl.u32 %v9701_v59, 16  ;;  %v8015_v48 = vld [vmem:[%s8316_s20 + $0x464] ss:$8 sps:$4 sm:$0xff]   ;;  %v10064_v49 = vpack.c.bf16 %v9915_v16, %v9904_v35  ;;  %v11804_v59 = vld [vmem:[#allocation37_spill] sm:$0xff] }
 0x112   : > { %v4307_v34 = vrot.slane %v4305_v11, 1  ;;  %v4323_v37 = vrot.slane %v4321_v5, 1  ;;  %v11805_v0 = vor.u32 %v9898_v9, %v9894_v24  ;;  %v11806_v24 = vld [vmem:[#allocation4_spill] sm:$0xff]  ;;  %v11809_v32 = vshrl.u32 %v11783_v47, 16 }
 0x113   : > { %8256 = vmatmul.mubr.msk.bf16.gmra.mrb[44].mxu1 %vm8254_vm7, %v8255_v1  ;;  %v4301_v1 = vshrl.u32 %v9546_v50, 16  ;;  %v4325_v50 = vshrl.u32 %v11782_v42, 16  ;;  %5378 = vmatpush1.bf16.msra.mxu0 %v7995_v38  ;;  %v8009_v42 = vld [vmem:[%s8316_s20 + $0x454] ss:$8 sps:$4 sm:$0xff]   ;;  %v11798_v38 = vld [vmem:[#allocation19_spill] sm:$0xff]  ;;  %v11810_v57 = vshll.u32 %v11783_v47, 16 }
 0x114   : > { %6949 = vmatprep.mubr.msk.bf16.mxu1 %vm342_vm0, %v9973_v55  ;;  %5379 = vmatprep.subr.bf16.mxu0 %v8003_v19  ;;  %v1811_v13 = vshrl.u32 %v11798_v38, 16  ;;  %v4319_v19 = vor.u32 %v4317_v31, %v4307_v34  ;;  %v4357_v31 = vshrl.u32 %v9741_v52, 16  ;;  %v10082_v52 = vor.u32 %v4333_v33, %v4323_v37 }
 0x115   : > { %v4303_v17 = vor.u32 %v4301_v1, %v4291_v36  ;;  %v11799_v36 = vshrl.u32 %v11781_v15, 16  ;;  %v11800_v1 = vshll.u32 %v11781_v15, 16  ;;  %v4327_v23 = vor.u32 %v4325_v50, %v4315_v40  ;;  %v8007_v15 = vld [vmem:[%s8316_s20 + $0x450] ss:$8 sps:$4 sm:$0xff]   ;;  %v8042_v50 = vld [vmem:[%s8316_s20 + $0x1e4] ss:$8 sps:$4 sm:$0xff]  }
 0x116   : > { %4674 = vmatmul.mubr.bf16.gmra.mrb[16].mxu0 %v4292_v45  ;;  %v10053_v45 = vor.u32 %v1645_v8, %v1642_v51  ;;  %v4337_v51 = vshll.u32 %v11804_v59, 16  ;;  %v4324_v35 = vsel %vm2302_vm9, %v4319_v19, %v4323_v37  ;;  %v1651_v33 = vrot.slane %v11809_v32, 3 }
 0x117   : > { %v1633_v11 = vrot.slane %v11799_v36, 3  ;;  %v1636_v7 = vrot.slane %v11800_v1, 4  ;;  %7192 = vmatprep.mubr.msk.bf16.mxu0 %vm342_vm0, %v4316_v56  ;;  %5380 = vmatpush1.bf16.msra.mxu0 %v8001_v14  ;;  %v4308_v36 = vsel %vm2302_vm9, %v4303_v17, %v4307_v34  ;;  %v11802_v56 = vld [vmem:[#allocation10_spill] sm:$0xff]  ;;  %v4332_v2 = vsel %vm2302_vm9, %v4327_v23, %v4331_v27 }
 0x118   : > { %11801 = vst [vmem:[#allocation23_spill] sm:$0xff] %v10053_v45  ;;  %v1658_v1 = vshrl.u32 %v11802_v56, 16  ;;  %v1661_v40 = vshll.u32 %v11802_v56, 16  ;;  %5381 = vmatprep.subr.bf16.mxu0 %v8009_v42  ;;  %v1612_v14 = vsel %vm1595_vm1, %v11805_v0, %v1611_v30  ;;  %v1647_v16 = vsel %vm1595_vm1, %v9876_v21, %v10053_v45  ;;  %v11812_v56 = vld [vmem:[#allocation6_spill] sm:$0xff] }
 0x119   : > { %v10066_v8 = vor.u32 %v1636_v7, %v1633_v11  ;;  %v4348_v17 = vsel %vm2302_vm9, %v4343_v6, %v4347_v26  ;;  %v4361_v27 = vshll.u32 %v9837_v29, 16  ;;  %v8173_v11 = vld [vmem:[%s8348_s24 + $0x1a8] sm:$0xff]  ;;  %v11807_v21 = vmax.f32 %v9857_v46, 0.0 }
 0x11a   : > { %v1660_v34 = vrot.slane %v1658_v1, 3  ;;  %v1663_v42 = vrot.slane %v1661_v40, 4  ;;  %v674_v9 = vmul.f32 %v8173_v11, %v11806_v24  ;;  %v11808_v7 = vmax.f32 %v9872_v58, 0.0  ;;  %v11811_v58 = vld [vmem:[#allocation15_spill] sm:$0xff] }
 0x11b   : > { %8259 = vmatmul.mubr.msk.bf16.gmra.mrb[48].mxu1 %vm8257_vm8, %v8258_v41  ;;  %v1814_v41 = vshll.u32 %v11798_v38, 16  ;;  %11803 = vst [vmem:[#allocation5_spill] sm:$0xff] %v10066_v8  ;;  %5382 = vmatpush1.bf16.msra.mxu0 %v8007_v15  ;;  %v10097_v19 = vsel %vm1595_vm1, %v1611_v30, %v10066_v8  ;;  %v10099_v37 = vrot.slane %v4337_v51, 1  ;;  %v10101_v6 = vor.u32 %v4357_v31, %v4347_v26 }
 0x11c   : > { %6950 = vmatprep.mubr.msk.bf16.mxu1 %vm342_vm0, %v10024_v12  ;;  %5785 = vmatprep.subr.bf16.mxu0 %v8015_v48  ;;  %v8261_v23 = vpack.c.bf16 %v11808_v7, %v11807_v21  ;;  %v1654_v46 = vrot.slane %v11810_v57, 4  ;;  %v1676_v15 = vshrl.u32 %v11811_v58, 16  ;;  %v741_v26 = vadd.f32 %v11812_v56, %v674_v9  ;;  %v11813_v48 = vld [vmem:[#allocation3_spill] sm:$0xff]  ;;  %v8176_v57 = vld [vmem:[%s8348_s24 + $0x1b0] sm:$0xff] }
 0x11d   : > { %v4349_v1 = vshrl.u32 %v11804_v59, 16  ;;  %v1679_v40 = vshll.u32 %v11811_v58, 16  ;;  %v828_v51 = vadd.s32 216, %v11813_v48  ;;  %v10118_v47 = vor.u32 %v1663_v42, %v1660_v34  ;;  %v7980_v42 = vld [vmem:[%s8316_s20 + $0x140] ss:$8 sps:$4 sm:$0xff]  }
 0x11e   : > { %4684 = vmatmul.mubr.bf16.gmra.mrb[20].mxu0 %v4308_v36  ;;  %v8174_v36 = vld [vmem:[%s8348_s24 + $0x1b8] sm:$0xff]  ;;  %v4363_v31 = vrot.slane %v4361_v27, 1  ;;  %v797_v0 = vmax.f32 %v741_v26, 0.0  ;;  %v4353_v11 = vshll.u32 %v9909_v54, 16  ;;  %v1678_v21 = vrot.slane %v1676_v15, 3 }
 0x11f   : > { %7193 = vmatprep.mubr.msk.bf16.mxu0 %vm342_vm0, %v4332_v2  ;;  %v676_v30 = vmul.f32 %v8174_v36, %v11806_v24  ;;  %v4373_v24 = vshrl.u32 %v9837_v29, 16  ;;  %v856_v9 = vand.u32 15, %v828_v51  ;;  %v675_v34 = vmul.f32 %v8176_v57, %v8812_v43  ;;  %v7988_v15 = vld [vmem:[%s8316_s20 + $0x154] ss:$8 sps:$4 sm:$0xff]   ;;  %v11822_v36 = vld [vmem:[#allocation20_spill] sm:$0xff] }
 0x120   : > { %v1681_v27 = vrot.slane %v1679_v40, 4  ;;  %v4377_v58 = vshll.u32 %v9924_v61, 16  ;;  %v11818_v40 = vshrl.u32 %v11784_v25, 16  ;;  %v1712_v29 = vshrl.u32 %v11822_v36, 16 }
 0x121   : > { %v743_v2 = vadd.f32 %v11812_v56, %v676_v30  ;;  %vm10133_vm5 = vcmp.le.s32.totalorder %v856_v9, 14  ;;  %v742_v26 = vadd.f32 %v8877_v20, %v675_v34  ;;  %v1655_v9 = vor.u32 %v1654_v46, %v1651_v33 }
 0x122   : > { %v1682_v57 = vor.u32 %v1681_v27, %v1678_v21  ;;  %v4379_v34 = vrot.slane %v4377_v58, 1  ;;  %v4340_v33 = vsel %vm2302_vm9, %v10082_v52, %v10099_v37  ;;  %v10173_v46 = vsel %vm1595_vm1, %v10053_v45, %v10118_v47 }
 0x123   : > { %8262 = vmatmul.mubr.msk.bf16.gmra.mrb[52].mxu1 %vm8260_vm11, %v8261_v23  ;;  %v799_v7 = vmax.f32 %v743_v2, 0.0  ;;  %v8175_v23 = vld [vmem:[%s8348_s24 + $0x1a0] sm:$0xff]  ;;  %v4365_v2 = vshrl.u32 %v9909_v54, 16  ;;  %v4351_v54 = vor.u32 %v4349_v1, %v10099_v37  ;;  %11821 = vst [vmem:[#allocation26_spill] sm:$0xff] %v10173_v46  ;;  %v4364_v52 = vsel %vm2302_vm9, %v10101_v6, %v4363_v31 }
 0x124   : > { %6971 = vmatprep.mubr.msk.bf16.mxu1 %vm342_vm0, %v9890_v18  ;;  %v827_v18 = vadd.s32 208, %v11813_v48  ;;  %v673_v32 = vmul.f32 %v8175_v23, %v8812_v43  ;;  %v1669_v48 = vrot.slane %v11818_v40, 3  ;;  %v7986_v23 = vld [vmem:[%s8316_s20 + $0x150] ss:$8 sps:$4 sm:$0xff]   ;;  %v7992_v37 = vld [vmem:[%s8316_s20 + $0x160] ss:$8 sps:$4 sm:$0xff]  }
 0x125   : > { %v1052_v56 = vsel %vm10133_vm5, %v799_v7, 0.0  ;;  %v4355_v7 = vrot.slane %v4353_v11, 1  ;;  %v4389_v11 = vshrl.u32 %v9924_v61, 16  ;;  %v4393_v58 = vshll.u32 %v9973_v55, 16 }
 0x126   : > { %v855_v59 = vand.u32 15, %v827_v18  ;;  %v740_v43 = vadd.f32 %v8877_v20, %v673_v32  ;;  %4694 = vmatmul.mubr.bf16.gmra.mrb[24].mxu0 %v4324_v35  ;;  %v11819_v18 = vshll.u32 %v11784_v25, 16  ;;  %1120 = vst.msk [vmem:[#allocation2 + $0x1e8] sm:$0xff] %vm342_vm0, %v1052_v56  ;;  %v11820_v20 = vld [vmem:[#allocation18_spill] sm:$0xff]  ;;  %v4375_v32 = vor.u32 %v4373_v24, %v4363_v31 }
 0x127   : > { %7194 = vmatprep.mubr.msk.bf16.mxu0 %vm342_vm0, %v4348_v17  ;;  %v1697_v35 = vshll.u32 %v11820_v20, 16  ;;  %v4367_v24 = vor.u32 %v4365_v2, %v4355_v7  ;;  %v1715_v61 = vshll.u32 %v11822_v36, 16  ;;  %v4356_v56 = vsel %vm2302_vm9, %v4351_v54, %v4355_v7  ;;  %v8000_v31 = vld [vmem:[%s8316_s20 + $0x174] ss:$8 sps:$4 sm:$0xff]   ;;  %v7998_v54 = vld [vmem:[%s8316_s20 + $0x170] ss:$8 sps:$4 sm:$0xff]  }
 0x128   : > { %vm10129_vm10 = vcmp.ge.s32.totalorder %v855_v59, 1  ;;  %v1672_v51 = vrot.slane %v11819_v18, 4  ;;  %v796_v25 = vmax.f32 %v740_v43, 0.0  ;;  %v798_v59 = vmax.f32 %v742_v26, 0.0 }
 0x129   : > { %v1050_v30 = vsel %vm10129_vm10, %v797_v0, 0.0  ;;  %v4369_v0 = vshll.u32 %v9962_v62, 16  ;;  %v1699_v27 = vrot.slane %v1697_v35, 4  ;;  %v10193_v43 = vsel %vm1595_vm1, %v10118_v47, %v1682_v57 }
 0x12a   : > { %1118 = vst.msk [vmem:[#allocation2 + $0x1d8] sm:$0xff] %vm342_vm0, %v1050_v30  ;;  %v10161_v17 = vsel %vm10129_vm10, %v796_v25, 0.0  ;;  %v10165_v30 = vsel %vm10133_vm5, %v798_v59, 0.0  ;;  %v10175_v1 = vor.u32 %v1672_v51, %v1669_v48  ;;  %11824 = vst [vmem:[#allocation8_spill] sm:$0xff] %v10193_v43  ;;  %v4380_v6 = vsel %vm2302_vm9, %v4375_v32, %v4379_v34  ;;  %v11826_v48 = vld [vmem:[#allocation14_spill] sm:$0xff] }
 0x12b   : > { %2053 = vmatmul.mubr.bf16.vlgmr.msra.gmra.mrb[0].mxu1 %v1612_v14  ;;  %v1694_v14 = vshrl.u32 %v11820_v20, 16  ;;  %1117 = vst [vmem:[#allocation2 + $0x1d0] sm:$0xff] %v10161_v17  ;;  %1119 = vst [vmem:[#allocation2 + $0x1e0] sm:$0xff] %v10165_v30  ;;  %v4371_v21 = vrot.slane %v4369_v0, 1  ;;  %v4391_v40 = vor.u32 %v4389_v11, %v4379_v34  ;;  %v11827_v18 = vshrl.u32 %v11826_v48, 16 }
 0x12c   : > { %6972 = vmatprep.mubr.msk.bf16.mxu1 %vm342_vm0, %v1647_v16  ;;  %2692 = vmatpush1.bf16.msra.mxu1 %v7980_v42  ;;  %v7994_v16 = vld [vmem:[%s8316_s20 + $0x164] ss:$8 sps:$4 sm:$0xff]   ;;  %v10200_v26 = vsel %vm1595_vm1, %v1655_v9, %v10175_v1  ;;  %v11828_v2 = vshll.u32 %v11826_v48, 16  ;;  %v4381_v20 = vshrl.u32 %v9962_v62, 16  ;;  %v4395_v35 = vrot.slane %v4393_v58, 1 }
 0x12d   : > { %2693 = vmatprep.subr.bf16.mxu1 %v7988_v15  ;;  %v1696_v42 = vrot.slane %v1694_v14, 3  ;;  %v10188_v15 = vsel %vm1595_vm1, %v10066_v8, %v1655_v9  ;;  %11825 = vst [vmem:[#allocation28_spill] sm:$0xff] %v10200_v26  ;;  %v1687_v51 = vrot.slane %v11827_v18, 3  ;;  %v4385_v14 = vshll.u32 %v10018_v53, 16  ;;  %v8006_v62 = vld [vmem:[%s8316_s20 + $0x184] ss:$8 sps:$4 sm:$0xff]  }
 0x12e   : > { %11823 = vst [vmem:[#allocation9_spill] sm:$0xff] %v10188_v15  ;;  %4704 = vmatmul.mubr.bf16.gmra.mrb[28].mxu0 %v4340_v33  ;;  %v1690_v47 = vrot.slane %v11828_v2, 4  ;;  %v1714_v25 = vrot.slane %v1712_v29, 3  ;;  %v1717_v59 = vrot.slane %v1715_v61, 4  ;;  %v4405_v9 = vshrl.u32 %v9973_v55, 16  ;;  %v10520_v8 = vld [vmem:[#allocation2 + $0x118] sm:$0xff] }
 0x12f   : > { %7195 = vmatprep.mubr.msk.bf16.mxu0 %vm342_vm0, %v4364_v52  ;;  %v1700_v0 = vor.u32 %v1699_v27, %v1696_v42  ;;  %v4409_v7 = vshll.u32 %v10024_v12, 16  ;;  %v11830_v34 = vshll.u32 %v11786_v4, 16  ;;  %v4397_v33 = vshrl.u32 %v10018_v53, 16  ;;  %v11831_v42 = vld [vmem:[#allocation25_spill] sm:$0xff]  ;;  %v8004_v18 = vld [vmem:[%s8316_s20 + $0x180] ss:$8 sps:$4 sm:$0xff]  }
 0x130   : > { %2694 = vmatpush1.bf16.msra.mxu1 %v7986_v23  ;;  %v11829_v23 = vshrl.u32 %v11786_v4, 16  ;;  %v1691_v11 = vor.u32 %v1690_v47, %v1687_v51  ;;  %v1730_v27 = vshrl.u32 %v11831_v42, 16  ;;  %v1733_v55 = vshll.u32 %v11831_v42, 16  ;;  %v11833_v4 = vld [vmem:[#allocation33_spill] sm:$0xff]  ;;  %11868 = vst [vmem:[#allocation25_spill] sm:$0xff] %v10520_v8 }
 0x131   : > { %2695 = vmatprep.subr.bf16.mxu1 %v7994_v16  ;;  %v1708_v16 = vrot.slane %v11830_v34, 4  ;;  %v4387_v52 = vrot.slane %v4385_v14, 1  ;;  %v1784_v29 = vshrl.u32 %v11833_v4, 16  ;;  %v10230_v53 = vsel %vm1595_vm1, %v1682_v57, %v1700_v0 }
 0x132   : > { %v1705_v32 = vrot.slane %v11829_v23, 3  ;;  %11834 = vst [vmem:[#allocation11_spill] sm:$0xff] %v10230_v53  ;;  %v10233_v61 = vsel %vm2302_vm9, %v4391_v40, %v4395_v35  ;;  %v4407_v48 = vor.u32 %v4405_v9, %v4395_v35  ;;  %v10236_v51 = vor.u32 %v1717_v59, %v1714_v25  ;;  %v8012_v23 = vld [vmem:[%s8316_s20 + $0x194] ss:$8 sps:$4 sm:$0xff]  }
 0x133   : > { %2063 = vmatmul.mubr.bf16.gmra.mrb[4].mxu1 %v10097_v19  ;;  %v10210_v19 = vsel %vm2302_vm9, %v4367_v24, %v4371_v21  ;;  %v4401_v24 = vshll.u32 %v10064_v49, 16  ;;  %v4411_v2 = vrot.slane %v4409_v7, 1  ;;  %v4399_v14 = vor.u32 %v4397_v33, %v4387_v52 }
 0x134   : > { %6973 = vmatprep.mubr.msk.bf16.mxu1 %vm342_vm0, %v10173_v46  ;;  %2696 = vmatpush1.bf16.msra.mxu1 %v7992_v37  ;;  %v11832_v37 = vld [vmem:[#allocation29_spill] sm:$0xff]  ;;  %v10238_v47 = vor.u32 %v1708_v16, %v1705_v32  ;;  %v1732_v40 = vrot.slane %v1730_v27, 3  ;;  %v1735_v34 = vrot.slane %v1733_v55, 4  ;;  %v1786_v25 = vrot.slane %v1784_v29, 3  ;;  %v10518_v46 = vld [vmem:[#allocation2 + $0x108] sm:$0xff] }
 0x135   : > { %2697 = vmatprep.subr.bf16.mxu1 %v8000_v31  ;;  %v1766_v58 = vshrl.u32 %v11832_v37, 16  ;;  %v1769_v36 = vshll.u32 %v11832_v37, 16  ;;  %v4383_v31 = vor.u32 %v4381_v20, %v4371_v21  ;;  %v10242_v57 = vrot.slane %v4401_v24, 1  ;;  %v11839_v24 = vld [vmem:[#allocation36_spill] sm:$0xff] }
 0x136   : > { %4714 = vmatmul.mubr.bf16.gmra.mrb[32].mxu0 %v4356_v56  ;;  %v4421_v21 = vshrl.u32 %v10024_v12, 16  ;;  %v1787_v59 = vshll.u32 %v11833_v4, 16  ;;  %v10251_v56 = vsel %vm1595_vm1, %v10175_v1, %v1691_v11  ;;  %v11836_v12 = vshrl.u32 %v11789_v10, 16 }
 0x137   : > { %7196 = vmatprep.mubr.msk.bf16.mxu0 %vm342_vm0, %v4380_v6  ;;  %v1768_v20 = vrot.slane %v1766_v58, 3  ;;  %v1771_v35 = vrot.slane %v1769_v36, 4  ;;  %11835 = vst [vmem:[#allocation12_spill] sm:$0xff] %v10251_v56  ;;  %v10254_v9 = vsel %vm2302_vm9, %v4383_v31, %v4387_v52  ;;  %v11837_v7 = vshll.u32 %v11789_v10, 16  ;;  %v8010_v6 = vld [vmem:[%s8316_s20 + $0x190] ss:$8 sps:$4 sm:$0xff]  }
 0x138   : > { %2698 = vmatpush1.bf16.msra.mxu1 %v7998_v54  ;;  %v1723_v54 = vrot.slane %v11836_v12, 3  ;;  %v10263_v16 = vsel %vm1595_vm1, %v1700_v0, %v10236_v51  ;;  %v10266_v33 = vsel %vm2302_vm9, %v4407_v48, %v4411_v2  ;;  %v1789_v1 = vrot.slane %v1787_v59, 4  ;;  %v4161_v52 = vld [vmem:[#allocation2 + $0x1f8] sm:$0x1] }
 0x139   : > { %2699 = vmatprep.subr.bf16.mxu1 %v8006_v62  ;;  %v1726_v32 = vrot.slane %v11837_v7, 4  ;;  %11838 = vst [vmem:[#allocation17_spill] sm:$0xff] %v10263_v16  ;;  %v8018_v62 = vld [vmem:[%s8316_s20 + $0x1a4] ss:$8 sps:$4 sm:$0xff]   ;;  %v1802_v42 = vshrl.u32 %v11839_v24, 16  ;;  %v10272_v27 = vsel %vm1595_vm1, %v1691_v11, %v10238_v47  ;;  %v10276_v10 = vsel %vm2302_vm9, %v4399_v14, %v10242_v57 }
 0x13a   : > { %11840 = vst [vmem:[#allocation22_spill] sm:$0xff] %v10272_v27  ;;  %v1748_v0 = vshrl.u32 %v10005_v3, 16  ;;  %v1751_v55 = vshll.u32 %v10005_v3, 16  ;;  %v10280_v37 = vor.u32 %v1735_v34, %v1732_v40  ;;  %v10282_v58 = vor.u32 %v4421_v21, %v4411_v2  ;;  %v8016_v14 = vld [vmem:[%s8316_s20 + $0x1a0] ss:$8 sps:$4 sm:$0xff]  }
 0x13b   : > { %2073 = vmatmul.mubr.bf16.gmra.mrb[8].mxu1 %v10188_v15  ;;  %v10284_v36 = vor.u32 %v1771_v35, %v1768_v20  ;;  %v1790_v4 = vor.u32 %v1789_v1, %v1786_v25  ;;  %v10286_v29 = vor.u32 %v1726_v32, %v1723_v54  ;;  %v4413_v11 = vshrl.u32 %v10064_v49, 16  ;;  %v4159_v40 = vld [vmem:[#allocation2 + $0x1e8] sm:$0xff]  ;;  %v8024_v49 = vld [vmem:[%s8316_s20 + $0x1b4] ss:$8 sps:$4 sm:$0xff]   ;;  %v4160_v25 = vld [vmem:[#allocation2 + $0x1f0] sm:$0x1] }
 0x13c   : > { %6974 = vmatprep.mubr.msk.bf16.mxu1 %vm342_vm0, %v10193_v43  ;;  %2700 = vmatpush1.bf16.msra.mxu1 %v8004_v18  ;;  %v11841_v31 = vshrl.u32 %v11793_v39, 16  ;;  %v11842_v18 = vshll.u32 %v11793_v39, 16  ;;  %v4191_v2 = vpack.c.bf16 %v4161_v52, %v4161_v52  ;;  %v1804_v21 = vrot.slane %v1802_v42, 3 }
 0x13d   : > { %2701 = vmatprep.subr.bf16.mxu1 %v8012_v23  ;;  %v4157_v23 = vld [vmem:[#allocation2 + $0x1d8] sm:$0xff]  ;;  %v10296_v34 = vsel %vm1595_vm1, %v10284_v36, %v1790_v4  ;;  %v1805_v20 = vshll.u32 %v11839_v24, 16  ;;  %v1750_v35 = vrot.slane %v1748_v0, 3  ;;  %v1753_v39 = vrot.slane %v1751_v55, 4 }
 0x13e   : > { %v1777_v48 = vrot.slane %v11841_v31, 3  ;;  %v1780_v3 = vrot.slane %v11842_v18, 4  ;;  %4724 = vmatmul.mubr.bf16.gmra.mrb[36].mxu0 %v10210_v19  ;;  %v1795_v59 = vrot.slane %v1793_v44, 3  ;;  %v11843_v12 = vshll.u32 %v9729_v60, 16  ;;  %v10326_v24 = vld [vmem:[#allocation2 + $0x58] sm:$0xff] }
 0x13f   : > { %7197 = vmatprep.mubr.msk.bf16.mxu0 %vm342_vm0, %v10233_v61  ;;  %v10313_v19 = vsel %vm1595_vm1, %v10236_v51, %v10280_v37  ;;  %v11845_v7 = vshrl.u32 %v11790_v28, 16  ;;  %v1807_v60 = vrot.slane %v1805_v20, 4  ;;  %v10319_v1 = vpack.c.bf16 %v4159_v40, %v4157_v23  ;;  %v4831_v61 = vld [vmem:[#allocation2 + $0x48] sm:$0x80]  ;;  %v8022_v0 = vld [vmem:[%s8316_s20 + $0x1b0] ss:$8 sps:$4 sm:$0xff]  }
 0x140   : > { %2702 = vmatpush1.bf16.msra.mxu1 %v8010_v6  ;;  %v1798_v54 = vrot.slane %v11843_v12, 4  ;;  %11844 = vst [vmem:[#allocation24_spill] sm:$0xff] %v10313_v19  ;;  %v11846_v6 = vshll.u32 %v11790_v28, 16  ;;  %v10328_v51 = vor.u32 %v1780_v3, %v1777_v48  ;;  %v10333_v28 = vpack.c.bf16 %v10165_v30, %v10161_v17  ;;  %v10343_v48 = vld [vmem:[#allocation2 + $0x68] sm:$0xff]  ;;  %v10345_v3 = vld [vmem:[#allocation2 + $0x78] sm:$0xff]  ;;  %v11850_v30 = vld [vmem:[#allocation21_spill] sm:$0xff] }
 0x141   : > { %2703 = vmatprep.subr.bf16.mxu1 %v8018_v62  ;;  %v1741_v32 = vrot.slane %v11845_v7, 3  ;;  %v10324_v62 = vsel %vm1595_vm1, %v10238_v47, %v10286_v29  ;;  %v10336_v55 = vor.u32 %v4413_v11, %v10242_v57  ;;  %v4190_v52 = vpack.c.bf16 %v4160_v25, %v4160_v25  ;;  %v8030_v47 = vld [vmem:[%s8316_s20 + $0x1c4] ss:$8 sps:$4 sm:$0xff]   ;;  %v10359_v20 = vld [vmem:[#allocation2 + $0x70] sm:$0xff] }
 0x142   : > { %v1744_v44 = vrot.slane %v11846_v6, 4  ;;  %11847 = vst [vmem:[#allocation27_spill] sm:$0xff] %v10324_v62  ;;  %v1799_v42 = vor.u32 %v1798_v54, %v1795_v59  ;;  %v1808_v31 = vor.u32 %v1807_v60, %v1804_v21  ;;  %v10339_v18 = vor.u32 %v1753_v39, %v1750_v35  ;;  %v4830_v21 = vld [vmem:[#allocation2 + $0x40] sm:$0x80]  ;;  %v8028_v54 = vld [vmem:[%s8316_s20 + $0x1c0] ss:$8 sps:$4 sm:$0xff]  }
 0x143   : > { %2083 = vmatmul.mubr.bf16.gmra.mrb[12].mxu1 %v10200_v26  ;;  %v10341_v23 = vshll.u32 %v4191_v2, 16  ;;  %v1820_v57 = vshrl.u32 %v11850_v30, 16  ;;  %v4889_v40 = vpack.c.bf16 %v10326_v24, %v4831_v61  ;;  %v10357_v2 = vld [vmem:[#allocation2 + $0x60] sm:$0xff]  ;;  %v1823_v35 = vshll.u32 %v11850_v30, 16 }
 0x144   : > { %6975 = vmatprep.mubr.msk.bf16.mxu1 %vm342_vm0, %v10230_v53  ;;  %2704 = vmatpush1.bf16.msra.mxu1 %v8016_v14  ;;  %11848 = vst [vmem:[#allocation30_spill] sm:$0xff] %v10339_v18  ;;  %v10347_v14 = vld [vmem:[#allocation2 + $0x50] sm:$0xff]  ;;  %v10351_v17 = vsel %vm1595_vm1, %v10328_v51, %v1799_v42  ;;  %v10354_v11 = vor.u32 %v1744_v44, %v1741_v32  ;;  %11851 = vst [vmem:[#allocation31_spill] sm:$0xff] %v10357_v2  ;;  %v4425_v39 = vshll.u32 %v10319_v1, 16  ;;  %v11852_v60 = vld [vmem:[#allocation7_spill] sm:$0xff] }
 0x145   : > { %2705 = vmatprep.subr.bf16.mxu1 %v8024_v49  ;;  %11849 = vst [vmem:[#allocation32_spill] sm:$0xff] %v10347_v14  ;;  %v10362_v49 = vsel %vm1595_vm1, %v1790_v4, %v1808_v31  ;;  %v1822_v25 = vrot.slane %v1820_v57, 3  ;;  %v1813_v59 = vrot.slane %v1811_v13, 3  ;;  %v1816_v12 = vrot.slane %v1814_v41, 4  ;;  %v8036_v44 = vld [vmem:[%s8316_s20 + $0x1d4] ss:$8 sps:$4 sm:$0xff]  }
 0x146   : > { %v4417_v7 = vshll.u32 %v10333_v28, 16  ;;  %v10372_v32 = vshll.u32 %v4190_v52, 16  ;;  %v4891_v4 = vpack.c.bf16 %v10345_v3, %v10343_v48  ;;  %v1825_v6 = vrot.slane %v1823_v35, 4  ;;  %4734 = vmatmul.mubr.bf16.gmra.mrb[40].mxu0 %v10254_v9  ;;  %v8034_v35 = vld [vmem:[%s8316_s20 + $0x1d0] ss:$8 sps:$4 sm:$0xff]  }
 0x147   : > { %v4429_v13 = vshrl.u32 %v10333_v28, 16  ;;  %v4888_v38 = vpack.c.bf16 %v10347_v14, %v4830_v21  ;;  %v1817_v41 = vor.u32 %v1816_v12, %v1813_v59  ;;  %v1838_v61 = vshrl.u32 %v11852_v60, 16  ;;  %7198 = vmatprep.mubr.msk.bf16.mxu0 %vm342_vm0, %v10266_v33 }
 0x148   : > { %2706 = vmatpush1.bf16.msra.mxu1 %v8022_v0  ;;  %v4957_v0 = vshrl.u32 %v4889_v40, 16  ;;  %v4890_v52 = vpack.c.bf16 %v10359_v20, %v10357_v2  ;;  %v1826_v9 = vor.u32 %v1825_v6, %v1822_v25  ;;  %v4427_v28 = vrot.slane %v4425_v39, 1 }
 0x149   : > { %2707 = vmatprep.subr.bf16.mxu1 %v8030_v47  ;;  %v1841_v47 = vshll.u32 %v11852_v60, 16  ;;  %v4960_v30 = vshll.u32 %v4889_v40, 16  ;;  %v10390_v57 = vsel %vm1595_vm1, %v1799_v42, %v1817_v41  ;;  %v1840_v21 = vrot.slane %v1838_v61, 3 }
 0x14a   : > { %11853 = vst [vmem:[#allocation34_spill] sm:$0xff] %v10390_v57  ;;  %v4965_v59 = vshrl.u32 %v4891_v4, 16  ;;  %v4968_v12 = vshll.u32 %v4891_v4, 16  ;;  %v10394_v33 = vsel %vm1595_vm1, %v1808_v31, %v1826_v9  ;;  %v4940_v25 = vshrl.u32 %v4888_v38, 16 }
 0x14b   : > { %2093 = vmatmul.mubr.bf16.gmra.mrb[16].mxu1 %v10251_v56  ;;  %v1843_v5 = vrot.slane %v1841_v47, 4  ;;  %v11854_v6 = vshrl.u32 %v9920_v22, 16  ;;  %v11855_v40 = vshll.u32 %v9920_v22, 16  ;;  %v4943_v60 = vshll.u32 %v4888_v38, 16  ;;  %v10406_v47 = vld [vmem:[#allocation2 + $0x88] sm:$0xff] }
 0x14c   : > { %6976 = vmatprep.mubr.msk.bf16.mxu1 %vm342_vm0, %v10263_v16  ;;  %2708 = vmatpush1.bf16.msra.mxu1 %v8028_v54  ;;  %v4419_v16 = vrot.slane %v4417_v7, 1  ;;  %v4948_v61 = vshrl.u32 %v4890_v52, 16  ;;  %v4951_v54 = vshll.u32 %v4890_v52, 16  ;;  %v4428_v31 = vsel %vm2302_vm9, %v10282_v58, %v4427_v28  ;;  %v10408_v7 = vld [vmem:[#allocation2 + $0x98] sm:$0xff] }
 0x14d   : > { %2709 = vmatprep.subr.bf16.mxu1 %v8036_v44  ;;  %v1831_v39 = vrot.slane %v11854_v6, 3  ;;  %v1834_v42 = vrot.slane %v11855_v40, 4  ;;  %v10401_v56 = vor.u32 %v1843_v5, %v1840_v21  ;;  %v4437_v4 = vshrl.u32 %v10319_v1, 16  ;;  %v10412_v40 = vld [vmem:[#allocation2 + $0x80] sm:$0xff]  ;;  %v10424_v21 = vld [vmem:[#allocation2 + $0x90] sm:$0xff] }
 0x14e   : > { %v4959_v44 = vrot.slane %v4957_v0, 3  ;;  %v4962_v22 = vrot.slane %v4960_v30, 4  ;;  %v4967_v6 = vrot.slane %v4965_v59, 3  ;;  %v4970_v38 = vrot.slane %v4968_v12, 4  ;;  %4744 = vmatmul.mubr.bf16.gmra.mrb[44].mxu0 %v10276_v10  ;;  %v10428_v59 = vld [vmem:[#allocation2 + $0xb8] sm:$0xff] }
 0x14f   : > { %v10410_v53 = vor.u32 %v1834_v42, %v1831_v39  ;;  %v10416_v5 = vsel %vm1595_vm1, %v1826_v9, %v10401_v56  ;;  %v11857_v58 = vshrl.u32 %v9979_v63, 16  ;;  %v11858_v0 = vshll.u32 %v9979_v63, 16  ;;  %7199 = vmatprep.mubr.msk.bf16.mxu0 %vm342_vm0, %v4428_v31  ;;  %v10441_v39 = vld [vmem:[#allocation2 + $0xb0] sm:$0xff] }
 0x150   : > { %2710 = vmatpush1.bf16.msra.mxu1 %v8034_v35  ;;  %11856 = vst [vmem:[#allocation19_spill] sm:$0xff] %v10416_v5  ;;  %v4942_v30 = vrot.slane %v4940_v25, 3  ;;  %v10426_v35 = vld [vmem:[#allocation2 + $0xa8] sm:$0xff]  ;;  %v4945_v10 = vrot.slane %v4943_v60, 4  ;;  %v4950_v9 = vrot.slane %v4948_v61, 3  ;;  %v4953_v63 = vrot.slane %v4951_v54, 4 }
 0x151   : > { %3453 = vmatprep.subr.bf16.mxu1 %v8042_v50  ;;  %v1759_v1 = vrot.slane %v11857_v58, 3  ;;  %v1762_v52 = vrot.slane %v11858_v0, 4  ;;  %v10432_v50 = vsel %vm1595_vm1, %v1817_v41, %v10410_v53  ;;  %v4893_v12 = vpack.c.bf16 %v10408_v7, %v10406_v47  ;;  %v10439_v25 = vld [vmem:[#allocation2 + $0xa0] sm:$0xff] }
 0x152   : > { %11859 = vst [vmem:[#allocation10_spill] sm:$0xff] %v10432_v50  ;;  %v4439_v42 = vor.u32 %v4437_v4, %v4427_v28  ;;  %v4443_v58 = vrot.slane %v10341_v23, 1  ;;  %v4431_v41 = vor.u32 %v4429_v13, %v4419_v16  ;;  %v4435_v0 = vrot.slane %v10372_v32, 1 }
 0x153   : > { %2103 = vmatmul.mubr.bf16.gmra.mrb[20].mxu1 %v10272_v27  ;;  %v4963_v27 = vor.u32 %v4962_v22, %v4959_v44  ;;  %v4892_v60 = vpack.c.bf16 %v10424_v21, %v10412_v40  ;;  %v4895_v61 = vpack.c.bf16 %v10428_v59, %v10426_v35  ;;  %v10454_v54 = vsel %vm1595_vm1, %v10280_v37, %v10339_v18  ;;  %v10469_v22 = vld [vmem:[#allocation2 + $0xc8] sm:$0xff]  ;;  %v10471_v37 = vld [vmem:[#allocation2 + $0xd8] sm:$0xff] }
 0x154   : > { %6977 = vmatprep.mubr.msk.bf16.mxu1 %vm342_vm0, %v10313_v19  ;;  %v10445_v19 = vor.u32 %v4970_v38, %v4967_v6  ;;  %11860 = vst [vmem:[#allocation37_spill] sm:$0xff] %v10454_v54  ;;  %v10459_v23 = vsel %vm1595_vm1, %v10286_v29, %v10354_v11  ;;  %v10461_v32 = vor.u32 %v1762_v52, %v1759_v1  ;;  %v4983_v44 = vshrl.u32 %v4893_v12, 16  ;;  %v10473_v6 = vld [vmem:[#allocation2 + $0xc0] sm:$0xff] }
 0x155   : > { %11861 = vst [vmem:[#allocation4_spill] sm:$0xff] %v10459_v23  ;;  %v4894_v13 = vpack.c.bf16 %v10441_v39, %v10439_v25  ;;  %v4420_v28 = vsel %vm2302_vm9, %v10336_v55, %v4419_v16  ;;  %v4946_v31 = vor.u32 %v4945_v10, %v4942_v30  ;;  %v10467_v4 = vor.u32 %v4953_v63, %v4950_v9  ;;  %v10480_v16 = vld [vmem:[#allocation2 + $0xd0] sm:$0xff]  ;;  %v10482_v55 = vld [vmem:[#allocation2 + $0xe8] sm:$0xff]  ;;  %v10484_v30 = vld [vmem:[#allocation2 + $0xf8] sm:$0xff] }
 0x156   : > { %11862 = vst [vmem:[#allocation15_spill] sm:$0xff] %v10461_v32  ;;  %v4444_v29 = vsel %vm2302_vm9, %v4439_v42, %v4443_v58  ;;  %v4436_v38 = vsel %vm2302_vm9, %v4431_v41, %v4435_v0  ;;  %v1773_v1 = vsel %vm1595_vm1, %v10339_v18, %v10284_v36  ;;  %v4986_v52 = vshll.u32 %v4893_v12, 16  ;;  %11863 = vst [vmem:[#allocation6_spill] sm:$0xff] %v10480_v16  ;;  %v10488_v42 = vld [vmem:[#allocation2 + $0xe0] sm:$0xff]  ;;  %v10490_v58 = vld [vmem:[#allocation2 + $0xf0] sm:$0xff] }
 0x157   : > { %11864 = vst [vmem:[#allocation3_spill] sm:$0xff] %v10484_v30  ;;  %v4972_v10 = vsel %vm1595_vm1, %v4963_v27, %v10445_v19  ;;  %v4974_v9 = vshrl.u32 %v4892_v60, 16  ;;  %v4977_v63 = vshll.u32 %v4892_v60, 16  ;;  %v5001_v26 = vshrl.u32 %v4895_v61, 16  ;;  %11865 = vst [vmem:[#allocation18_spill] sm:$0xff] %v10488_v42  ;;  %4754 = vmatmul.mubr.bf16.gmra.mrb[48].mxu0 %v4420_v28 }
 0x158   : > { %11866 = vst [vmem:[#allocation20_spill] sm:$0xff] %v10490_v58  ;;  %v10496_v36 = vsel %vm1595_vm1, %v10354_v11, %v10461_v32  ;;  %v5004_v12 = vshll.u32 %v4895_v61, 16  ;;  %v4992_v41 = vshrl.u32 %v4894_v13, 16  ;;  %v4897_v27 = vpack.c.bf16 %v10471_v37, %v10469_v22  ;;  %v1178_v0 = vld [vmem:[#allocation2 + $0x1c8] sm:$0x7f]  ;;  %7200 = vmatprep.mubr.msk.bf16.mxu0 %vm342_vm0, %v4444_v29 }
 0x159   : > { %11867 = vst [vmem:[#allocation14_spill] sm:$0xff] %v10496_v36  ;;  %v10505_v60 = vsel %vm1595_vm1, %v4946_v31, %v10467_v4  ;;  %v4985_v28 = vrot.slane %v4983_v44, 3  ;;  %v4896_v11 = vpack.c.bf16 %v10480_v16, %v10473_v6  ;;  %v4899_v61 = vpack.c.bf16 %v10484_v30, %v10482_v55 }
 0x15a   : > { %v4988_v18 = vrot.slane %v4986_v52, 4  ;;  %v4898_v29 = vpack.c.bf16 %v10490_v58, %v10488_v42  ;;  %v4976_v43 = vrot.slane %v4974_v9, 3  ;;  %v4979_v31 = vrot.slane %v4977_v63, 4 }
 0x15b   : > { %2113 = vmatmul.mubr.bf16.gmra.mrb[24].mxu1 %v10324_v62  ;;  %v10514_v62 = vsel %vm1595_vm1, %v10461_v32, %v10328_v51  ;;  %v5003_v15 = vrot.slane %v5001_v26, 3  ;;  %v1208_v44 = vpack.c.bf16 %v1178_v0, %v1178_v0  ;;  %v5006_v45 = vrot.slane %v5004_v12, 4 }
 0x15c   : > { %6978 = vmatprep.mubr.msk.bf16.mxu1 %vm342_vm0, %v10454_v54  ;;  %v4995_v54 = vshll.u32 %v4894_v13, 16  ;;  %v4994_v50 = vrot.slane %v4992_v41, 3  ;;  %v5019_v52 = vshrl.u32 %v4897_v27, 16  ;;  %v5022_v5 = vshll.u32 %v4897_v27, 16  ;;  %v1177_v13 = vld [vmem:[#allocation2 + $0x1c0] sm:$0x7f] }
 0x15d   : > { %v5010_v57 = vshrl.u32 %v4896_v11, 16  ;;  %v5013_v30 = vshll.u32 %v4896_v11, 16  ;;  %v5037_v51 = vshrl.u32 %v4899_v61, 16  ;;  %v5040_v32 = vshll.u32 %v4899_v61, 16 }
 0x15e   : > { %v4997_v2 = vrot.slane %v4995_v54, 4  ;;  %v5028_v14 = vshrl.u32 %v4898_v29, 16  ;;  %v5031_v58 = vshll.u32 %v4898_v29, 16  ;;  %v4901_v26 = vpack.c.bf16 %v10520_v8, %v10518_v46 }
 0x15f   : > { %v4989_v9 = vor.u32 %v4988_v18, %v4985_v28  ;;  %v4980_v63 = vor.u32 %v4979_v31, %v4976_v43  ;;  %v1856_v0 = vshrl.u32 %v1208_v44, 16  ;;  %v1859_v42 = vshll.u32 %v1208_v44, 16  ;;  %4764 = vmatmul.mubr.bf16.gmra.mrb[52].mxu0 %v4436_v38  ;;  %v10529_v31 = vld [vmem:[#allocation2 + $0x100] sm:$0xff] }
 0x160   : > { %v5007_v12 = vor.u32 %v5006_v45, %v5003_v15  ;;  %v5021_v41 = vrot.slane %v5019_v52, 3  ;;  %v5024_v27 = vrot.slane %v5022_v5, 4  ;;  %v1207_v11 = vpack.c.bf16 %v1177_v13, %v1177_v13  ;;  %7241 = vmatprep.mubr.msk.bf16.mxu0 %vm342_vm0, %v4972_v10  ;;  %v8021_v52 = vld [vmem:[%s8316_s20 + $0x474] ss:$8 sps:$4 sm:$0xff]  }
 0x161   : > { %v5012_v54 = vrot.slane %v5010_v57, 3  ;;  %v5015_v61 = vrot.slane %v5013_v30, 4  ;;  %v5039_v29 = vrot.slane %v5037_v51, 3  ;;  %v5042_v16 = vrot.slane %v5040_v32, 4  ;;  %v2194_v32 = vld [vmem:[#allocation2 + $0x18] sm:$0xfe] }
 0x162   : > { %v4998_v8 = vor.u32 %v4997_v2, %v4994_v50  ;;  %v5030_v43 = vrot.slane %v5028_v14, 3  ;;  %v5033_v18 = vrot.slane %v5031_v58, 4  ;;  %v5055_v28 = vshrl.u32 %v4901_v26, 16  ;;  %v2196_v2 = vld [vmem:[#allocation2 + $0x28] sm:$0xff] }
 0x163   : > { %2123 = vmatmul.mubr.bf16.gmra.mrb[28].mxu1 %v10459_v23  ;;  %v4990_v38 = vsel %vm1595_vm1, %v10445_v19, %v4989_v9  ;;  %v1858_v45 = vrot.slane %v1856_v0, 3  ;;  %v1861_v15 = vrot.slane %v1859_v42, 4  ;;  %v5058_v5 = vshll.u32 %v4901_v26, 16  ;;  %v8013_v50 = vld [vmem:[%s8316_s20 + $0x460] ss:$8 sps:$4 sm:$0xff]  }
 0x164   : > { %6979 = vmatprep.mubr.msk.bf16.mxu1 %vm342_vm0, %v1773_v1  ;;  %v10531_v1 = vld [vmem:[#allocation2 + $0x110] sm:$0xff]  ;;  %v5025_v57 = vor.u32 %v5024_v27, %v5021_v41  ;;  %v1847_v30 = vshrl.u32 %v1207_v11, 16  ;;  %v1850_v10 = vshll.u32 %v1207_v11, 16  ;;  %v10535_v14 = vpack.c.bf16 %v10406_v47, %v10345_v3  ;;  %v2198_v47 = vld [vmem:[#allocation2 + $0x38] sm:$0xff]  ;;  %v2200_v0 = vld [vmem:[#allocation2 + $0x48] sm:$0xff] }
 0x165   : > { %v10540_v19 = vsel %vm1595_vm1, %v10467_v4, %v4980_v63  ;;  %v10543_v42 = vsel %vm1595_vm1, %v4989_v9, %v5007_v12  ;;  %v5016_v58 = vor.u32 %v5015_v61, %v5012_v54  ;;  %v5043_v44 = vor.u32 %v5042_v16, %v5039_v29  ;;  %v8019_v61 = vld [vmem:[%s8316_s20 + $0x470] ss:$8 sps:$4 sm:$0xff]  }
 0x166   : > { %v10547_v51 = vsel %vm1595_vm1, %v4980_v63, %v4998_v8  ;;  %v10549_v13 = vor.u32 %v5033_v18, %v5030_v43  ;;  %v5057_v26 = vrot.slane %v5055_v28, 3  ;;  %v4900_v3 = vpack.c.bf16 %v10531_v1, %v10529_v31  ;;  %v10582_v18 = vld [vmem:[#allocation2 + $0x128] sm:$0xff] }
 0x167   : > { %v1862_v4 = vor.u32 %v1861_v15, %v1858_v45  ;;  %v5060_v41 = vrot.slane %v5058_v5, 4  ;;  %v10553_v27 = vpack.c.bf16 %v2196_v2, %v2194_v32  ;;  %v10557_v16 = vpack.c.bf16 %v10412_v40, %v10359_v20  ;;  %5396 = vmatmul.mubr.bf16.vlgmr.msra.gmra.mrb[0].mxu0 %v10505_v60  ;;  %v8027_v60 = vld [vmem:[%s8316_s20 + $0x484] ss:$8 sps:$4 sm:$0xff]  }
 0x168   : > { %v10562_v9 = vsel %vm1595_vm1, %v5007_v12, %v5025_v57  ;;  %v1849_v63 = vrot.slane %v1847_v30, 3  ;;  %v1852_v11 = vrot.slane %v1850_v10, 4  ;;  %v2355_v54 = vshll.u32 %v10535_v14, 16  ;;  %5786 = vmatpush1.bf16.msra.mxu0 %v8013_v50  ;;  %7242 = vmatprep.mubr.msk.bf16.mxu0 %vm342_vm0, %v4990_v38  ;;  %v2193_v50 = vld [vmem:[#allocation2 + $0x10] sm:$0xfe] }
 0x169   : > { %11869 = vst [vmem:[#allocation29_spill] sm:$0xff] %v10557_v16  ;;  %v10569_v29 = vsel %vm1595_vm1, %v4998_v8, %v5016_v58  ;;  %v10572_v20 = vsel %vm1595_vm1, %v5025_v57, %v5043_v44  ;;  %v10574_v40 = vpack.c.bf16 %v2200_v0, %v2198_v47  ;;  %5787 = vmatprep.subr.bf16.mxu0 %v8021_v52  ;;  %v5046_v43 = vshrl.u32 %v4900_v3, 16  ;;  %v10584_v8 = vld [vmem:[#allocation2 + $0x138] sm:$0xff] }
 0x16a   : > { %v10580_v12 = vsel %vm1595_vm1, %v5016_v58, %v10549_v13  ;;  %v10588_v28 = vpack.c.bf16 %v10426_v35, %v10408_v7  ;;  %v10592_v38 = vsel %vm1595_vm1, %v10401_v56, %v1862_v4  ;;  %v10594_v45 = vor.u32 %v5060_v41, %v5057_v26  ;;  %v8025_v7 = vld [vmem:[%s8316_s20 + $0x480] ss:$8 sps:$4 sm:$0xff]   ;;  %v8033_v52 = vld [vmem:[%s8316_s20 + $0x494] ss:$8 sps:$4 sm:$0xff]  }
 0x16b   : > { %2133 = vmatmul.mubr.bf16.gmra.mrb[32].mxu1 %v10496_v36  ;;  %v2318_v15 = vshll.u32 %v10553_v27, 16  ;;  %v2347_v5 = vshll.u32 %v10557_v16, 16  ;;  %v1853_v57 = vor.u32 %v1852_v11, %v1849_v63  ;;  %v10598_v30 = vrot.slane %v2355_v54, 1  ;;  %v2199_v63 = vld [vmem:[#allocation2 + $0x40] sm:$0xff] }
 0x16c   : > { %6980 = vmatprep.mubr.msk.bf16.mxu1 %vm342_vm0, %v10296_v34  ;;  %v5049_v34 = vshll.u32 %v4900_v3, 16  ;;  %11870 = vst [vmem:[#allocation33_spill] sm:$0xff] %v10588_v28  ;;  %v2367_v10 = vshrl.u32 %v10535_v14, 16  ;;  %v2371_v32 = vshll.u32 %v10588_v28, 16  ;;  %5788 = vmatpush1.bf16.msra.mxu0 %v8019_v61  ;;  %v2316_v35 = vshrl.u32 %v10553_v27, 16  ;;  %v2197_v27 = vld [vmem:[#allocation2 + $0x30] sm:$0xff] }
 0x16d   : > { %v2323_v56 = vshll.u32 %v10574_v40, 16  ;;  %v4903_v2 = vpack.c.bf16 %v10584_v8, %v10582_v18  ;;  %v10609_v58 = vpack.c.bf16 %v10439_v25, %v10424_v21  ;;  %5789 = vmatprep.subr.bf16.mxu0 %v8027_v60  ;;  %v5048_v26 = vrot.slane %v5046_v43, 3  ;;  %v10626_v25 = vld [vmem:[#allocation2] sm:$0xff]  ;;  %v10641_v43 = vld [vmem:[#allocation2 + $0x130] sm:$0xff] }
 0x16e   : > { %v5051_v3 = vrot.slane %v5049_v34, 4  ;;  %v2369_v47 = vor.u32 %v2367_v10, %v10598_v30  ;;  %v2373_v0 = vrot.slane %v2371_v32, 1  ;;  %v10615_v4 = vsel %vm1595_vm1, %v5043_v44, %v10594_v45  ;;  %v8039_v32 = vld [vmem:[%s8316_s20 + $0x4a4] ss:$8 sps:$4 sm:$0xff]  }
 0x16f   : > { %11871 = vst [vmem:[#allocation36_spill] sm:$0xff] %v10609_v58  ;;  %v2320_v41 = vrot.slane %v2318_v15, 1  ;;  %v10617_v11 = vrot.slane %v2347_v5, 1  ;;  %v2359_v54 = vshrl.u32 %v10557_v16, 16  ;;  %5406 = vmatmul.mubr.bf16.gmra.mrb[4].mxu0 %v10540_v19  ;;  %v10624_v21 = vsel %vm1595_vm1, %v10410_v53, %v1853_v57  ;;  %v10639_v19 = vld [vmem:[#allocation2 + $0x120] sm:$0xff] }
 0x170   : > { %v10629_v44 = vpack.c.bf16 %v10626_v25, %v2193_v50  ;;  %v10632_v61 = vsel %vm2302_vm9, %v2369_v47, %v2373_v0  ;;  %v2363_v60 = vshll.u32 %v10609_v58, 16  ;;  %7243 = vmatprep.mubr.msk.bf16.mxu0 %vm342_vm0, %v10543_v42  ;;  %v5076_v53 = vshll.u32 %v4903_v2, 16  ;;  %5790 = vmatpush1.bf16.msra.mxu0 %v8025_v7  ;;  %v8031_v5 = vld [vmem:[%s8316_s20 + $0x490] ss:$8 sps:$4 sm:$0xff]   ;;  %v11879_v36 = vld [vmem:[#allocation31_spill] sm:$0xff] }
 0x171   : > { %v2361_v34 = vor.u32 %v2359_v54, %v10617_v11  ;;  %v10646_v15 = vpack.c.bf16 %v10469_v22, %v10428_v59  ;;  %v10649_v57 = vor.u32 %v5051_v3, %v5048_v26  ;;  %v10653_v10 = vpack.c.bf16 %v2199_v63, %v2197_v27  ;;  %5791 = vmatprep.subr.bf16.mxu0 %v8033_v52  ;;  %v8037_v63 = vld [vmem:[%s8316_s20 + $0x4a0] ss:$8 sps:$4 sm:$0xff]  }
 0x172   : > { %v2365_v42 = vrot.slane %v2363_v60, 1  ;;  %v2304_v50 = vshrl.u32 %v10629_v44, 16  ;;  %v2383_v47 = vshrl.u32 %v10588_v28, 16  ;;  %v2306_v22 = vshll.u32 %v10629_v44, 16 }
 0x173   : > { %2143 = vmatmul.mubr.bf16.gmra.mrb[36].mxu1 %v10514_v62  ;;  %v5073_v62 = vshrl.u32 %v4903_v2, 16  ;;  %11872 = vst [vmem:[#allocation21_spill] sm:$0xff] %v10646_v15  ;;  %v2321_v2 = vor.u32 %v2320_v41, %v2316_v35  ;;  %v2387_v59 = vshll.u32 %v10646_v15, 16  ;;  %v4902_v7 = vpack.c.bf16 %v10641_v43, %v10639_v19 }
 0x174   : > { %6981 = vmatprep.mubr.msk.bf16.mxu1 %vm342_vm0, %v10362_v49  ;;  %v10651_v49 = vrot.slane %v2323_v56, 1  ;;  %v10663_v56 = vsel %vm2302_vm9, %v2361_v34, %v2365_v42  ;;  %v10667_v52 = vpack.c.bf16 %v10473_v6, %v10441_v39  ;;  %v5078_v26 = vrot.slane %v5076_v53, 4  ;;  %5792 = vmatpush1.bf16.msra.mxu0 %v8031_v5 }
 0x175   : > { %v5075_v35 = vrot.slane %v5073_v62, 3  ;;  %v2385_v3 = vor.u32 %v2383_v47, %v2373_v0  ;;  %v2389_v41 = vrot.slane %v2387_v59, 1  ;;  %v10672_v27 = vsel %vm1595_vm1, %v10549_v13, %v10649_v57  ;;  %5793 = vmatprep.subr.bf16.mxu0 %v8039_v32  ;;  %v10686_v0 = vld [vmem:[#allocation2 + $0x148] sm:$0xff]  ;;  %v10688_v13 = vld [vmem:[#allocation2 + $0x158] sm:$0xff] }
 0x176   : > { %11873 = vst [vmem:[#allocation7_spill] sm:$0xff] %v10667_v52  ;;  %v2311_v54 = vshll.u32 %v10653_v10, 16  ;;  %v2375_v44 = vshrl.u32 %v10609_v58, 16  ;;  %v2379_v60 = vshll.u32 %v10667_v52, 16  ;;  %v10680_v39 = vsel %vm2302_vm9, %v2321_v2, %v10651_v49  ;;  %v8045_v62 = vld [vmem:[%s8316_s20 + $0x4b4] ss:$8 sps:$4 sm:$0xff]  }
 0x177   : > { %v10684_v6 = vpack.c.bf16 %v10343_v48, %v10326_v24  ;;  %v10692_v53 = vsel %vm2302_vm9, %v2385_v3, %v2389_v41  ;;  %v10696_v34 = vpack.c.bf16 %v10482_v55, %v10471_v37  ;;  %5416 = vmatmul.mubr.bf16.gmra.mrb[8].mxu0 %v10547_v51  ;;  %v2308_v5 = vrot.slane %v2306_v22, 1  ;;  %v8043_v47 = vld [vmem:[%s8316_s20 + $0x4b0] ss:$8 sps:$4 sm:$0xff]  }
 0x178   : > { %v5064_v24 = vshrl.u32 %v4902_v7, 16  ;;  %v2377_v48 = vor.u32 %v2375_v44, %v2365_v42  ;;  %v2381_v32 = vrot.slane %v2379_v60, 1  ;;  %7244 = vmatprep.mubr.msk.bf16.mxu0 %vm342_vm0, %v10562_v9  ;;  %v10704_v2 = vor.u32 %v5078_v26, %v5075_v35  ;;  %5794 = vmatpush1.bf16.msra.mxu0 %v8037_v63  ;;  %v11876_v22 = vld [vmem:[#allocation18_spill] sm:$0xff]  ;;  %v8051_v35 = vld [vmem:[%s8316_s20 + $0x4c4] ss:$8 sps:$4 sm:$0xff]  }
 0x179   : > { %11874 = vst [vmem:[#allocation38_spill] sm:$0xff] %v10696_v34  ;;  %v5067_v37 = vshll.u32 %v4902_v7, 16  ;;  %v2399_v55 = vshrl.u32 %v10646_v15, 16  ;;  %v2313_v51 = vrot.slane %v2311_v54, 1  ;;  %v4905_v42 = vpack.c.bf16 %v10688_v13, %v10686_v0  ;;  %5795 = vmatprep.subr.bf16.mxu0 %v8045_v62  ;;  %v11878_v60 = vld [vmem:[#allocation32_spill] sm:$0xff]  ;;  %v10731_v62 = vld [vmem:[#allocation2 + $0x140] sm:$0xff] }
 0x17a   : > { %v10712_v59 = vsel %vm2302_vm9, %v2377_v48, %v2381_v32  ;;  %v2335_v9 = vshrl.u32 %v10574_v40, 16  ;;  %v2339_v7 = vshll.u32 %v10684_v6, 16  ;;  %v2309_v54 = vor.u32 %v2308_v5, %v2304_v50  ;;  %v11881_v58 = vld [vmem:[#allocation34_spill] sm:$0xff] }
 0x17b   : > { %2153 = vmatmul.mubr.bf16.gmra.mrb[40].mxu1 %v10351_v17  ;;  %v2403_v17 = vshll.u32 %v10696_v34, 16  ;;  %v2401_v26 = vor.u32 %v2399_v55, %v2389_v41  ;;  %v5066_v44 = vrot.slane %v5064_v24, 3  ;;  %v10723_v23 = vpack.c.bf16 %v11879_v36, %v11878_v60  ;;  %v8049_v24 = vld [vmem:[%s8316_s20 + $0x4c0] ss:$8 sps:$4 sm:$0xff]  }
 0x17c   : > { %6982 = vmatprep.mubr.msk.bf16.mxu1 %vm342_vm0, %v10394_v33  ;;  %v11875_v33 = vld [vmem:[#allocation6_spill] sm:$0xff]  ;;  %v2391_v48 = vshrl.u32 %v10667_v52, 16  ;;  %v5069_v40 = vrot.slane %v5067_v37, 4  ;;  %v5091_v36 = vshrl.u32 %v4905_v42, 16  ;;  %v5094_v5 = vshll.u32 %v4905_v42, 16  ;;  %5796 = vmatpush1.bf16.msra.mxu0 %v8043_v47  ;;  %v10756_v42 = vld [vmem:[#allocation2 + $0x168] sm:$0xff] }
 0x17d   : > { %v10716_v3 = vpack.c.bf16 %v11876_v22, %v11875_v33  ;;  %v2405_v63 = vrot.slane %v2403_v17, 1  ;;  %v10729_v33 = vsel %vm1595_vm1, %v10594_v45, %v10704_v2  ;;  %v10733_v22 = vld [vmem:[#allocation2 + $0x150] sm:$0xff]  ;;  %v11880_v17 = vld [vmem:[#allocation3_spill] sm:$0xff]  ;;  %v2337_v37 = vor.u32 %v2335_v9, %v10651_v49  ;;  %5797 = vmatprep.subr.bf16.mxu0 %v8051_v35  ;;  %v10758_v49 = vld [vmem:[#allocation2 + $0x178] sm:$0xff] }
 0x17e   : > { %v2393_v55 = vor.u32 %v2391_v48, %v2381_v32  ;;  %v10742_v45 = vpack.c.bf16 %v10518_v46, %v11880_v17  ;;  %v10745_v60 = vrot.slane %v2339_v7, 1  ;;  %v2327_v52 = vshrl.u32 %v10653_v10, 16  ;;  %v11882_v9 = vld [vmem:[#allocation19_spill] sm:$0xff]  ;;  %v11883_v35 = vld [vmem:[#allocation20_spill] sm:$0xff]  ;;  %v8055_v17 = vld [vmem:[%s8316_s20 + $0x4d0] ss:$8 sps:$4 sm:$0xff]  }
 0x17f   : > { %11877 = vst [vmem:[#allocation6_spill] sm:$0xff] %v10716_v3  ;;  %v10736_v50 = vsel %vm2302_vm9, %v2401_v26, %v2405_v63  ;;  %v2395_v41 = vshll.u32 %v10716_v3, 16  ;;  %v8057_v26 = vld [vmem:[%s8316_s20 + $0x4d4] ss:$8 sps:$4 sm:$0xff]   ;;  %5426 = vmatmul.mubr.bf16.gmra.mrb[12].mxu0 %v10569_v29  ;;  %v10752_v32 = vsel %vm2302_vm9, %v2309_v54, %v2313_v51  ;;  %v4904_v46 = vpack.c.bf16 %v10733_v22, %v10731_v62 }
 0x180   : > { %v2415_v10 = vshrl.u32 %v10696_v34, 16  ;;  %v2419_v47 = vshll.u32 %v10742_v45, 16  ;;  %7245 = vmatprep.mubr.msk.bf16.mxu0 %vm342_vm0, %v10572_v20  ;;  %v10766_v29 = vor.u32 %v5069_v40, %v5066_v44  ;;  %v10774_v54 = vpack.c.bf16 %v10529_v31, %v11883_v35  ;;  %5798 = vmatpush1.bf16.msra.mxu0 %v8049_v24  ;;  %v8063_v44 = vld [vmem:[%s8316_s20 + $0x4e4] ss:$8 sps:$4 sm:$0xff]  }
 0x181   : > { %v2397_v15 = vrot.slane %v2395_v41, 1  ;;  %v5093_v48 = vrot.slane %v5091_v36, 3  ;;  %v5096_v41 = vrot.slane %v5094_v5, 4  ;;  %v2329_v28 = vor.u32 %v2327_v52, %v2313_v51  ;;  %5799 = vmatprep.subr.bf16.mxu0 %v8057_v26  ;;  %v11885_v5 = vld [vmem:[#allocation25_spill] sm:$0xff] }
 0x182   : > { %11884 = vst [vmem:[#allocation18_spill] sm:$0xff] %v10774_v54  ;;  %v2417_v34 = vor.u32 %v2415_v10, %v2405_v63  ;;  %v4907_v20 = vpack.c.bf16 %v10758_v49, %v10756_v42  ;;  %v2407_v40 = vshrl.u32 %v10716_v3, 16  ;;  %v5082_v16 = vshrl.u32 %v4904_v46, 16  ;;  %v10801_v3 = vld [vmem:[#allocation2 + $0x170] sm:$0xff] }
 0x183   : > { %2163 = vmatmul.mubr.bf16.gmra.mrb[44].mxu1 %v11881_v58  ;;  %v2331_v58 = vshll.u32 %v10723_v23, 16  ;;  %v10770_v7 = vsel %vm2302_vm9, %v2393_v55, %v2397_v15  ;;  %v2411_v55 = vshll.u32 %v10774_v54, 16  ;;  %v5085_v31 = vshll.u32 %v4904_v46, 16 }
 0x184   : > { %6983 = vmatprep.mubr.msk.bf16.mxu1 %vm342_vm0, %v11882_v9  ;;  %v2421_v9 = vrot.slane %v2419_v47, 1  ;;  %v10787_v63 = vpack.c.bf16 %v10582_v18, %v11885_v5  ;;  %v2351_v51 = vshrl.u32 %v10684_v6, 16  ;;  %v2409_v24 = vor.u32 %v2407_v40, %v2397_v15  ;;  %5800 = vmatpush1.bf16.msra.mxu0 %v8055_v17  ;;  %v4866_v5 = vld [vmem:[#allocation2 + $0x160] sm:$0xff]  ;;  %v8069_v40 = vld [vmem:[%s8316_s20 + $0x4f4] ss:$8 sps:$4 sm:$0xff]  }
 0x185   : > { %v10789_v52 = vrot.slane %v2331_v58, 1  ;;  %v2413_v26 = vrot.slane %v2411_v55, 1  ;;  %v10794_v10 = vsel %vm2302_vm9, %v2337_v37, %v10745_v60  ;;  %v10796_v47 = vor.u32 %v5096_v41, %v5093_v48  ;;  %5801 = vmatprep.subr.bf16.mxu0 %v8063_v44  ;;  %v11886_v48 = vld [vmem:[#allocation10_spill] sm:$0xff] }
 0x186   : > { %v10783_v36 = vsel %vm2302_vm9, %v2417_v34, %v2421_v9  ;;  %v8061_v34 = vld [vmem:[%s8316_s20 + $0x4e0] ss:$8 sps:$4 sm:$0xff]   ;;  %v2431_v46 = vshrl.u32 %v10742_v45, 16  ;;  %v2435_v18 = vshll.u32 %v10787_v63, 16  ;;  %v5109_v35 = vshrl.u32 %v4907_v20, 16 }
 0x187   : > { %v5112_v58 = vshll.u32 %v4907_v20, 16  ;;  %v10804_v15 = vsel %vm2302_vm9, %v2409_v24, %v2413_v26  ;;  %v10809_v37 = vpack.c.bf16 %v10639_v19, %v10531_v1  ;;  %5436 = vmatmul.mubr.bf16.gmra.mrb[16].mxu0 %v10580_v12  ;;  %v5084_v41 = vrot.slane %v5082_v16, 3  ;;  %v4871_v12 = vld [vmem:[#allocation2 + $0x188] sm:$0xff] }
 0x188   : > { %v5087_v17 = vrot.slane %v5085_v31, 4  ;;  %v2433_v20 = vor.u32 %v2431_v46, %v2421_v9  ;;  %v2437_v55 = vrot.slane %v2435_v18, 1  ;;  %7246 = vmatprep.mubr.msk.bf16.mxu0 %vm342_vm0, %v10615_v4  ;;  %v10820_v1 = vsel %vm1595_vm1, %v10649_v57, %v10766_v29  ;;  %v4873_v9 = vld [vmem:[#allocation2 + $0x198] sm:$0xff]  ;;  %5802 = vmatpush1.bf16.msra.mxu0 %v8061_v34 }
 0x189   : > { %v10824_v19 = vsel %vm2302_vm9, %v2329_v28, %v10789_v52  ;;  %v2353_v16 = vor.u32 %v2351_v51, %v10745_v60  ;;  %v2423_v44 = vshrl.u32 %v10774_v54, 16  ;;  %v10834_v4 = vpack.c.bf16 %v10801_v3, %v4866_v5  ;;  %v8067_v57 = vld [vmem:[%s8316_s20 + $0x4f0] ss:$8 sps:$4 sm:$0xff]   ;;  %5803 = vmatprep.subr.bf16.mxu0 %v8069_v40 }
 0x18a   : > { %v10838_v28 = vsel %vm2302_vm9, %v2433_v20, %v2437_v55  ;;  %v2427_v31 = vshll.u32 %v10809_v37, 16  ;;  %v5111_v60 = vrot.slane %v5109_v35, 3  ;;  %v5114_v51 = vrot.slane %v5112_v58, 4 }
 0x18b   : > { %2173 = vmatmul.mubr.bf16.gmra.mrb[48].mxu1 %v11886_v48  ;;  %v2425_v24 = vor.u32 %v2423_v44, %v2413_v26  ;;  %v10843_v46 = vpack.c.bf16 %v10686_v0, %v10584_v8  ;;  %v10846_v18 = vor.u32 %v5087_v17, %v5084_v41  ;;  %v10849_v34 = vpack.c.bf16 %v4873_v9, %v4871_v12 }
 0x18c   : > { %6984 = vmatprep.mubr.msk.bf16.mxu1 %vm342_vm0, %v10592_v38  ;;  %v10831_v38 = vsel %vm1595_vm1, %v10704_v2, %v10796_v47  ;;  %v8075_v2 = vld [vmem:[%s8316_s20 + $0x504] ss:$8 sps:$4 sm:$0xff]   ;;  %v2429_v54 = vrot.slane %v2427_v31, 1  ;;  %v10853_v20 = vsel %vm2302_vm9, %v2353_v16, %v10598_v30  ;;  %v2447_v35 = vshrl.u32 %v10787_v63, 16  ;;  %5804 = vmatpush1.bf16.msra.mxu0 %v8067_v57 }
 0x18d   : > { %11887 = vst [vmem:[#allocation32_spill] sm:$0xff] %v10843_v46  ;;  %v2451_v26 = vshll.u32 %v10843_v46, 16  ;;  %v10859_v8 = vpack.c.bf16 %v10731_v62, %v10641_v43  ;;  %v2439_v41 = vshrl.u32 %v10809_v37, 16  ;;  %v10867_v30 = vor.u32 %v5114_v51, %v5111_v60  ;;  %6511 = vmatprep.subr.bf16.mxu0 %v8075_v2  ;;  %v4877_v43 = vld [vmem:[#allocation2 + $0x1b8] sm:$0xff] }
 0x18e   : > { %v10864_v40 = vsel %vm2302_vm9, %v2425_v24, %v2429_v54  ;;  %v2449_v17 = vor.u32 %v2447_v35, %v2437_v55  ;;  %v10875_v57 = vpack.c.bf16 %v10756_v42, %v10688_v13  ;;  %v2463_v31 = vshrl.u32 %v10843_v46, 16  ;;  %v4875_v35 = vld [vmem:[#allocation2 + $0x1a8] sm:$0xff] }
 0x18f   : > { %11888 = vst [vmem:[#allocation31_spill] sm:$0xff] %v10859_v8  ;;  %v2453_v16 = vrot.slane %v2451_v26, 1  ;;  %v2443_v44 = vshll.u32 %v10859_v8, 16  ;;  %5446 = vmatmul.mubr.bf16.gmra.mrb[20].mxu0 %v10672_v27  ;;  %v2441_v62 = vor.u32 %v2439_v41, %v2429_v54  ;;  %v10886_v27 = vpack.c.bf16 %v4866_v5, %v10733_v22  ;;  %v4872_v5 = vld [vmem:[#allocation2 + $0x190] sm:$0xff]  ;;  %v10899_v26 = vld [vmem:[#allocation2 + $0x1a0] sm:$0xff] }
 0x190   : > { %11889 = vst [vmem:[#allocation3_spill] sm:$0xff] %v10875_v57  ;;  %7247 = vmatprep.mubr.msk.bf16.mxu0 %vm342_vm0, %v10729_v33  ;;  %v2455_v54 = vshrl.u32 %v10859_v8, 16  ;;  %v2467_v60 = vshll.u32 %v10875_v57, 16  ;;  %v10892_v51 = vpack.c.bf16 %v4871_v12, %v10758_v49  ;;  %v2479_v22 = vshrl.u32 %v10875_v57, 16 }
 0x191   : > { %v10883_v55 = vsel %vm2302_vm9, %v2449_v17, %v2453_v16  ;;  %11890 = vst [vmem:[#allocation34_spill] sm:$0xff] %v10886_v27  ;;  %v2465_v42 = vor.u32 %v2463_v31, %v2453_v16  ;;  %v2459_v2 = vshll.u32 %v10886_v27, 16  ;;  %v2471_v12 = vshrl.u32 %v10886_v27, 16 }
 0x192   : > { %11891 = vst [vmem:[#allocation19_spill] sm:$0xff] %v10892_v51  ;;  %v2469_v41 = vrot.slane %v2467_v60, 1  ;;  %v2483_v17 = vshll.u32 %v10892_v51, 16  ;;  %v10910_v31 = vpack.c.bf16 %v10899_v26, %v4872_v5  ;;  %v5116_v8 = vsel %vm1595_vm1, %v10796_v47, %v10867_v30 }
 0x193   : > { %2183 = vmatmul.mubr.bf16.gmra.mrb[52].mxu1 %v10624_v21  ;;  %v2445_v21 = vrot.slane %v2443_v44, 1  ;;  %v2461_v16 = vrot.slane %v2459_v2, 1  ;;  %v10906_v44 = vpack.c.bf16 %v4875_v35, %v4873_v9  ;;  %v11899_v47 = vshrl.u32 %v10723_v23, 16 }
 0x194   : > { %7025 = vmatprep.mubr.msk.bf16.mxu1 %vm342_vm0, %v10680_v39  ;;  %v4870_v39 = vld [vmem:[#allocation2 + $0x180] sm:$0xff]  ;;  %11894 = vst [vmem:[#allocation10_spill] sm:$0xff] %v10910_v31  ;;  %v2481_v60 = vor.u32 %v2479_v22, %v2469_v41  ;;  %v2485_v48 = vrot.slane %v2483_v17, 1  ;;  %v10925_v22 = vld [vmem:[#allocation2 + $0x1c8] sm:$0xff] }
 0x195   : > { %v10895_v33 = vsel %vm2302_vm9, %v2441_v62, %v2445_v21  ;;  %v2457_v24 = vor.u32 %v2455_v54, %v2445_v21  ;;  %v10903_v49 = vpack.c.bf16 %v4870_v39, %v10801_v3  ;;  %11893 = vst [vmem:[#allocation25_spill] sm:$0xff] %v10906_v44  ;;  %v2495_v62 = vshrl.u32 %v10892_v51, 16  ;;  %v8040_v21 = vld [vmem:[%s8316_s20 + $0x1e0] ss:$8 sps:$4 sm:$0xff]   ;;  %v8048_v3 = vld [vmem:[%s8316_s20 + $0x1f4] ss:$8 sps:$4 sm:$0xff]  }
 0x196   : > { %v10914_v54 = vsel %vm2302_vm9, %v2465_v42, %v2469_v41  ;;  %v2473_v9 = vor.u32 %v2471_v12, %v2461_v16  ;;  %v2499_v2 = vshll.u32 %v10906_v44, 16  ;;  %v4876_v42 = vld [vmem:[#allocation2 + $0x1b0] sm:$0xff]  ;;  %v10927_v41 = vld [vmem:[#allocation2 + $0x1c0] sm:$0xff]  ;;  %v10930_v17 = vsel %vm2302_vm9, %v2481_v60, %v2485_v48 }
 0x197   : > { %11892 = vst [vmem:[#allocation20_spill] sm:$0xff] %v10903_v49  ;;  %v2475_v13 = vshll.u32 %v10903_v49, 16  ;;  %v10919_v58 = vsel %vm2302_vm9, %v2457_v24, %v2461_v16  ;;  %v2487_v0 = vshrl.u32 %v10903_v49, 16  ;;  %5456 = vmatmul.mubr.bf16.gmra.mrb[24].mxu0 %v10820_v1  ;;  %v2497_v12 = vor.u32 %v2495_v62, %v2485_v48 }
 0x198   : > { %v2491_v16 = vshll.u32 %v10910_v31, 16  ;;  %7248 = vmatprep.mubr.msk.bf16.mxu0 %vm342_vm0, %v10831_v38  ;;  %v10938_v1 = vpack.c.bf16 %v10925_v22, %v4877_v43  ;;  %v2511_v49 = vshrl.u32 %v10906_v44, 16  ;;  %v10942_v60 = vpack.c.bf16 %v10927_v41, %v4876_v42  ;;  %v8054_v38 = vld [vmem:[%s8316_s20 + $0x204] ss:$8 sps:$4 sm:$0xff]  }
 0x199   : > { %v2477_v24 = vrot.slane %v2475_v13, 1  ;;  %v8046_v13 = vld [vmem:[%s8316_s20 + $0x1f0] ss:$8 sps:$4 sm:$0xff]  }
 0x19a   : > { %v2493_v51 = vrot.slane %v2491_v16, 1  ;;  %v2515_v44 = vshll.u32 %v10938_v1, 16  ;;  %v2507_v57 = vshll.u32 %v10942_v60, 16 }
 0x19b   : > { %2724 = vmatmul.mubr.bf16.vlgmr.msra.gmra.mrb[0].mxu1 %v10752_v32  ;;  %v2501_v32 = vrot.slane %v2499_v2, 1  ;;  %v10946_v48 = vsel %vm2302_vm9, %v2473_v9, %v2477_v24  ;;  %v2489_v62 = vor.u32 %v2487_v0, %v2477_v24  ;;  %v11895_v0 = vshrl.u32 %v10834_v4, 16 }
 0x19c   : > { %7026 = vmatprep.mubr.msk.bf16.mxu1 %vm342_vm0, %v10794_v10  ;;  %3454 = vmatpush1.bf16.msra.mxu1 %v8040_v21  ;;  %v2503_v10 = vshrl.u32 %v10910_v31, 16  ;;  %v5089_v21 = vsel %vm1595_vm1, %v10766_v29, %v10846_v18  ;;  %v10967_v31 = vrot.slane %v2507_v57, 1  ;;  %v11897_v29 = vshrl.u32 %v10849_v34, 16 }
 0x19d   : > { %3455 = vmatprep.subr.bf16.mxu1 %v8048_v3  ;;  %v10951_v2 = vsel %vm2302_vm9, %v2497_v12, %v2501_v32  ;;  %v2513_v27 = vor.u32 %v2511_v49, %v2501_v32  ;;  %v5102_v9 = vrot.slane %v11895_v0, 3  ;;  %v10961_v3 = vsel %vm2302_vm9, %v2489_v62, %v2493_v51 }
 0x19e   : > { %v2505_v24 = vor.u32 %v2503_v10, %v2493_v51  ;;  %v11896_v12 = vshll.u32 %v10834_v4, 16  ;;  %v4908_v49 = vpack.c.bf16 %v4872_v5, %v4870_v39  ;;  %v10965_v32 = vrot.slane %v2515_v44, 1  ;;  %v8052_v51 = vld [vmem:[%s8316_s20 + $0x200] ss:$8 sps:$4 sm:$0xff]   ;;  %v8060_v4 = vld [vmem:[%s8316_s20 + $0x214] ss:$8 sps:$4 sm:$0xff]  }
 0x19f   : > { %v5129_v0 = vrot.slane %v11897_v29, 3  ;;  %v11898_v62 = vshll.u32 %v10849_v34, 16  ;;  %v4911_v10 = vpack.c.bf16 %v4877_v43, %v4875_v35  ;;  %5466 = vmatmul.mubr.bf16.gmra.mrb[28].mxu0 %v5089_v21  ;;  %v2345_v34 = vor.u32 %v11899_v47, %v10789_v52  ;;  %v8066_v21 = vld [vmem:[%s8316_s20 + $0x224] ss:$8 sps:$4 sm:$0xff]   ;;  %v8064_v29 = vld [vmem:[%s8316_s20 + $0x220] ss:$8 sps:$4 sm:$0xff]  }
 0x1a0   : > { %v5105_v16 = vrot.slane %v11896_v12, 4  ;;  %3456 = vmatpush1.bf16.msra.mxu1 %v8046_v13  ;;  %v10980_v57 = vsel %vm2302_vm9, %v2513_v27, %v10965_v32  ;;  %v10984_v39 = vsel %vm2302_vm9, %v2505_v24, %v10967_v31  ;;  %7249 = vmatprep.mubr.msk.bf16.mxu0 %vm342_vm0, %v5116_v8  ;;  %v5118_v27 = vshrl.u32 %v4908_v49, 16  ;;  %v8078_v47 = vld [vmem:[%s8316_s20 + $0x244] ss:$8 sps:$4 sm:$0xff]  }
 0x1a1   : > { %v5132_v46 = vrot.slane %v11898_v62, 4  ;;  %3457 = vmatprep.subr.bf16.mxu1 %v8054_v38  ;;  %v5121_v5 = vshll.u32 %v4908_v49, 16  ;;  %v5145_v44 = vshrl.u32 %v4911_v10, 16  ;;  %v5148_v13 = vshll.u32 %v4911_v10, 16  ;;  %v10993_v38 = vld [vmem:[#allocation2 + $0x1d8] sm:$0xff]  ;;  %v11011_v62 = vld [vmem:[#allocation2 + $0x1d0] sm:$0xff] }
 0x1a2   : > { %v5106_v43 = vor.u32 %v5105_v16, %v5102_v9  ;;  %v2350_v52 = vsel %vm2302_vm9, %v2345_v34, %v10617_v11  ;;  %v5120_v9 = vrot.slane %v5118_v27, 3  ;;  %v4913_v24 = vpack.c.bf16 %v10993_v38, %v10925_v22  ;;  %v8072_v11 = vld [vmem:[%s8316_s20 + $0x234] ss:$8 sps:$4 sm:$0xff]   ;;  %v11014_v10 = vld [vmem:[#allocation2 + $0x1e8] sm:$0xff] }
 0x1a3   : > { %2734 = vmatmul.mubr.bf16.gmra.mrb[4].mxu1 %v10824_v19  ;;  %v5133_v35 = vor.u32 %v5132_v46, %v5129_v0  ;;  %v8058_v19 = vld [vmem:[%s8316_s20 + $0x210] ss:$8 sps:$4 sm:$0xff]   ;;  %v5123_v46 = vrot.slane %v5121_v5, 4  ;;  %v5147_v16 = vrot.slane %v5145_v44, 3  ;;  %v5150_v49 = vrot.slane %v5148_v13, 4 }
 0x1a4   : > { %7027 = vmatprep.mubr.msk.bf16.mxu1 %vm342_vm0, %v10853_v20  ;;  %3458 = vmatpush1.bf16.msra.mxu1 %v8052_v51  ;;  %v4910_v20 = vpack.c.bf16 %v4876_v42, %v10899_v26  ;;  %v5107_v8 = vsel %vm1595_vm1, %v10846_v18, %v5106_v43  ;;  %v5163_v22 = vshrl.u32 %v4913_v24, 16  ;;  %v8070_v51 = vld [vmem:[%s8316_s20 + $0x230] ss:$8 sps:$4 sm:$0xff]   ;;  %v4912_v13 = vpack.c.bf16 %v11011_v62, %v10927_v41 }
 0x1a5   : > { %3459 = vmatprep.subr.bf16.mxu1 %v8060_v4  ;;  %v5134_v12 = vsel %vm1595_vm1, %v10867_v30, %v5133_v35  ;;  %v5124_v42 = vor.u32 %v5123_v46, %v5120_v9  ;;  %v5166_v30 = vshll.u32 %v4913_v24, 16  ;;  %v5151_v0 = vor.u32 %v5150_v49, %v5147_v16  ;;  %v11016_v4 = vld [vmem:[#allocation2 + $0x1f8] sm:$0xff]  ;;  %v4887_v16 = vld [vmem:[#allocation2 + $0x208] sm:$0x7f] }
 0x1a6   : > { %v5136_v26 = vshrl.u32 %v4910_v20, 16  ;;  %v5139_v18 = vshll.u32 %v4910_v20, 16  ;;  %v5165_v5 = vrot.slane %v5163_v22, 3  ;;  %v8084_v20 = vld [vmem:[%s8316_s20 + $0x254] ss:$8 sps:$4 sm:$0xff]   ;;  %v5619_v9 = vpack.c.bf16 %v11014_v10, %v10993_v38 }
 0x1a7   : > { %5476 = vmatmul.mubr.bf16.gmra.mrb[32].mxu0 %v5107_v8  ;;  %v5125_v27 = vsel %vm1595_vm1, %v5106_v43, %v5124_v42  ;;  %v5168_v44 = vrot.slane %v5166_v30, 4  ;;  %v5157_v8 = vshll.u32 %v4912_v13, 16  ;;  %v8090_v49 = vld [vmem:[%s8316_s20 + $0x264] ss:$8 sps:$4 sm:$0xff]  }
 0x1a8   : > { %3460 = vmatpush1.bf16.msra.mxu1 %v8058_v19  ;;  %7250 = vmatprep.mubr.msk.bf16.mxu0 %vm342_vm0, %v5134_v12  ;;  %v5138_v34 = vrot.slane %v5136_v26, 3  ;;  %v5152_v19 = vsel %vm1595_vm1, %v5133_v35, %v5151_v0  ;;  %v5154_v35 = vshrl.u32 %v4912_v13, 16  ;;  %v11033_v12 = vld [vmem:[#allocation2 + $0x1e0] sm:$0xff] }
 0x1a9   : > { %3461 = vmatprep.subr.bf16.mxu1 %v8066_v21  ;;  %v4915_v21 = vpack.c.bf16 %v11016_v4, %v11014_v10  ;;  %v5169_v41 = vor.u32 %v5168_v44, %v5165_v5  ;;  %v5159_v26 = vrot.slane %v5157_v8, 4  ;;  %v4886_v13 = vld [vmem:[#allocation2 + $0x200] sm:$0x7f] }
 0x1ab   : > { %2744 = vmatmul.mubr.bf16.gmra.mrb[8].mxu1 %v2350_v52  ;;  %v8076_v52 = vld [vmem:[%s8316_s20 + $0x240] ss:$8 sps:$4 sm:$0xff]   ;;  %v5181_v46 = vshrl.u32 %v4915_v21, 16  ;;  %v5184_v24 = vshll.u32 %v4915_v21, 16 }
 0x1ac   : > { %7028 = vmatprep.mubr.msk.bf16.mxu1 %vm342_vm0, %v10632_v61  ;;  %3462 = vmatpush1.bf16.msra.mxu1 %v8064_v29  ;;  %v5141_v61 = vrot.slane %v5139_v18, 4  ;;  %v5170_v29 = vsel %vm1595_vm1, %v5151_v0, %v5169_v41  ;;  %v4914_v18 = vpack.c.bf16 %v10626_v25, %v11033_v12 }
 0x1ad   : > { %3463 = vmatprep.subr.bf16.mxu1 %v8072_v11  ;;  %v5156_v11 = vrot.slane %v5154_v35, 3  ;;  %v5183_v22 = vrot.slane %v5181_v46, 3  ;;  %v5186_v30 = vrot.slane %v5184_v24, 4  ;;  %v8178_v46 = vld [vmem:[%s8316_s20 + $0x284] ss:$8 sps:$4 sm:$0xff]  }
 0x1ae   : > { %v5142_v43 = vor.u32 %v5141_v61, %v5138_v34  ;;  %v5618_v34 = vpack.c.bf16 %v11033_v12, %v11011_v62  ;;  %v8096_v61 = vld [vmem:[%s8316_s20 + $0x274] ss:$8 sps:$4 sm:$0xff]   ;;  %v5175_v0 = vshll.u32 %v4914_v18, 16 }
 0x1af   : > { %5486 = vmatmul.mubr.bf16.gmra.mrb[36].mxu0 %v5125_v27  ;;  %v5160_v25 = vor.u32 %v5159_v26, %v5156_v11  ;;  %v5187_v27 = vor.u32 %v5186_v30, %v5183_v22  ;;  %v8081_v11 = vld [vmem:[%s8316_s20 + $0x514] ss:$8 sps:$4 sm:$0xff]   ;;  %v8097_v26 = vld [vmem:[%s8316_s20 + $0x540] ss:$8 sps:$4 sm:$0xff]  }
 0x1b0   : > { %3464 = vmatpush1.bf16.msra.mxu1 %v8070_v51  ;;  %7251 = vmatprep.mubr.msk.bf16.mxu0 %vm342_vm0, %v5152_v19  ;;  %v4917_v51 = vpack.c.bf16 %v4887_v16, %v4887_v16  ;;  %v8094_v19 = vld [vmem:[%s8316_s20 + $0x270] ss:$8 sps:$4 sm:$0xff]   ;;  %v8102_v22 = vld [vmem:[%s8316_s20 + $0x554] ss:$8 sps:$4 sm:$0xff]  }
 0x1b1   : > { %3465 = vmatprep.subr.bf16.mxu1 %v8078_v47  ;;  %v8088_v47 = vld [vmem:[%s8316_s20 + $0x260] ss:$8 sps:$4 sm:$0xff]   ;;  %v5161_v21 = vsel %vm1595_vm1, %v5142_v43, %v5160_v25  ;;  %v11238_v62 = vld [vmem:[#allocation2 + $0x198] sm:$0xff] }
 0x1b2   : > { %v5199_v5 = vshrl.u32 %v4917_v51, 16  ;;  %v5202_v44 = vshll.u32 %v4917_v51, 16  ;;  %v8100_v51 = vld [vmem:[%s8316_s20 + $0x550] ss:$8 sps:$4 sm:$0xff]  }
 0x1b3   : > { %2754 = vmatmul.mubr.bf16.gmra.mrb[12].mxu1 %v10663_v56  ;;  %v8082_v56 = vld [vmem:[%s8316_s20 + $0x250] ss:$8 sps:$4 sm:$0xff]  }
 0x1b4   : > { %7029 = vmatprep.mubr.msk.bf16.mxu1 %vm342_vm0, %v10692_v53  ;;  %3466 = vmatpush1.bf16.msra.mxu1 %v8076_v52  ;;  %v5143_v53 = vsel %vm1595_vm1, %v5124_v42, %v5142_v43  ;;  %v5172_v42 = vshrl.u32 %v4914_v18, 16  ;;  %v5177_v52 = vrot.slane %v5175_v0, 4  ;;  %v5201_v35 = vrot.slane %v5199_v5, 3  ;;  %v2250_v18 = vld [vmem:[#allocation2 + $0x1d8] sm:$0x1] }
 0x1b5   : > { %3467 = vmatprep.subr.bf16.mxu1 %v8084_v20  ;;  %v4916_v20 = vpack.c.bf16 %v4886_v13, %v4886_v13  ;;  %v5204_v8 = vrot.slane %v5202_v44, 4  ;;  %v2280_v30 = vpack.c.bf16 %v2250_v18, %v2250_v18  ;;  %v8103_v5 = vld [vmem:[%s8316_s20 + $0x560] ss:$8 sps:$4 sm:$0xff]   ;;  %v2920_v13 = vld [vmem:[#allocation2 + $0x20] sm:$0x80] }
 0x1b6   : > { %v11904_v44 = vld [vmem:[#allocation7_spill] sm:$0xff]  ;;  %v8182_v18 = vld [vmem:[%s8316_s20 + $0x294] ss:$8 sps:$4 sm:$0xff]  }
 0x1b7   : > { %5496 = vmatmul.mubr.bf16.gmra.mrb[40].mxu0 %v5143_v53  ;;  %v5190_v43 = vshrl.u32 %v4916_v20, 16  ;;  %v5205_v16 = vor.u32 %v5204_v8, %v5201_v35  ;;  %v2531_v0 = vshll.u32 %v2280_v30, 16  ;;  %v8106_v35 = vld [vmem:[%s8316_s20 + $0x570] ss:$8 sps:$4 sm:$0xff]   ;;  %v11915_v30 = vld [vmem:[#allocation3_spill] sm:$0xff] }
 0x1b8   : > { %3468 = vmatpush1.bf16.msra.mxu1 %v8082_v56  ;;  %7252 = vmatprep.mubr.msk.bf16.mxu0 %vm342_vm0, %v5170_v29  ;;  %v5193_v56 = vshll.u32 %v4916_v20, 16  ;;  %v8180_v8 = vld [vmem:[#allocation2 + $0x30] sm:$0xff] }
 0x1b9   : > { %3469 = vmatprep.subr.bf16.mxu1 %v8090_v49  ;;  %v5192_v49 = vrot.slane %v5190_v43, 3  ;;  %v5206_v29 = vsel %vm1595_vm1, %v5187_v27, %v5205_v16 }
 0x1ba   : > { %v5195_v53 = vrot.slane %v5193_v56, 4 }
 0x1bb   : > { %2764 = vmatmul.mubr.bf16.gmra.mrb[16].mxu1 %v10712_v59  ;;  %v5174_v59 = vrot.slane %v5172_v42, 3 }
 0x1bc   : > { %7030 = vmatprep.mubr.msk.bf16.mxu1 %vm342_vm0, %v10736_v50  ;;  %3470 = vmatpush1.bf16.msra.mxu1 %v8088_v47  ;;  %v5188_v50 = vsel %vm1595_vm1, %v5169_v41, %v5187_v27  ;;  %v2921_v47 = vld [vmem:[#allocation2 + $0x28] sm:$0x80]  ;;  %v2249_v27 = vld [vmem:[#allocation2 + $0x1d0] sm:$0x1] }
 0x1bd   : > { %3471 = vmatprep.subr.bf16.mxu1 %v8096_v61  ;;  %v5178_v24 = vor.u32 %v5177_v52, %v5174_v59  ;;  %v8105_v61 = vld [vmem:[%s8316_s20 + $0x564] ss:$8 sps:$4 sm:$0xff]  }
 0x1bf   : > { %5506 = vmatmul.mubr.bf16.gmra.mrb[44].mxu0 %v5161_v21  ;;  %v5179_v41 = vsel %vm1595_vm1, %v5160_v25, %v5178_v24  ;;  %v8179_v25 = vld [vmem:[#allocation2 + $0x38] sm:$0xff]  ;;  %v2279_v21 = vpack.c.bf16 %v2249_v27, %v2249_v27  ;;  %v11919_v27 = vld [vmem:[#allocation19_spill] sm:$0xff] }
 0x1c0   : > { %3472 = vmatpush1.bf16.msra.mxu1 %v8094_v19  ;;  %7253 = vmatprep.mubr.msk.bf16.mxu0 %vm342_vm0, %v5188_v50  ;;  %v2979_v42 = vpack.c.bf16 %v8179_v25, %v2921_v47  ;;  %v11905_v19 = vld [vmem:[#allocation38_spill] sm:$0xff]  ;;  %v2533_v50 = vrot.slane %v2531_v0, 1  ;;  %v8188_v25 = vld [vmem:[%s8316_s20 + $0x2c4] ss:$8 sps:$4 sm:$0xff]  }
 0x1c1   : > { %7365 = vmatprep.subr.bf16.mxu1 %v8178_v46  ;;  %v2978_v46 = vpack.c.bf16 %v8180_v8, %v2920_v13  ;;  %v8186_v47 = vld [vmem:[%s8316_s20 + $0x2b4] ss:$8 sps:$4 sm:$0xff]   ;;  %v11918_v0 = vld [vmem:[#allocation11_spill] sm:$0xff] }
 0x1c2   : > { %v3047_v59 = vshrl.u32 %v2979_v42, 16  ;;  %v3050_v52 = vshll.u32 %v2979_v42, 16  ;;  %v11916_v42 = vld [vmem:[#allocation28_spill] sm:$0xff] }
 0x1c3   : > { %2774 = vmatmul.mubr.bf16.gmra.mrb[20].mxu1 %v10770_v7  ;;  %v5196_v7 = vor.u32 %v5195_v53, %v5192_v49  ;;  %v3030_v49 = vshrl.u32 %v2978_v46, 16  ;;  %v11906_v53 = vld [vmem:[#allocation6_spill] sm:$0xff]  ;;  %v8192_v13 = vld [vmem:[%s8316_s20 + $0x2e4] ss:$8 sps:$4 sm:$0xff]  }
 0x1c4   : > { %7031 = vmatprep.mubr.msk.bf16.mxu1 %vm342_vm0, %v10783_v36  ;;  %v3049_v43 = vrot.slane %v3047_v59, 3  ;;  %v3052_v56 = vrot.slane %v3050_v52, 4  ;;  %v11922_v59 = vld [vmem:[#allocation17_spill] sm:$0xff] }
 0x1c5   : > { %v5197_v36 = vsel %vm1595_vm1, %v5178_v24, %v5196_v7  ;;  %v2519_v24 = vshrl.u32 %v10942_v60, 16  ;;  %v11923_v52 = vld [vmem:[#allocation25_spill] sm:$0xff] }
 0x1c7   : > { %5516 = vmatmul.mubr.bf16.gmra.mrb[48].mxu0 %v5179_v41  ;;  %v8109_v41 = vld [vmem:[%s8316_s20 + $0x580] ss:$8 sps:$4 sm:$0xff]   ;;  %v2521_v7 = vor.u32 %v2519_v24, %v10967_v31  ;;  %v8196_v24 = vld [vmem:[%s8316_s20 + $0x304] ss:$8 sps:$4 sm:$0xff]  }
 0x1c8   : > { %7254 = vmatprep.mubr.msk.bf16.mxu0 %vm342_vm0, %v5206_v29  ;;  %v3033_v29 = vshll.u32 %v2978_v46, 16  ;;  %v8195_v46 = vld [vmem:[%s8316_s20 + $0x2f0] ss:$8 sps:$4 sm:$0xff]  }
 0x1cb   : > { %2784 = vmatmul.mubr.bf16.gmra.mrb[24].mxu1 %v10804_v15  ;;  %v8073_v15 = vld [vmem:[%s8316_s20 + $0x500] ss:$8 sps:$4 sm:$0xff]  }
 0x1cc   : > { %7032 = vmatprep.mubr.msk.bf16.mxu1 %vm342_vm0, %v10838_v28  ;;  %v8079_v28 = vld [vmem:[%s8316_s20 + $0x510] ss:$8 sps:$4 sm:$0xff]  }
 0x1cf   : > { %5526 = vmatmul.mubr.bf16.gmra.mrb[52].mxu0 %v5197_v36 }
 0x1d0   : > { %7295 = vmatprep.mubr.msk.bf16.mxu0 %vm342_vm0, %v10684_v6  ;;  %v8085_v6 = vld [vmem:[%s8316_s20 + $0x520] ss:$8 sps:$4 sm:$0xff]  }
 0x1d3   : > { %2794 = vmatmul.mubr.bf16.gmra.mrb[28].mxu1 %v10864_v40  ;;  %v8087_v40 = vld [vmem:[%s8316_s20 + $0x524] ss:$8 sps:$4 sm:$0xff]  }
 0x1d4   : > { %7033 = vmatprep.mubr.msk.bf16.mxu1 %vm342_vm0, %v10883_v55  ;;  %v8093_v55 = vld [vmem:[%s8316_s20 + $0x534] ss:$8 sps:$4 sm:$0xff]  }
 0x1d7   : > { %5818 = vmatmul.mubr.bf16.vlgmr.msra.gmra.mrb[0].mxu0 %v10723_v23  ;;  %v11900_v23 = vld [vmem:[#allocation29_spill] sm:$0xff] }
 0x1d8   : > { %6512 = vmatpush1.bf16.msra.mxu0 %v8073_v15  ;;  %7296 = vmatprep.mubr.msk.bf16.mxu0 %vm342_vm0, %v10535_v14  ;;  %v8091_v14 = vld [vmem:[%s8316_s20 + $0x530] ss:$8 sps:$4 sm:$0xff]   ;;  %v3053_v15 = vor.u32 %v3052_v56, %v3049_v43  ;;  %v11926_v56 = vld [vmem:[#allocation24_spill] sm:$0xff] }
 0x1d9   : > { %6513 = vmatprep.subr.bf16.mxu0 %v8081_v11  ;;  %v8112_v11 = vld [vmem:[%s8316_s20 + $0x590] ss:$8 sps:$4 sm:$0xff]  }
 0x1da   : > { %v11925_v43 = vld [vmem:[#allocation10_spill] sm:$0xff] }
 0x1db   : > { %2804 = vmatmul.mubr.bf16.gmra.mrb[32].mxu1 %v10895_v33  ;;  %v11901_v33 = vld [vmem:[#allocation33_spill] sm:$0xff] }
 0x1dc   : > { %7034 = vmatprep.mubr.msk.bf16.mxu1 %vm342_vm0, %v10914_v54  ;;  %6514 = vmatpush1.bf16.msra.mxu0 %v8079_v28  ;;  %v8099_v54 = vld [vmem:[%s8316_s20 + $0x544] ss:$8 sps:$4 sm:$0xff]   ;;  %v3032_v28 = vrot.slane %v3030_v49, 3  ;;  %v11184_v49 = vld [vmem:[#allocation2 + $0x158] sm:$0xff] }
 0x1dd   : > { %6515 = vmatprep.subr.bf16.mxu0 %v8087_v40  ;;  %v3035_v40 = vrot.slane %v3033_v29, 4  ;;  %v6017_v29 = vld [vmem:[#allocation2 + $0x68] sm:$0xff] }
 0x1df   : > { %5828 = vmatmul.mubr.bf16.gmra.mrb[4].mxu0 %v11900_v23  ;;  %v3036_v31 = vor.u32 %v3035_v40, %v3032_v28  ;;  %v11909_v23 = vld [vmem:[#allocation5_spill] sm:$0xff] }
 0x1e0   : > { %7297 = vmatprep.mubr.msk.bf16.mxu0 %vm342_vm0, %v11901_v33  ;;  %6516 = vmatpush1.bf16.msra.mxu0 %v8085_v6  ;;  %v11907_v6 = vld [vmem:[#allocation23_spill] sm:$0xff] }
 0x1e1   : > { %6517 = vmatprep.subr.bf16.mxu0 %v8093_v55  ;;  %v3062_v55 = vsel %vm1595_vm1, %v3053_v15, %v11907_v6  ;;  %v3045_v33 = vsel %vm1595_vm1, %v3036_v31, %v11909_v23  ;;  %v8199_v6 = vld [vmem:[%s8316_s20 + $0x310] ss:$8 sps:$4 sm:$0xff]   ;;  %v11927_v31 = vld [vmem:[#allocation27_spill] sm:$0xff] }
 0x1e2   : > { %v6014_v23 = vld [vmem:[#allocation2 + $0x50] sm:$0xfe] }
 0x1e3   : > { %2814 = vmatmul.mubr.bf16.gmra.mrb[36].mxu1 %v10919_v58  ;;  %v11902_v58 = vld [vmem:[#allocation36_spill] sm:$0xff] }
 0x1e4   : > { %7035 = vmatprep.mubr.msk.bf16.mxu1 %vm342_vm0, %v10930_v17  ;;  %6518 = vmatpush1.bf16.msra.mxu0 %v8091_v14  ;;  %v11903_v17 = vld [vmem:[#allocation21_spill] sm:$0xff]  ;;  %v11910_v14 = vld [vmem:[#allocation26_spill] sm:$0xff] }
 0x1e5   : > { %6519 = vmatprep.subr.bf16.mxu0 %v8099_v54  ;;  %v11911_v54 = vld [vmem:[#allocation32_spill] sm:$0xff] }
 0x1e7   : > { %5838 = vmatmul.mubr.bf16.gmra.mrb[8].mxu0 %v11902_v58  ;;  %v11912_v58 = vld [vmem:[#allocation9_spill] sm:$0xff] }
 0x1e8   : > { %7298 = vmatprep.mubr.msk.bf16.mxu0 %vm342_vm0, %v11903_v17  ;;  %6520 = vmatpush1.bf16.msra.mxu0 %v8097_v26  ;;  %v8181_v26 = vld [vmem:[%s8316_s20 + $0x280] ss:$8 sps:$4 sm:$0xff]  }
 0x1e9   : > { %6521 = vmatprep.subr.bf16.mxu0 %v8102_v22  ;;  %v8184_v22 = vld [vmem:[%s8316_s20 + $0x2a4] ss:$8 sps:$4 sm:$0xff]  }
 0x1ea   : > { %v11914_v17 = vld [vmem:[#allocation8_spill] sm:$0xff] }
 0x1eb   : > { %2824 = vmatmul.mubr.bf16.gmra.mrb[40].mxu1 %v10946_v48  ;;  %v2527_v48 = vshrl.u32 %v10938_v1, 16 }
 0x1ec   : > { %7036 = vmatprep.mubr.msk.bf16.mxu1 %vm342_vm0, %v10951_v2  ;;  %6522 = vmatpush1.bf16.msra.mxu0 %v8100_v51  ;;  %v8108_v2 = vld [vmem:[%s8316_s20 + $0x574] ss:$8 sps:$4 sm:$0xff]   ;;  %v8185_v51 = vld [vmem:[%s8316_s20 + $0x2a0] ss:$8 sps:$4 sm:$0xff]  }
 0x1ed   : > { %6523 = vmatprep.subr.bf16.mxu0 %v8105_v61  ;;  %v2529_v20 = vor.u32 %v2527_v48, %v10965_v32  ;;  %v8114_v32 = vld [vmem:[%s8316_s20 + $0x594] ss:$8 sps:$4 sm:$0xff]   ;;  %v8187_v61 = vld [vmem:[%s8316_s20 + $0x2b0] ss:$8 sps:$4 sm:$0xff]  }
 0x1ee   : > { %v11917_v48 = vld [vmem:[#allocation34_spill] sm:$0xff] }
 0x1ef   : > { %5848 = vmatmul.mubr.bf16.gmra.mrb[12].mxu0 %v11904_v44  ;;  %v2534_v16 = vsel %vm2302_vm9, %v2529_v20, %v2533_v50  ;;  %v8191_v44 = vld [vmem:[%s8316_s20 + $0x2d0] ss:$8 sps:$4 sm:$0xff]   ;;  %v8193_v20 = vld [vmem:[%s8316_s20 + $0x2e0] ss:$8 sps:$4 sm:$0xff]  }
 0x1f0   : > { %7299 = vmatprep.mubr.msk.bf16.mxu0 %vm342_vm0, %v11905_v19  ;;  %6524 = vmatpush1.bf16.msra.mxu0 %v8103_v5  ;;  %v8189_v5 = vld [vmem:[%s8316_s20 + $0x2c0] ss:$8 sps:$4 sm:$0xff]  }
 0x1f1   : > { %6525 = vmatprep.subr.bf16.mxu0 %v8108_v2  ;;  %v8190_v2 = vld [vmem:[%s8316_s20 + $0x2d4] ss:$8 sps:$4 sm:$0xff]   ;;  %v11920_v19 = vld [vmem:[#allocation12_spill] sm:$0xff] }
 0x1f2   : > { %v11167_v50 = vld [vmem:[#allocation2 + $0x128] sm:$0xff] }
 0x1f3   : > { %2834 = vmatmul.mubr.bf16.gmra.mrb[44].mxu1 %v10961_v3  ;;  %v8111_v3 = vld [vmem:[%s8316_s20 + $0x584] ss:$8 sps:$4 sm:$0xff]  }
 0x1f4   : > { %7037 = vmatprep.mubr.msk.bf16.mxu1 %vm342_vm0, %v10980_v57  ;;  %v2523_v57 = vshll.u32 %v2279_v21, 16  ;;  %6526 = vmatpush1.bf16.msra.mxu0 %v8106_v35  ;;  %v11921_v21 = vld [vmem:[#allocation20_spill] sm:$0xff]  ;;  %v11169_v35 = vld [vmem:[#allocation2 + $0x138] sm:$0xff] }
 0x1f5   : > { %6527 = vmatprep.subr.bf16.mxu0 %v8111_v3  ;;  %v8194_v3 = vld [vmem:[%s8316_s20 + $0x2f4] ss:$8 sps:$4 sm:$0xff]   ;;  %v2995_v8 = vpack.c.bf16 %v11169_v35, %v11167_v50 }
 0x1f6   : > { %v2525_v36 = vrot.slane %v2523_v57, 1  ;;  %v11924_v57 = vld [vmem:[#allocation22_spill] sm:$0xff] }
 0x1f7   : > { %5858 = vmatmul.mubr.bf16.gmra.mrb[16].mxu0 %v11906_v53  ;;  %v6015_v53 = vld [vmem:[#allocation2 + $0x58] sm:$0xfe] }
 0x1f8   : > { %7300 = vmatprep.mubr.msk.bf16.mxu0 %vm342_vm0, %v10742_v45  ;;  %6528 = vmatpush1.bf16.msra.mxu0 %v8109_v41  ;;  %v11908_v45 = vld [vmem:[#allocation18_spill] sm:$0xff]  ;;  %v3181_v41 = vshrl.u32 %v2995_v8, 16 }
 0x1f9   : > { %6529 = vmatprep.subr.bf16.mxu0 %v8114_v32  ;;  %v3184_v32 = vshll.u32 %v2995_v8, 16  ;;  %v11232_v8 = vld [vmem:[#allocation2 + $0x170] sm:$0xff] }
 0x1fa   : > { %v3183_v28 = vrot.slane %v3181_v41, 3 }
 0x1fb   : > { %2844 = vmatmul.mubr.bf16.gmra.mrb[48].mxu1 %v10984_v39  ;;  %v2526_v39 = vsel %vm2302_vm9, %v2521_v7, %v2525_v36  ;;  %v8197_v7 = vld [vmem:[%s8316_s20 + $0x300] ss:$8 sps:$4 sm:$0xff]   ;;  %v8198_v36 = vld [vmem:[%s8316_s20 + $0x314] ss:$8 sps:$4 sm:$0xff]   ;;  %v3186_v40 = vrot.slane %v3184_v32, 4 }
 0x1fc   : > { %7038 = vmatprep.mubr.msk.bf16.mxu1 %vm342_vm0, %v2534_v16  ;;  %6530 = vmatpush1.bf16.msra.mxu0 %v8112_v11  ;;  %v11182_v16 = vld [vmem:[#allocation2 + $0x148] sm:$0xff]  ;;  %v6073_v11 = vpack.c.bf16 %v6017_v29, %v6015_v53  ;;  %v8200_v53 = vld [vmem:[#allocation2] sm:$0xff] }
 0x1fd   : > { %v2997_v15 = vpack.c.bf16 %v11184_v49, %v11182_v16  ;;  %v11241_v29 = vpack.c.bf16 %v8200_v53, %v8200_v53 }
 0x1fe   : > { %v6136_v10 = vshrl.u32 %v6073_v11, 16 }
 0x1ff   : > { %5868 = vmatmul.mubr.bf16.gmra.mrb[20].mxu0 %v11908_v45  ;;  %v11193_v45 = vld [vmem:[#allocation2 + $0x150] sm:$0xff] }
 0x200   : > { %7301 = vmatprep.mubr.msk.bf16.mxu0 %vm342_vm0, %v10787_v63  ;;  %v8183_v63 = vld [vmem:[%s8316_s20 + $0x290] ss:$8 sps:$4 sm:$0xff]  }
 0x203   : > { %2854 = vmatmul.mubr.bf16.gmra.mrb[52].mxu1 %v2526_v39  ;;  %v6021_v39 = vld [vmem:[#allocation2 + $0x88] sm:$0xff] }
 0x204   : > { %7079 = vmatprep.mubr.msk.bf16.mxu1 %vm342_vm0, %v3062_v55  ;;  %v11191_v55 = vld [vmem:[#allocation2 + $0x140] sm:$0xff] }
 0x207   : > { %5878 = vmatmul.mubr.bf16.gmra.mrb[24].mxu0 %v10809_v37  ;;  %v11913_v37 = vld [vmem:[#allocation31_spill] sm:$0xff] }
 0x208   : > { %7302 = vmatprep.mubr.msk.bf16.mxu0 %vm342_vm0, %v11911_v54  ;;  %v11203_v54 = vld [vmem:[#allocation2 + $0x208] sm:$0xff] }
 0x209   : > { %v5621_v38 = vpack.c.bf16 %v11203_v54, %v11016_v4  ;;  %v6023_v4 = vld [vmem:[#allocation2 + $0x98] sm:$0xff] }
 0x20b   : > { %3486 = vmatmul.mubr.bf16.vlgmr.msra.gmra.mrb[0].mxu1 %v3045_v33  ;;  %v6016_v33 = vld [vmem:[#allocation2 + $0x60] sm:$0xff] }
 0x20c   : > { %7080 = vmatprep.mubr.msk.bf16.mxu1 %vm342_vm0, %v11910_v14  ;;  %7375 = vmatpush1.bf16.msra.mxu1 %v8181_v26  ;;  %v11928_v14 = vld [vmem:[#allocation37_spill] sm:$0xff]  ;;  %v3199_v26 = vshrl.u32 %v2997_v15, 16 }
 0x20d   : > { %7366 = vmatprep.subr.bf16.mxu1 %v8182_v18  ;;  %v3202_v18 = vshll.u32 %v2997_v15, 16 }
 0x20f   : > { %5888 = vmatmul.mubr.bf16.gmra.mrb[28].mxu0 %v11913_v37  ;;  %v6072_v37 = vpack.c.bf16 %v6016_v33, %v6014_v23  ;;  %v6027_v23 = vld [vmem:[#allocation2 + $0xb8] sm:$0xff]  ;;  %v6029_v33 = vld [vmem:[#allocation2 + $0xc8] sm:$0xff] }
 0x210   : > { %7376 = vmatpush1.bf16.msra.mxu1 %v8183_v63  ;;  %7303 = vmatprep.mubr.msk.bf16.mxu0 %vm342_vm0, %v11915_v30  ;;  %v11211_v30 = vld [vmem:[#allocation2 + $0x178] sm:$0xff] }
 0x211   : > { %7367 = vmatprep.subr.bf16.mxu1 %v8184_v22  ;;  %v6138_v22 = vshll.u32 %v6073_v11, 16  ;;  %v6022_v11 = vld [vmem:[#allocation2 + $0x90] sm:$0xff] }
 0x213   : > { %3496 = vmatmul.mubr.bf16.gmra.mrb[4].mxu1 %v11912_v58  ;;  %v3187_v58 = vor.u32 %v3186_v40, %v3183_v28  ;;  %v6024_v28 = vld [vmem:[#allocation2 + $0xa0] sm:$0xff] }
 0x214   : > { %7081 = vmatprep.mubr.msk.bf16.mxu1 %vm342_vm0, %v11914_v17  ;;  %7377 = vmatpush1.bf16.msra.mxu1 %v8185_v51  ;;  %v11209_v17 = vld [vmem:[#allocation2 + $0x168] sm:$0xff]  ;;  %v6020_v51 = vld [vmem:[#allocation2 + $0x80] sm:$0xff] }
 0x215   : > { %7368 = vmatprep.subr.bf16.mxu1 %v8186_v47  ;;  %v3201_v47 = vrot.slane %v3199_v26, 3 }
 0x217   : > { %5898 = vmatmul.mubr.bf16.gmra.mrb[32].mxu0 %v11917_v48  ;;  %v11929_v48 = vld [vmem:[#allocation30_spill] sm:$0xff] }
 0x218   : > { %7378 = vmatpush1.bf16.msra.mxu1 %v8187_v61  ;;  %7304 = vmatprep.mubr.msk.bf16.mxu0 %vm342_vm0, %v11919_v27  ;;  %v3204_v61 = vrot.slane %v3202_v18, 4 }
 0x219   : > { %7369 = vmatprep.subr.bf16.mxu1 %v8188_v25  ;;  %v6140_v25 = vrot.slane %v6138_v22, 1  ;;  %v11931_v22 = vld [vmem:[#allocation14_spill] sm:$0xff] }
 0x21b   : > { %3506 = vmatmul.mubr.bf16.gmra.mrb[8].mxu1 %v11916_v42 }
 0x21c   : > { %7082 = vmatprep.mubr.msk.bf16.mxu1 %vm342_vm0, %v11918_v0  ;;  %7379 = vmatpush1.bf16.msra.mxu1 %v8189_v5  ;;  %v3188_v0 = vsel %vm1595_vm1, %v11929_v48, %v3187_v58  ;;  %v2999_v5 = vpack.c.bf16 %v11211_v30, %v11209_v17 }
 0x21d   : > { %7370 = vmatprep.subr.bf16.mxu1 %v8190_v2 }
 0x21f   : > { %5908 = vmatmul.mubr.bf16.gmra.mrb[36].mxu0 %v11921_v21  ;;  %v11930_v21 = vld [vmem:[#allocation4_spill] sm:$0xff] }
 0x220   : > { %7380 = vmatpush1.bf16.msra.mxu1 %v8191_v44  ;;  %7305 = vmatprep.mubr.msk.bf16.mxu0 %vm342_vm0, %v11923_v52  ;;  %v6141_v52 = vor.u32 %v6140_v25, %v6136_v10  ;;  %v11258_v10 = vld [vmem:[#allocation2 + $0x190] sm:$0xff] }
 0x221   : > { %7371 = vmatprep.subr.bf16.mxu1 %v8192_v13  ;;  %v6126_v13 = vshll.u32 %v6072_v37, 16 }
 0x223   : > { %3516 = vmatmul.mubr.bf16.gmra.mrb[12].mxu1 %v11920_v19  ;;  %v6025_v19 = vld [vmem:[#allocation2 + $0xa8] sm:$0xff]  ;;  %v6128_v41 = vrot.slane %v6126_v13, 1 }
 0x224   : > { %7083 = vmatprep.mubr.msk.bf16.mxu1 %vm342_vm0, %v11922_v59  ;;  %7381 = vmatpush1.bf16.msra.mxu1 %v8193_v20  ;;  %v11228_v59 = vor.u32 %v3204_v61, %v3201_v47 }
 0x225   : > { %7372 = vmatprep.subr.bf16.mxu1 %v8194_v3  ;;  %v11230_v3 = vld [vmem:[#allocation2 + $0x160] sm:$0xff] }
 0x227   : > { %5918 = vmatmul.mubr.bf16.gmra.mrb[40].mxu0 %v11925_v43  ;;  %v11234_v43 = vpack.c.bf16 %v6025_v19, %v6023_v4 }
 0x228   : > { %7382 = vmatpush1.bf16.msra.mxu1 %v8195_v46  ;;  %7306 = vmatprep.mubr.msk.bf16.mxu0 %vm342_vm0, %v10938_v1  ;;  %v6019_v1 = vld [vmem:[#allocation2 + $0x78] sm:$0xff] }
 0x229   : > { %7373 = vmatprep.subr.bf16.mxu1 %v8196_v24  ;;  %v11205_v63 = vpack.c.bf16 %v6021_v39, %v6019_v1  ;;  %v3217_v24 = vshrl.u32 %v2999_v5, 16 }
 0x22b   : > { %3526 = vmatmul.mubr.bf16.gmra.mrb[16].mxu1 %v11924_v57  ;;  %v6143_v42 = vshll.u32 %v11205_v63, 16  ;;  %v3220_v57 = vshll.u32 %v2999_v5, 16  ;;  %v3219_v1 = vrot.slane %v3217_v24, 3  ;;  %v11269_v5 = vld [vmem:[#allocation2 + $0x1a8] sm:$0xff] }
 0x22c   : > { %7084 = vmatprep.mubr.msk.bf16.mxu1 %vm342_vm0, %v11926_v56  ;;  %7383 = vmatpush1.bf16.msra.mxu1 %v8197_v7  ;;  %v11236_v56 = vld [vmem:[#allocation2 + $0x188] sm:$0xff]  ;;  %v2998_v7 = vpack.c.bf16 %v11232_v8, %v11230_v3 }
 0x22d   : > { %7374 = vmatprep.subr.bf16.mxu1 %v8198_v36  ;;  %v6145_v20 = vrot.slane %v6143_v42, 1  ;;  %v3206_v36 = vsel %vm1595_vm1, %v3187_v58, %v11228_v59  ;;  %v3001_v40 = vpack.c.bf16 %v11238_v62, %v11236_v56  ;;  %v3222_v39 = vrot.slane %v3220_v57, 4  ;;  %v11932_v42 = vld [vmem:[#allocation15_spill] sm:$0xff]  ;;  %v6026_v57 = vld [vmem:[#allocation2 + $0xb0] sm:$0xff] }
 0x22e   : > { %v3208_v58 = vshrl.u32 %v2998_v7, 16 }
 0x22f   : > { %5928 = vmatmul.mubr.bf16.gmra.mrb[44].mxu0 %v10942_v60  ;;  %v2996_v60 = vpack.c.bf16 %v11193_v45, %v11191_v55  ;;  %v6146_v15 = vsel %vm2302_vm9, %v6141_v52, %v6145_v20  ;;  %v3223_v47 = vor.u32 %v3222_v39, %v3219_v1 }
 0x230   : > { %7384 = vmatpush1.bf16.msra.mxu1 %v8199_v6  ;;  %7307 = vmatprep.mubr.msk.bf16.mxu0 %vm342_vm0, %v5619_v9  ;;  %v6018_v9 = vld [vmem:[#allocation2 + $0x70] sm:$0xff]  ;;  %v6155_v6 = vshrl.u32 %v11205_v63, 16  ;;  %v3235_v63 = vshrl.u32 %v3001_v40, 16  ;;  %v3210_v13 = vrot.slane %v3208_v58, 3 }
 0x231   : > { %v3190_v27 = vshrl.u32 %v2996_v60, 16  ;;  %v3193_v2 = vshll.u32 %v2996_v60, 16  ;;  %v11220_v44 = vpack.c.bf16 %v6020_v51, %v6018_v9  ;;  %v3211_v60 = vshll.u32 %v2998_v7, 16  ;;  %v6031_v7 = vld [vmem:[#allocation2 + $0xd8] sm:$0xff] }
 0x232   : > { %v3238_v9 = vshll.u32 %v3001_v40, 16  ;;  %v11262_v51 = vpack.c.bf16 %v6029_v33, %v6027_v23  ;;  %v6157_v61 = vor.u32 %v6155_v6, %v6145_v20  ;;  %v3237_v52 = vrot.slane %v3235_v63, 3  ;;  %v11286_v40 = vld [vmem:[#allocation2 + $0x1b0] sm:$0xff] }
 0x233   : > { %3536 = vmatmul.mubr.bf16.gmra.mrb[20].mxu1 %v11927_v31  ;;  %v3192_v46 = vrot.slane %v3190_v27, 3  ;;  %v3195_v12 = vrot.slane %v3193_v2, 4  ;;  %v6131_v32 = vshll.u32 %v11220_v44, 16  ;;  %v6159_v31 = vshll.u32 %v11234_v43, 16  ;;  %v11271_v2 = vld [vmem:[#allocation2 + $0x1b8] sm:$0xff] }
 0x234   : > { %7085 = vmatprep.mubr.msk.bf16.mxu1 %vm342_vm0, %v11928_v14  ;;  %v3213_v4 = vrot.slane %v3211_v60, 4  ;;  %v6147_v19 = vshrl.u32 %v11220_v44, 16  ;;  %v3240_v20 = vrot.slane %v3238_v9, 4  ;;  %v6175_v24 = vshll.u32 %v11262_v51, 16 }
 0x235   : > { %v3196_v14 = vor.u32 %v3195_v12, %v3192_v46  ;;  %v6133_v18 = vrot.slane %v6131_v32, 1  ;;  %v6161_v25 = vrot.slane %v6159_v31, 1  ;;  %v6171_v46 = vshrl.u32 %v11234_v43, 16  ;;  %v6028_v12 = vld [vmem:[#allocation2 + $0xc0] sm:$0xff] }
 0x236   : > { %v3003_v32 = vpack.c.bf16 %v11271_v2, %v11269_v5  ;;  %v3241_v1 = vor.u32 %v3240_v20, %v3237_v52  ;;  %v6177_v6 = vrot.slane %v6175_v24, 1  ;;  %v6037_v52 = vld [vmem:[#allocation2 + $0x108] sm:$0xff] }
 0x237   : > { %5938 = vmatmul.mubr.bf16.gmra.mrb[48].mxu0 %v5618_v34  ;;  %v6124_v34 = vshrl.u32 %v6072_v37, 16  ;;  %v11254_v37 = vpack.c.bf16 %v6024_v28, %v6022_v11  ;;  %v3197_v48 = vsel %vm1595_vm1, %v11932_v42, %v3196_v14  ;;  %v6149_v43 = vor.u32 %v6147_v19, %v6133_v18  ;;  %v11284_v28 = vld [vmem:[#allocation2 + $0x1a0] sm:$0xff] }
 0x238   : > { %7308 = vmatprep.mubr.msk.bf16.mxu0 %vm342_vm0, %v5621_v38  ;;  %v11256_v38 = vld [vmem:[#allocation2 + $0x180] sm:$0xff]  ;;  %v11282_v11 = vpack.c.bf16 %v6028_v12, %v6026_v57  ;;  %v6173_v39 = vor.u32 %v6171_v46, %v6161_v25  ;;  %v3253_v31 = vshrl.u32 %v3003_v32, 16  ;;  %v3256_v23 = vshll.u32 %v3003_v32, 16 }
 0x239   : > { %v6129_v26 = vor.u32 %v6128_v41, %v6124_v34  ;;  %v3000_v27 = vpack.c.bf16 %v11258_v10, %v11256_v38  ;;  %v3224_v34 = vsel %vm1595_vm1, %v11228_v59, %v3223_v47  ;;  %v6162_v41 = vsel %vm2302_vm9, %v6157_v61, %v6161_v25  ;;  %v11314_v32 = vld [vmem:[#allocation2 + $0x1c0] sm:$0xff] }
 0x23a   : > { %v3002_v60 = vpack.c.bf16 %v11286_v40, %v11284_v28  ;;  %v6163_v9 = vshrl.u32 %v11254_v37, 16  ;;  %v6167_v61 = vshll.u32 %v11282_v11, 16  ;;  %v3242_v42 = vsel %vm1595_vm1, %v3223_v47, %v3241_v1 }
 0x23b   : > { %3546 = vmatmul.mubr.bf16.gmra.mrb[24].mxu1 %v11930_v21  ;;  %v6151_v21 = vshll.u32 %v11254_v37, 16  ;;  %v3226_v53 = vshrl.u32 %v3000_v27, 16  ;;  %v3229_v44 = vshll.u32 %v3000_v27, 16  ;;  %v6032_v27 = vld [vmem:[#allocation2 + $0xe0] sm:$0xff]  ;;  %v3258_v19 = vrot.slane %v3256_v23, 4  ;;  %v6035_v37 = vld [vmem:[#allocation2 + $0xf8] sm:$0xff] }
 0x23c   : > { %7086 = vmatprep.mubr.msk.bf16.mxu1 %vm342_vm0, %v3188_v0  ;;  %v6134_v0 = vsel %vm2302_vm9, %v6129_v26, %v6133_v18  ;;  %v11292_v26 = vld [vmem:[#allocation2 + $0x1c8] sm:$0xff]  ;;  %v11294_v18 = vld [vmem:[#allocation2 + $0x1d8] sm:$0xff]  ;;  %v3244_v46 = vshrl.u32 %v3002_v60, 16  ;;  %v3247_v24 = vshll.u32 %v3002_v60, 16  ;;  %v6169_v57 = vrot.slane %v6167_v61, 1 }
 0x23d   : > { %v6153_v59 = vrot.slane %v6151_v21, 1  ;;  %v3231_v58 = vrot.slane %v3229_v44, 4  ;;  %v6187_v21 = vshrl.u32 %v11262_v51, 16  ;;  %v11312_v51 = vpack.c.bf16 %v6037_v52, %v6035_v37  ;;  %v2976_v52 = vld [vmem:[#allocation2 + $0x1e0] sm:$0x7f] }
 0x23f   : > { %5948 = vmatmul.mubr.bf16.gmra.mrb[52].mxu0 %v11241_v29  ;;  %v6154_v25 = vsel %vm2302_vm9, %v6149_v43, %v6153_v59  ;;  %v6165_v47 = vor.u32 %v6163_v9, %v6153_v59  ;;  %v3246_v59 = vrot.slane %v3244_v46, 3 }
 0x240   : > { %7349 = vmatprep.mubr.msk.bf16.mxu0 %vm342_vm0, %v6146_v15  ;;  %v3214_v15 = vor.u32 %v3213_v4, %v3210_v13  ;;  %v3005_v13 = vpack.c.bf16 %v11294_v18, %v11292_v26  ;;  %v3255_v4 = vrot.slane %v3253_v31, 3  ;;  %v2977_v31 = vld [vmem:[#allocation2 + $0x1e8] sm:$0x7f] }
 0x241   : > { %v6170_v23 = vsel %vm2302_vm9, %v6165_v47, %v6169_v57 }
 0x242   : > { %v3215_v63 = vsel %vm1595_vm1, %v3196_v14, %v3214_v15  ;;  %v3259_v44 = vor.u32 %v3258_v19, %v3255_v4 }
 0x243   : > { %3556 = vmatmul.mubr.bf16.gmra.mrb[28].mxu1 %v11931_v22  ;;  %v3228_v22 = vrot.slane %v3226_v53, 3  ;;  %v11316_v53 = vld [vmem:[#allocation2 + $0x1d0] sm:$0xff] }
 0x244   : > { %7087 = vmatprep.mubr.msk.bf16.mxu1 %vm342_vm0, %v3206_v36  ;;  %v6033_v36 = vld [vmem:[#allocation2 + $0xe8] sm:$0xff]  ;;  %v3004_v60 = vpack.c.bf16 %v11316_v53, %v11314_v32 }
 0x245   : > { %v11290_v33 = vpack.c.bf16 %v6033_v36, %v6031_v7  ;;  %v3232_v20 = vor.u32 %v3231_v58, %v3228_v22  ;;  %v6189_v7 = vor.u32 %v6187_v21, %v6177_v6  ;;  %v6179_v22 = vshrl.u32 %v11282_v11, 16  ;;  %v6039_v11 = vld [vmem:[#allocation2 + $0x118] sm:$0xff] }
 0x246   : > { %v3262_v19 = vshrl.u32 %v3004_v60, 16  ;;  %v3265_v21 = vshll.u32 %v3004_v60, 16  ;;  %v6085_v47 = vpack.c.bf16 %v11167_v50, %v6039_v11 }
 0x247   : > { %6544 = vmatmul.mubr.bf16.vlgmr.msra.gmra.mrb[0].mxu0 %v6134_v0  ;;  %v6030_v0 = vld [vmem:[#allocation2 + $0xd0] sm:$0xff]  ;;  %v6191_v14 = vshll.u32 %v11290_v33, 16  ;;  %v3233_v43 = vsel %vm1595_vm1, %v3214_v15, %v3232_v20  ;;  %v6203_v61 = vshrl.u32 %v11290_v33, 16  ;;  %v3260_v15 = vsel %vm1595_vm1, %v3241_v1, %v3259_v44 }
 0x248   : > { %7350 = vmatprep.mubr.msk.bf16.mxu0 %vm342_vm0, %v6162_v41  ;;  %v11308_v12 = vpack.c.bf16 %v6032_v27, %v6030_v0  ;;  %v3274_v41 = vshll.u32 %v3005_v13, 16  ;;  %v3007_v0 = vpack.c.bf16 %v2977_v31, %v2977_v31  ;;  %v6223_v60 = vshll.u32 %v6085_v47, 16 }
 0x249   : > { %v6193_v36 = vrot.slane %v6191_v14, 1 }
 0x24a   : > { %v6183_v58 = vshll.u32 %v11308_v12, 16  ;;  %v3276_v9 = vrot.slane %v3274_v41, 4  ;;  %v3289_v46 = vshrl.u32 %v3007_v0, 16  ;;  %v3264_v41 = vrot.slane %v3262_v19, 3 }
 0x24b   : > { %3566 = vmatmul.mubr.bf16.gmra.mrb[32].mxu1 %v3197_v48  ;;  %v6178_v48 = vsel %vm2302_vm9, %v6173_v39, %v6177_v6  ;;  %v3249_v39 = vrot.slane %v3247_v24, 4  ;;  %v6207_v6 = vshll.u32 %v11312_v51, 16  ;;  %v6205_v14 = vor.u32 %v6203_v61, %v6193_v36 }
 0x24c   : > { %7088 = vmatprep.mubr.msk.bf16.mxu1 %vm342_vm0, %v3224_v34  ;;  %v3271_v34 = vshrl.u32 %v3005_v13, 16  ;;  %v6181_v13 = vor.u32 %v6179_v22, %v6169_v57  ;;  %v6185_v4 = vrot.slane %v6183_v58, 1  ;;  %v3292_v24 = vshll.u32 %v3007_v0, 16 }
 0x24d   : > { %v3250_v27 = vor.u32 %v3249_v39, %v3246_v59  ;;  %v6209_v1 = vrot.slane %v6207_v6, 1  ;;  %v6219_v58 = vshrl.u32 %v11312_v51, 16  ;;  %v6087_v51 = vpack.c.bf16 %v11182_v16, %v11169_v35 }
 0x24e   : > { %v6186_v57 = vsel %vm2302_vm9, %v6181_v13, %v6185_v4  ;;  %v3294_v22 = vrot.slane %v3292_v24, 4 }
 0x24f   : > { %6554 = vmatmul.mubr.bf16.gmra.mrb[4].mxu0 %v6154_v25  ;;  %v6194_v25 = vsel %vm2302_vm9, %v6189_v7, %v6193_v36  ;;  %v3267_v7 = vrot.slane %v3265_v21, 4  ;;  %v6210_v39 = vsel %vm2302_vm9, %v6205_v14, %v6209_v1  ;;  %v6195_v36 = vshrl.u32 %v11308_v12, 16 }
 0x250   : > { %7351 = vmatprep.mubr.msk.bf16.mxu0 %vm342_vm0, %v6178_v48  ;;  %v6036_v48 = vld [vmem:[#allocation2 + $0x100] sm:$0xff]  ;;  %v6239_v24 = vshll.u32 %v6087_v51, 16 }
 0x251   : > { %v6197_v6 = vor.u32 %v6195_v36, %v6185_v4 }
 0x253   : > { %3576 = vmatmul.mubr.bf16.gmra.mrb[36].mxu1 %v3215_v63  ;;  %v3273_v63 = vrot.slane %v3271_v34, 3  ;;  %v3251_v34 = vsel %vm1595_vm1, %v3232_v20, %v3250_v27 }
 0x254   : > { %7089 = vmatprep.mubr.msk.bf16.mxu1 %vm342_vm0, %v3242_v42  ;;  %v6034_v42 = vld [vmem:[#allocation2 + $0xf0] sm:$0xff] }
 0x255   : > { %v3277_v33 = vor.u32 %v3276_v9, %v3273_v63  ;;  %v6082_v37 = vpack.c.bf16 %v6036_v48, %v6034_v42  ;;  %v6038_v63 = vld [vmem:[#allocation2 + $0x110] sm:$0xff]  ;;  %v6040_v9 = vld [vmem:[#allocation2 + $0x120] sm:$0xff]  ;;  %v6221_v42 = vor.u32 %v6219_v58, %v6209_v1  ;;  %v6225_v48 = vrot.slane %v6223_v60, 1 }
 0x256   : > { %v6084_v12 = vpack.c.bf16 %v6040_v9, %v6038_v63 }
 0x257   : > { %6564 = vmatmul.mubr.bf16.gmra.mrb[8].mxu0 %v6170_v23  ;;  %v3278_v59 = vsel %vm1595_vm1, %v3259_v44, %v3277_v33  ;;  %v6199_v31 = vshll.u32 %v6082_v37, 16  ;;  %v3291_v23 = vrot.slane %v3289_v46, 3  ;;  %v3268_v44 = vor.u32 %v3267_v7, %v3264_v41  ;;  %v8201_v7 = vld [vmem:[#allocation2 + $0x118] sm:$0xff] }
 0x258   : > { %7352 = vmatprep.mubr.msk.bf16.mxu0 %vm342_vm0, %v6194_v25  ;;  %v6211_v21 = vshrl.u32 %v6082_v37, 16  ;;  %v6215_v14 = vshll.u32 %v6084_v12, 16  ;;  %v6226_v4 = vsel %vm2302_vm9, %v6221_v42, %v6225_v48  ;;  %v6235_v46 = vshrl.u32 %v6085_v47, 16 }
 0x259   : > { %v3295_v25 = vor.u32 %v3294_v22, %v3291_v23  ;;  %v3269_v13 = vsel %vm1595_vm1, %v3250_v27, %v3268_v44  ;;  %v6088_v22 = vpack.c.bf16 %v11230_v3, %v11193_v45  ;;  %v6090_v3 = vpack.c.bf16 %v11256_v38, %v11232_v8 }
 0x25a   : > { %v6217_v16 = vrot.slane %v6215_v14, 1  ;;  %v6237_v37 = vor.u32 %v6235_v46, %v6225_v48  ;;  %v6093_v48 = vpack.c.bf16 %v11269_v5, %v11238_v62  ;;  %v6092_v62 = vpack.c.bf16 %v11284_v28, %v11258_v10 }
 0x25b   : > { %3586 = vmatmul.mubr.bf16.gmra.mrb[40].mxu1 %v3233_v43  ;;  %v3006_v43 = vpack.c.bf16 %v2976_v52, %v2976_v52  ;;  %v3296_v52 = vsel %vm1595_vm1, %v3277_v33, %v3295_v25  ;;  %v6089_v33 = vpack.c.bf16 %v11209_v17, %v11184_v49 }
 0x25c   : > { %7090 = vmatprep.mubr.msk.bf16.mxu1 %vm342_vm0, %v3260_v15  ;;  %v6201_v15 = vrot.slane %v6199_v31, 1  ;;  %v6251_v31 = vshrl.u32 %v6087_v51, 16 }
 0x25d   : > { %v3280_v20 = vshrl.u32 %v3006_v43, 16  ;;  %v3283_v61 = vshll.u32 %v3006_v43, 16  ;;  %v3699_v43 = vpack.c.bf16 %v11167_v50, %v8201_v7  ;;  %v6255_v23 = vshll.u32 %v6089_v33, 16 }
 0x25e   : > { %v6202_v19 = vsel %vm2302_vm9, %v6197_v6, %v6201_v15  ;;  %v6213_v35 = vor.u32 %v6211_v21, %v6201_v15  ;;  %v6091_v50 = vpack.c.bf16 %v11236_v56, %v11211_v30  ;;  %v11933_v15 = vld [vmem:[#allocation35_spill] sm:$0xff]  ;;  %v6263_v21 = vshll.u32 %v6090_v3, 16 }
 0x25f   : > { %6574 = vmatmul.mubr.bf16.gmra.mrb[12].mxu0 %v6186_v57  ;;  %v3282_v0 = vrot.slane %v3280_v20, 3  ;;  %v3285_v11 = vrot.slane %v3283_v61, 4  ;;  %v6241_v57 = vrot.slane %v6239_v24, 1  ;;  %v6257_v60 = vrot.slane %v6255_v23, 1 }
 0x260   : > { %7353 = vmatprep.mubr.msk.bf16.mxu0 %vm342_vm0, %v6210_v39  ;;  %v6218_v41 = vsel %vm2302_vm9, %v6213_v35, %v6217_v16  ;;  %v6247_v20 = vshll.u32 %v6088_v22, 16  ;;  %v6271_v6 = vshll.u32 %v6091_v50, 16  ;;  %v6283_v14 = vshrl.u32 %v6091_v50, 16 }
 0x261   : > { %v3286_v1 = vor.u32 %v3285_v11, %v3282_v0  ;;  %v6242_v36 = vsel %vm2302_vm9, %v6237_v37, %v6241_v57  ;;  %v6253_v58 = vor.u32 %v6251_v31, %v6241_v57  ;;  %v8202_v0 = vld [vmem:[#allocation2 + $0x130] sm:$0xff]  ;;  %v6265_v38 = vrot.slane %v6263_v21, 1 }
 0x262   : > { %v6249_v30 = vrot.slane %v6247_v20, 1  ;;  %v6273_v42 = vrot.slane %v6271_v6, 1  ;;  %v3700_v11 = vpack.c.bf16 %v11191_v55, %v8202_v0  ;;  %v6275_v24 = vshrl.u32 %v6090_v3, 16 }
 0x263   : > { %3596 = vmatmul.mubr.bf16.gmra.mrb[44].mxu1 %v3251_v34  ;;  %v6042_v34 = vld [vmem:[#allocation2 + $0x130] sm:$0xff]  ;;  %v3287_v47 = vsel %vm1595_vm1, %v3268_v44, %v3286_v1  ;;  %v6258_v61 = vsel %vm2302_vm9, %v6253_v58, %v6257_v60  ;;  %v6267_v44 = vshrl.u32 %v6089_v33, 16  ;;  %v6299_v35 = vshrl.u32 %v6093_v48, 16 }
 0x264   : > { %7091 = vmatprep.mubr.msk.bf16.mxu1 %vm342_vm0, %v3278_v59  ;;  %v6086_v27 = vpack.c.bf16 %v11191_v55, %v6042_v34  ;;  %v6227_v59 = vshrl.u32 %v6084_v12, 16  ;;  %v6285_v55 = vor.u32 %v6283_v14, %v6273_v42  ;;  %v6279_v34 = vshll.u32 %v6092_v62, 16 }
 0x265   : > { %v6269_v56 = vor.u32 %v6267_v44, %v6257_v60  ;;  %v6277_v10 = vor.u32 %v6275_v24, %v6265_v38  ;;  %v6327_v12 = vshll.u32 %v11241_v29, 16 }
 0x266   : > { %v6231_v39 = vshll.u32 %v6086_v27, 16  ;;  %v6229_v49 = vor.u32 %v6227_v59, %v6217_v16  ;;  %v6243_v9 = vshrl.u32 %v6086_v27, 16  ;;  %v6065_v27 = vld [vmem:[#allocation2 + $0x1e8] sm:$0xff]  ;;  %v6281_v28 = vrot.slane %v6279_v34, 1 }
 0x267   : > { %6584 = vmatmul.mubr.bf16.gmra.mrb[16].mxu0 %v6202_v19  ;;  %v6259_v19 = vshrl.u32 %v6088_v22, 16  ;;  %v6097_v57 = vpack.c.bf16 %v6065_v27, %v11294_v18 }
 0x268   : > { %7354 = vmatprep.mubr.msk.bf16.mxu0 %vm342_vm0, %v6226_v4  ;;  %v6233_v17 = vrot.slane %v6231_v39, 1  ;;  %v6095_v4 = vpack.c.bf16 %v11292_v26, %v11271_v2  ;;  %v6094_v2 = vpack.c.bf16 %v11314_v32, %v11286_v40  ;;  %v6064_v39 = vld [vmem:[#allocation2 + $0x1e0] sm:$0xff] }
 0x269   : > { %v6261_v8 = vor.u32 %v6259_v19, %v6249_v30  ;;  %v6319_v59 = vshll.u32 %v6097_v57, 16  ;;  %v6096_v18 = vpack.c.bf16 %v6064_v39, %v11316_v53  ;;  %v6339_v19 = vshrl.u32 %v11241_v29, 16 }
 0x26a   : > { %v6234_v63 = vsel %vm2302_vm9, %v6229_v49, %v6233_v17  ;;  %v6245_v45 = vor.u32 %v6243_v9, %v6233_v17  ;;  %v6303_v16 = vshll.u32 %v6095_v4, 16  ;;  %v6071_v9 = vld [vmem:[#allocation2 + $0x218] sm:$0x1] }
 0x26b   : > { %3606 = vmatmul.mubr.bf16.gmra.mrb[48].mxu1 %v3269_v13  ;;  %v6266_v46 = vsel %vm2302_vm9, %v6261_v8, %v6265_v38  ;;  %v6321_v23 = vrot.slane %v6319_v59, 1  ;;  %v6311_v58 = vshll.u32 %v6096_v18, 16 }
 0x26c   : > { %7092 = vmatprep.mubr.msk.bf16.mxu1 %vm342_vm0, %v3296_v52  ;;  %v6250_v13 = vsel %vm2302_vm9, %v6245_v45, %v6249_v30  ;;  %v6287_v52 = vshll.u32 %v6093_v48, 16  ;;  %v6305_v37 = vrot.slane %v6303_v16, 1 }
 0x26d   : > { %v6313_v20 = vrot.slane %v6311_v58, 1 }
 0x26e   : > { %v6289_v5 = vrot.slane %v6287_v52, 1 }
 0x26f   : > { %6594 = vmatmul.mubr.bf16.gmra.mrb[20].mxu0 %v6218_v41  ;;  %v6295_v41 = vshll.u32 %v6094_v2, 16 }
 0x270   : > { %7355 = vmatprep.mubr.msk.bf16.mxu0 %vm342_vm0, %v6242_v36  ;;  %v6290_v1 = vsel %vm2302_vm9, %v6285_v55, %v6289_v5  ;;  %v6301_v26 = vor.u32 %v6299_v35, %v6289_v5  ;;  %v6067_v36 = vld [vmem:[#allocation2 + $0x1f8] sm:$0xff] }
 0x271   : > { %v6297_v32 = vrot.slane %v6295_v41, 1  ;;  %v6099_v49 = vpack.c.bf16 %v11203_v54, %v6067_v36  ;;  %v6101_v54 = vpack.c.bf16 %v6071_v9, %v6071_v9 }
 0x272   : > { %v6306_v7 = vsel %vm2302_vm9, %v6301_v26, %v6305_v37 }
 0x273   : > { %3616 = vmatmul.mubr.bf16.gmra.mrb[52].mxu1 %v3287_v47  ;;  %v6291_v47 = vshrl.u32 %v6092_v62, 16  ;;  %v6347_v45 = vshrl.u32 %v6099_v49, 16  ;;  %v6351_v30 = vshll.u32 %v6101_v54, 16 }
 0x274   : > { %7140 = vmatprep.mubr.msk.bf16.mxu1 %vm342_vm0, %v3699_v43  ;;  %v6315_v43 = vshrl.u32 %v6095_v4, 16 }
 0x275   : > { %v6293_v40 = vor.u32 %v6291_v47, %v6281_v28 }
 0x276   : > { %v6317_v31 = vor.u32 %v6315_v43, %v6305_v37 }
 0x277   : > { %6604 = vmatmul.mubr.bf16.gmra.mrb[24].mxu0 %v6234_v63  ;;  %v6298_v17 = vsel %vm2302_vm9, %v6293_v40, %v6297_v32  ;;  %v6335_v63 = vshll.u32 %v6099_v49, 16 }
 0x278   : > { %7356 = vmatprep.mubr.msk.bf16.mxu0 %vm342_vm0, %v6258_v61  ;;  %v6322_v60 = vsel %vm2302_vm9, %v6317_v31, %v6321_v23 }
 0x279   : > { %v6337_v44 = vrot.slane %v6335_v63, 1 }
 0x27b   : > { %8265 = vmatmul.mubr.msk.bf16.vlgmr.msra.gmra.mrb[28].mxu1 %vm11936_vm12, %v11933_v15  ;;  %v6323_v15 = vshrl.u32 %v6096_v18, 16  ;;  %v6349_v0 = vor.u32 %v6347_v45, %v6337_v44 }
 0x27c   : > { %7141 = vmatprep.mubr.msk.bf16.mxu1 %vm342_vm0, %v6087_v51  ;;  %v6274_v51 = vsel %vm2302_vm9, %v6269_v56, %v6273_v42  ;;  %v6329_v42 = vrot.slane %v6327_v12, 1 }
 0x27d   : > { %v6325_v56 = vor.u32 %v6323_v15, %v6313_v20 }
 0x27e   : > { %v6341_v14 = vor.u32 %v6339_v19, %v6329_v42 }
 0x27f   : > { %6614 = vmatmul.mubr.bf16.gmra.mrb[28].mxu0 %v6250_v13  ;;  %v6330_v13 = vsel %vm2302_vm9, %v6325_v56, %v6329_v42 }
 0x280   : > { %7357 = vmatprep.mubr.msk.bf16.mxu0 %vm342_vm0, %v6274_v51 }
 0x283   : > { %3988 = vmatmul.mubr.bf16.gmra.mrb[32].mxu1 %v3700_v11  ;;  %v6353_v11 = vrot.slane %v6351_v30, 1 }
 0x284   : > { %7142 = vmatprep.mubr.msk.bf16.mxu1 %vm342_vm0, %v6089_v33  ;;  %v6282_v33 = vsel %vm2302_vm9, %v6277_v10, %v6281_v28 }
 0x285   : > { %v6354_v51 = vsel %vm2302_vm9, %v6349_v0, %v6353_v11 }
 0x287   : > { %6624 = vmatmul.mubr.bf16.gmra.mrb[32].mxu0 %v6266_v46 }
 0x288   : > { %7358 = vmatprep.mubr.msk.bf16.mxu0 %vm342_vm0, %v6290_v1 }
 0x28b   : > { %3998 = vmatmul.mubr.bf16.gmra.mrb[36].mxu1 %v6088_v22  ;;  %v6307_v22 = vshrl.u32 %v6094_v2, 16 }
 0x28c   : > { %7143 = vmatprep.mubr.msk.bf16.mxu1 %vm342_vm0, %v6091_v50  ;;  %v6331_v50 = vshrl.u32 %v6097_v57, 16 }
 0x28d   : > { %v6309_v53 = vor.u32 %v6307_v22, %v6297_v32 }
 0x28e   : > { %v6333_v61 = vor.u32 %v6331_v50, %v6321_v23 }
 0x28f   : > { %6634 = vmatmul.mubr.bf16.gmra.mrb[36].mxu0 %v6282_v33  ;;  %v6314_v6 = vsel %vm2302_vm9, %v6309_v53, %v6313_v20 }
 0x290   : > { %7359 = vmatprep.mubr.msk.bf16.mxu0 %vm342_vm0, %v6306_v7  ;;  %v6338_v25 = vsel %vm2302_vm9, %v6333_v61, %v6337_v44 }
 0x293   : > { %4008 = vmatmul.mubr.bf16.gmra.mrb[40].mxu1 %v6090_v3  ;;  %v6070_v3 = vld [vmem:[#allocation2 + $0x210] sm:$0x1] }
 0x294   : > { %7144 = vmatprep.mubr.msk.bf16.mxu1 %vm342_vm0, %v6093_v48  ;;  %v6100_v48 = vpack.c.bf16 %v6070_v3, %v6070_v3 }
 0x296   : > { %v6343_v21 = vshll.u32 %v6100_v48, 16 }
 0x297   : > { %6644 = vmatmul.mubr.bf16.gmra.mrb[40].mxu0 %v6298_v17 }
 0x298   : > { %7360 = vmatprep.mubr.msk.bf16.mxu0 %vm342_vm0, %v6322_v60  ;;  %v6345_v52 = vrot.slane %v6343_v21, 1 }
 0x29a   : > { %v6346_v8 = vsel %vm2302_vm9, %v6341_v14, %v6345_v52 }
 0x29b   : > { %4018 = vmatmul.mubr.bf16.gmra.mrb[44].mxu1 %v6092_v62 }
 0x29c   : > { %7145 = vmatprep.mubr.msk.bf16.mxu1 %vm342_vm0, %v6095_v4 }
 0x29f   : > { %6654 = vmatmul.mubr.bf16.gmra.mrb[44].mxu0 %v6314_v6 }
 0x2a0   : > { %7361 = vmatprep.mubr.msk.bf16.mxu0 %vm342_vm0, %v6338_v25 }
 0x2a3   : > { %4028 = vmatmul.mubr.bf16.gmra.mrb[48].mxu1 %v6094_v2 }
 0x2a4   : > { %7146 = vmatprep.mubr.msk.bf16.mxu1 %vm342_vm0, %v6097_v57 }
 0x2a7   : > { %6664 = vmatmul.mubr.bf16.gmra.mrb[48].mxu0 %v6330_v13 }
 0x2a8   : > { %7362 = vmatprep.mubr.msk.bf16.mxu0 %vm342_vm0, %v6354_v51 }
 0x2ab   : > { %4038 = vmatmul.mubr.bf16.gmra.mrb[52].mxu1 %v6096_v18 }
 0x2af   : > { %6674 = vmatmul.mubr.bf16.gmra.mrb[52].mxu0 %v6346_v8 }
 0x2de   : > { %v3487_v38 = vpop.f32.mrb[0].mxu1 }
 0x2df   : > { %v3489_v62 = vpop.f32.mrb[1].mxu1 }
 0x2e0   : > { %v3491_v55 = vpop.f32.mrb[2].mxu1 }
 0x2e1   : > { %v3493_v5 = vpop.f32.mrb[3].mxu1 }
 0x2e6   : > { %v3497_v4 = vpop.f32.mrb[4].mxu1 }
 0x2e7   : > { %v3499_v46 = vpop.f32.mrb[5].mxu1 }
 0x2e8   : > { %v3501_v24 = vpop.f32.mrb[6].mxu1 }
 0x2e9   : > { %v3503_v29 = vpop.f32.mrb[7].mxu1 }
 0x2ee   : > { %v3507_v34 = vpop.f32.mrb[8].mxu1 }
 0x2ef   : > { %v3509_v1 = vpop.f32.mrb[9].mxu1 }
 0x2f0   : > { %v3511_v35 = vpop.f32.mrb[10].mxu1 }
 0x2f1   : > { %v3513_v16 = vpop.f32.mrb[11].mxu1 }
 0x2f6   : > { %v3517_v27 = vpop.f32.mrb[12].mxu1 }
 0x2f7   : > { %v3519_v10 = vpop.f32.mrb[13].mxu1 }
 0x2f8   : > { %v3521_v28 = vpop.f32.mrb[14].mxu1 }
 0x2f9   : > { %v3523_v2 = vpop.f32.mrb[15].mxu1 }
 0x2fe   : > { %v3527_v26 = vpop.f32.mrb[16].mxu1 }
 0x2ff   : > { %v11410_v37 = vpop.f32.mrb[17].mxu1 }
 0x300   : > { %v11412_v57 = vpop.f32.mrb[18].mxu1 }
 0x301   : > { %v11414_v33 = vpop.f32.mrb[19].mxu1 }
 0x306   : > { %v11416_v47 = vpop.f32.mrb[20].mxu1 }
 0x307   : > { %v11418_v41 = vpop.f32.mrb[21].mxu1 }
 0x308   : > { %v11420_v7 = vpop.f32.mrb[22].mxu1 }
 0x309   : > { %v11422_v43 = vpop.f32.mrb[23].mxu1 }
 0x30e   : > { %v11424_v59 = vpop.f32.mrb[24].mxu1 }
 0x30f   : > { %v11426_v39 = vpop.f32.mrb[25].mxu1 }
 0x310   : > { %v11428_v36 = vpop.f32.mrb[26].mxu1 }
 0x311   : > { %v11430_v40 = vpop.f32.mrb[27].mxu1 }
 0x31a   : > { %v6545_v32 = vpop.f32.mrb[0].mxu0 }
 0x31b   : > { %v7385_v18 = vadd.f32 %v6545_v32, %v3487_v38  ;;  %v6547_v31 = vpop.f32.mrb[1].mxu0 }
 0x31c   : > { %v7386_v23 = vadd.f32 %v6547_v31, %v3489_v62  ;;  %v6549_v49 = vpop.f32.mrb[2].mxu0 }
 0x31d   : > { %6740 = vst [vmem:[%s11437_s8] sm:$0xff] %v7385_v18  ;;  %v7387_v17 = vadd.f32 %v6549_v49, %v3491_v55  ;;  %v6551_v22 = vpop.f32.mrb[3].mxu0 }
 0x31e   : > { %6741 = vst.msk [vmem:[%s11437_s8 + $0x8] sm:$0xff] %vm342_vm0, %v7386_v23  ;;  %v7388_v58 = vadd.f32 %v6551_v22, %v3493_v5 }
 0x31f   : > { %6742 = vst [vmem:[%s11437_s8 + $0x10] sm:$0xff] %v7387_v17 }
 0x320   : > { %6743 = vst.msk [vmem:[%s11437_s8 + $0x18] sm:$0xff] %vm342_vm0, %v7388_v58 }
 0x322   : > { %v6555_v60 = vpop.f32.mrb[4].mxu0 }
 0x323   : > { %v7389_v50 = vadd.f32 %v6555_v60, %v3497_v4  ;;  %v6557_v63 = vpop.f32.mrb[5].mxu0 }
 0x324   : > { %v7390_v9 = vadd.f32 %v6557_v63, %v3499_v46  ;;  %v6559_v53 = vpop.f32.mrb[6].mxu0 }
 0x325   : > { %6744 = vst [vmem:[%s11437_s8 + $0x20] sm:$0xff] %v7389_v50  ;;  %v7391_v20 = vadd.f32 %v6559_v53, %v3501_v24  ;;  %v6561_v61 = vpop.f32.mrb[7].mxu0 }
 0x326   : > { %6745 = vst.msk [vmem:[%s11437_s8 + $0x28] sm:$0xff] %vm342_vm0, %v7390_v9  ;;  %v7392_v44 = vadd.f32 %v6561_v61, %v3503_v29 }
 0x327   : > { %6746 = vst [vmem:[%s11437_s8 + $0x30] sm:$0xff] %v7391_v20 }
 0x328   : > { %6747 = vst.msk [vmem:[%s11437_s8 + $0x38] sm:$0xff] %vm342_vm0, %v7392_v44 }
 0x32a   : > { %v6565_v54 = vpop.f32.mrb[8].mxu0 }
 0x32b   : > { %v7393_v6 = vadd.f32 %v6565_v54, %v3507_v34  ;;  %v6567_v15 = vpop.f32.mrb[9].mxu0 }
 0x32c   : > { %v7394_v12 = vadd.f32 %v6567_v15, %v3509_v1  ;;  %v6569_v25 = vpop.f32.mrb[10].mxu0 }
 0x32d   : > { %6748 = vst [vmem:[%s11437_s8 + $0x40] sm:$0xff] %v7393_v6  ;;  %v7395_v45 = vadd.f32 %v6569_v25, %v3511_v35  ;;  %v6571_v30 = vpop.f32.mrb[11].mxu0 }
 0x32e   : > { %6749 = vst.msk [vmem:[%s11437_s8 + $0x48] sm:$0xff] %vm342_vm0, %v7394_v12  ;;  %v7396_v3 = vadd.f32 %v6571_v30, %v3513_v16 }
 0x32f   : > { %6750 = vst [vmem:[%s11437_s8 + $0x50] sm:$0xff] %v7395_v45 }
 0x330   : > { %6751 = vst.msk [vmem:[%s11437_s8 + $0x58] sm:$0xff] %vm342_vm0, %v7396_v3 }
 0x332   : > { %v6575_v56 = vpop.f32.mrb[12].mxu0 }
 0x333   : > { %v7397_v42 = vadd.f32 %v6575_v56, %v3517_v27  ;;  %v6577_v48 = vpop.f32.mrb[13].mxu0 }
 0x334   : > { %v7398_v0 = vadd.f32 %v6577_v48, %v3519_v10  ;;  %v6579_v11 = vpop.f32.mrb[14].mxu0 }
 0x335   : > { %6752 = vst [vmem:[%s11437_s8 + $0x60] sm:$0xff] %v7397_v42  ;;  %v7399_v13 = vadd.f32 %v6579_v11, %v3521_v28  ;;  %v6581_v19 = vpop.f32.mrb[15].mxu0 }
 0x336   : > { %6753 = vst.msk [vmem:[%s11437_s8 + $0x68] sm:$0xff] %vm342_vm0, %v7398_v0  ;;  %v7400_v21 = vadd.f32 %v6581_v19, %v3523_v2 }
 0x337   : > { %6754 = vst [vmem:[%s11437_s8 + $0x70] sm:$0xff] %v7399_v13 }
 0x338   : > { %6755 = vst.msk [vmem:[%s11437_s8 + $0x78] sm:$0xff] %vm342_vm0, %v7400_v21 }
 0x33a   : > { %v6585_v51 = vpop.f32.mrb[16].mxu0 }
 0x33b   : > { %v7401_v14 = vadd.f32 %v6585_v51, %v3527_v26  ;;  %v6587_v52 = vpop.f32.mrb[17].mxu0 }
 0x33c   : > { %v7402_v8 = vadd.f32 %v6587_v52, %v11410_v37  ;;  %v6589_v38 = vpop.f32.mrb[18].mxu0 }
 0x33d   : > { %6756 = vst [vmem:[%s11437_s8 + $0x80] sm:$0xff] %v7401_v14  ;;  %v7403_v62 = vadd.f32 %v6589_v38, %v11412_v57  ;;  %v6591_v55 = vpop.f32.mrb[19].mxu0 }
 0x33e   : > { %6757 = vst.msk [vmem:[%s11437_s8 + $0x88] sm:$0xff] %vm342_vm0, %v7402_v8  ;;  %v7404_v5 = vadd.f32 %v6591_v55, %v11414_v33 }
 0x33f   : > { %6758 = vst [vmem:[%s11437_s8 + $0x90] sm:$0xff] %v7403_v62 }
 0x340   : > { %6759 = vst.msk [vmem:[%s11437_s8 + $0x98] sm:$0xff] %vm342_vm0, %v7404_v5 }
 0x342   : > { %v6595_v4 = vpop.f32.mrb[20].mxu0 }
 0x343   : > { %v7405_v46 = vadd.f32 %v6595_v4, %v11416_v47  ;;  %v6597_v24 = vpop.f32.mrb[21].mxu0 }
 0x344   : > { %v7406_v29 = vadd.f32 %v6597_v24, %v11418_v41  ;;  %v6599_v34 = vpop.f32.mrb[22].mxu0 }
 0x345   : > { %6760 = vst [vmem:[%s11437_s8 + $0xa0] sm:$0xff] %v7405_v46  ;;  %v7407_v1 = vadd.f32 %v6599_v34, %v11420_v7  ;;  %v6601_v35 = vpop.f32.mrb[23].mxu0 }
 0x346   : > { %6761 = vst.msk [vmem:[%s11437_s8 + $0xa8] sm:$0xff] %vm342_vm0, %v7406_v29  ;;  %v7408_v16 = vadd.f32 %v6601_v35, %v11422_v43 }
 0x347   : > { %6762 = vst [vmem:[%s11437_s8 + $0xb0] sm:$0xff] %v7407_v1 }
 0x348   : > { %6763 = vst.msk [vmem:[%s11437_s8 + $0xb8] sm:$0xff] %vm342_vm0, %v7408_v16 }
 0x34a   : > { %v6605_v10 = vpop.f32.mrb[24].mxu0 }
 0x34b   : > { %v7409_v28 = vadd.f32 %v6605_v10, %v11424_v59  ;;  %v6607_v26 = vpop.f32.mrb[25].mxu0 }
 0x34c   : > { %v7410_v37 = vadd.f32 %v6607_v26, %v11426_v39  ;;  %v6609_v33 = vpop.f32.mrb[26].mxu0 }
 0x34d   : > { %6764 = vst [vmem:[%s11437_s8 + $0xc0] sm:$0xff] %v7409_v28  ;;  %v7411_v47 = vadd.f32 %v6609_v33, %v11428_v36  ;;  %v6611_v7 = vpop.f32.mrb[27].mxu0 }
 0x34e   : > { %v3979_v27 = vpop.f32.mrb[28].mxu1  ;;  %6765 = vst.msk [vmem:[%s11437_s8 + $0xc8] sm:$0xff] %vm342_vm0, %v7410_v37  ;;  %v7412_v43 = vadd.f32 %v6611_v7, %v11430_v40 }
 0x34f   : > { %v3981_v2 = vpop.f32.mrb[29].mxu1  ;;  %6766 = vst [vmem:[%s11437_s8 + $0xd0] sm:$0xff] %v7411_v47 }
 0x350   : > { %v3983_v57 = vpop.f32.mrb[30].mxu1  ;;  %6767 = vst.msk [vmem:[%s11437_s8 + $0xd8] sm:$0xff] %vm342_vm0, %v7412_v43 }
 0x351   : > { %v3985_v41 = vpop.f32.mrb[31].mxu1 }
 0x352   : > { %v6615_v39 = vpop.f32.mrb[28].mxu0 }
 0x353   : > { %v7413_v32 = vadd.f32 %v6615_v39, %v3979_v27  ;;  %v6617_v31 = vpop.f32.mrb[29].mxu0 }
 0x354   : > { %v7414_v23 = vadd.f32 %v6617_v31, %v3981_v2  ;;  %v6619_v36 = vpop.f32.mrb[30].mxu0 }
 0x355   : > { %6768 = vst [vmem:[%s11437_s8 + $0xe0] sm:$0xff] %v7413_v32  ;;  %v7415_v17 = vadd.f32 %v6619_v36, %v3983_v57  ;;  %v6621_v58 = vpop.f32.mrb[31].mxu0 }
 0x356   : > { %v3989_v59 = vpop.f32.mrb[32].mxu1  ;;  %6769 = vst.msk [vmem:[%s11437_s8 + $0xe8] sm:$0xff] %vm342_vm0, %v7414_v23  ;;  %v7416_v40 = vadd.f32 %v6621_v58, %v3985_v41 }
 0x357   : > { %v3991_v18 = vpop.f32.mrb[33].mxu1  ;;  %6770 = vst [vmem:[%s11437_s8 + $0xf0] sm:$0xff] %v7415_v17 }
 0x358   : > { %v3993_v49 = vpop.f32.mrb[34].mxu1  ;;  %6771 = vst.msk [vmem:[%s11437_s8 + $0xf8] sm:$0xff] %vm342_vm0, %v7416_v40 }
 0x359   : > { %v3995_v22 = vpop.f32.mrb[35].mxu1 }
 0x35a   : > { %v6625_v50 = vpop.f32.mrb[32].mxu0 }
 0x35b   : > { %v7417_v63 = vadd.f32 %v6625_v50, %v3989_v59  ;;  %v6627_v53 = vpop.f32.mrb[33].mxu0 }
 0x35c   : > { %v7418_v20 = vadd.f32 %v6627_v53, %v3991_v18  ;;  %v6629_v44 = vpop.f32.mrb[34].mxu0 }
 0x35d   : > { %6772 = vst [vmem:[%s11437_s8 + $0x100] sm:$0xff] %v7417_v63  ;;  %v7419_v54 = vadd.f32 %v6629_v44, %v3993_v49  ;;  %v6631_v15 = vpop.f32.mrb[35].mxu0 }
 0x35e   : > { %v3999_v60 = vpop.f32.mrb[36].mxu1  ;;  %6773 = vst.msk [vmem:[%s11437_s8 + $0x108] sm:$0xff] %vm342_vm0, %v7418_v20  ;;  %v7420_v12 = vadd.f32 %v6631_v15, %v3995_v22 }
 0x35f   : > { %v4001_v9 = vpop.f32.mrb[37].mxu1  ;;  %6774 = vst [vmem:[%s11437_s8 + $0x110] sm:$0xff] %v7419_v54 }
 0x360   : > { %v4003_v61 = vpop.f32.mrb[38].mxu1  ;;  %6775 = vst.msk [vmem:[%s11437_s8 + $0x118] sm:$0xff] %vm342_vm0, %v7420_v12 }
 0x361   : > { %v4005_v6 = vpop.f32.mrb[39].mxu1 }
 0x362   : > { %v6635_v45 = vpop.f32.mrb[36].mxu0 }
 0x363   : > { %v7421_v30 = vadd.f32 %v6635_v45, %v3999_v60  ;;  %v6637_v56 = vpop.f32.mrb[37].mxu0 }
 0x364   : > { %v7422_v42 = vadd.f32 %v6637_v56, %v4001_v9  ;;  %v6639_v0 = vpop.f32.mrb[38].mxu0 }
 0x365   : > { %6776 = vst [vmem:[%s11437_s8 + $0x120] sm:$0xff] %v7421_v30  ;;  %v7423_v11 = vadd.f32 %v6639_v0, %v4003_v61  ;;  %v6641_v19 = vpop.f32.mrb[39].mxu0 }
 0x366   : > { %v4009_v25 = vpop.f32.mrb[40].mxu1  ;;  %6777 = vst.msk [vmem:[%s11437_s8 + $0x128] sm:$0xff] %vm342_vm0, %v7422_v42  ;;  %v7424_v21 = vadd.f32 %v6641_v19, %v4005_v6 }
 0x367   : > { %v4011_v3 = vpop.f32.mrb[41].mxu1  ;;  %6778 = vst [vmem:[%s11437_s8 + $0x130] sm:$0xff] %v7423_v11 }
 0x368   : > { %v4013_v48 = vpop.f32.mrb[42].mxu1  ;;  %6779 = vst.msk [vmem:[%s11437_s8 + $0x138] sm:$0xff] %vm342_vm0, %v7424_v21 }
 0x369   : > { %v4015_v13 = vpop.f32.mrb[43].mxu1 }
 0x36a   : > { %v6645_v14 = vpop.f32.mrb[40].mxu0 }
 0x36b   : > { %v7425_v52 = vadd.f32 %v6645_v14, %v4009_v25  ;;  %v6647_v38 = vpop.f32.mrb[41].mxu0 }
 0x36c   : > { %v7426_v62 = vadd.f32 %v6647_v38, %v4011_v3  ;;  %v6649_v5 = vpop.f32.mrb[42].mxu0 }
 0x36d   : > { %6780 = vst [vmem:[%s11437_s8 + $0x140] sm:$0xff] %v7425_v52  ;;  %v7427_v4 = vadd.f32 %v6649_v5, %v4013_v48  ;;  %v6651_v24 = vpop.f32.mrb[43].mxu0 }
 0x36e   : > { %v4019_v51 = vpop.f32.mrb[44].mxu1  ;;  %6781 = vst.msk [vmem:[%s11437_s8 + $0x148] sm:$0xff] %vm342_vm0, %v7426_v62  ;;  %v7428_v29 = vadd.f32 %v6651_v24, %v4015_v13 }
 0x36f   : > { %v4021_v8 = vpop.f32.mrb[45].mxu1  ;;  %6782 = vst [vmem:[%s11437_s8 + $0x150] sm:$0xff] %v7427_v4 }
 0x370   : > { %v4023_v55 = vpop.f32.mrb[46].mxu1  ;;  %6783 = vst.msk [vmem:[%s11437_s8 + $0x158] sm:$0xff] %vm342_vm0, %v7428_v29 }
 0x371   : > { %v4025_v46 = vpop.f32.mrb[47].mxu1 }
 0x372   : > { %v6655_v1 = vpop.f32.mrb[44].mxu0 }
 0x373   : > { %v7429_v35 = vadd.f32 %v6655_v1, %v4019_v51  ;;  %v6657_v27 = vpop.f32.mrb[45].mxu0 }
 0x374   : > { %v7430_v10 = vadd.f32 %v6657_v27, %v4021_v8  ;;  %v6659_v2 = vpop.f32.mrb[46].mxu0 }
 0x375   : > { %6784 = vst [vmem:[%s11437_s8 + $0x160] sm:$0xff] %v7429_v35  ;;  %v7431_v26 = vadd.f32 %v6659_v2, %v4023_v55  ;;  %v6661_v57 = vpop.f32.mrb[47].mxu0 }
 0x376   : > { %v4029_v34 = vpop.f32.mrb[48].mxu1  ;;  %6785 = vst.msk [vmem:[%s11437_s8 + $0x168] sm:$0xff] %vm342_vm0, %v7430_v10  ;;  %v7432_v33 = vadd.f32 %v6661_v57, %v4025_v46 }
 0x377   : > { %v4031_v16 = vpop.f32.mrb[49].mxu1  ;;  %6786 = vst [vmem:[%s11437_s8 + $0x170] sm:$0xff] %v7431_v26 }
 0x378   : > { %v4033_v28 = vpop.f32.mrb[50].mxu1  ;;  %6787 = vst.msk [vmem:[%s11437_s8 + $0x178] sm:$0xff] %vm342_vm0, %v7432_v33 }
 0x379   : > { %v4035_v37 = vpop.f32.mrb[51].mxu1 }
 0x37a   : > { %v6665_v41 = vpop.f32.mrb[48].mxu0 }
 0x37b   : > { %v7433_v7 = vadd.f32 %v6665_v41, %v4029_v34  ;;  %v6667_v59 = vpop.f32.mrb[49].mxu0 }
 0x37c   : > { %v7434_v39 = vadd.f32 %v6667_v59, %v4031_v16  ;;  %v6669_v18 = vpop.f32.mrb[50].mxu0 }
 0x37d   : > { %6788 = vst [vmem:[%s11437_s8 + $0x180] sm:$0xff] %v7433_v7  ;;  %v7435_v31 = vadd.f32 %v6669_v18, %v4033_v28  ;;  %v6671_v49 = vpop.f32.mrb[51].mxu0 }
 0x37e   : > { %v4039_v47 = vpop.f32.mrb[52].mxu1  ;;  %6789 = vst.msk [vmem:[%s11437_s8 + $0x188] sm:$0xff] %vm342_vm0, %v7434_v39  ;;  %v7436_v36 = vadd.f32 %v6671_v49, %v4035_v37 }
 0x37f   : > { %v4041_v43 = vpop.f32.mrb[53].mxu1  ;;  %6790 = vst [vmem:[%s11437_s8 + $0x190] sm:$0xff] %v7435_v31 }
 0x380   : > { %v4043_v32 = vpop.f32.mrb[54].mxu1  ;;  %6791 = vst.msk [vmem:[%s11437_s8 + $0x198] sm:$0xff] %vm342_vm0, %v7436_v36 }
 0x381   : > { %v4045_v23 = vpop.f32.mrb[55].mxu1 }
 0x382   : > { %v6675_v17 = vpop.f32.mrb[52].mxu0 }
 0x383   : > { %v7437_v22 = vadd.f32 %v6675_v17, %v4039_v47  ;;  %v6677_v58 = vpop.f32.mrb[53].mxu0 }
 0x384   : > { %v7438_v40 = vadd.f32 %v6677_v58, %v4041_v43  ;;  %v6679_v60 = vpop.f32.mrb[54].mxu0 }
 0x385   : > { %6792 = vst [vmem:[%s11437_s8 + $0x1a0] sm:$0xff] %v7437_v22  ;;  %v7439_v50 = vadd.f32 %v6679_v60, %v4043_v32  ;;  %v6681_v63 = vpop.f32.mrb[55].mxu0 }
 0x386   : > { %6793 = vst.msk [vmem:[%s11437_s8 + $0x1a8] sm:$0xff] %vm342_vm0, %v7438_v40  ;;  %v7440_v9 = vadd.f32 %v6681_v63, %v4045_v23 }
 0x387   : > { %6794 = vst [vmem:[%s11437_s8 + $0x1b0] sm:$0xff] %v7439_v50 }
 0x388   : > { %6795 = vst.msk [vmem:[%s11437_s8 + $0x1b8] sm:$0xff] %vm342_vm0, %v7440_v9 }
 0x389 PF: > { %s14_s15 = sadd.s32 1, %s8272_s15  }
 0x38a   : > { %p11_p4 = scmp.ge.s32.totalorder %s14_s15, 4  }
 0x38c   :  { %13 = sbr.rel (!%p11_p4) target bundleno = 1 (0x1), region = 83 }

</bundles_post_ra>
